<compile_context>
chip_gen: v6e
topology: v6e:2x2x1
jax: 0.10.0
libtpu: 0.0.40
codegen_flags: <defaults>
</compile_context>

<pallas_src>
import functools

import jax
import jax.numpy as jnp
from jax.experimental import pallas as pl
from jax.experimental.pallas import tpu as pltpu


def _layernorm_f32(x, gamma, beta, eps=1e-12):
    """LayerNorm with statistics in f32; returns f32."""
    xf = x.astype(jnp.float32)
    mean = jnp.mean(xf, axis=-1, keepdims=True)
    var = jnp.mean((xf - mean) ** 2, axis=-1, keepdims=True)
    return (xf - mean) * jax.lax.rsqrt(var + eps) * gamma + beta


def encoder_classifier_kernel(
        n_heads,
        emb_ref, mask_ref, eg_ref, eb_ref,
        wq_ref, bq_ref, wk_ref, bk_ref, wv_ref, bv_ref, wo_ref, bo_ref,
        g1_ref, l1b_ref, w1_ref, f1b_ref, w2_ref, f2b_ref, g2_ref, l2b_ref,
        cw_ref, cb_ref,
        o_ref,
        x_ref):
    """One grid step = one encoder layer for one batch tile.

    x_ref (VMEM scratch) carries the bf16 residual stream across the layer
    axis.  The last layer only evaluates the [CLS] query row and feeds the
    classifier head (dropout = identity at inference).
    """
    l = pl.program_id(1)
    n_layers = pl.num_programs(1)
    Bt, S, H = x_ref.shape
    hd = H // n_heads

    # ---- first layer step of this batch tile: embedding LayerNorm ----
    @pl.when(l == 0)
    def _():
        x_ref[...] = _layernorm_f32(
            emb_ref[...], eg_ref[...], eb_ref[...]).astype(jnp.bfloat16)

    # additive padding bias kept at (Bt, 1, S); broadcast happens at the add
    bias = ((1.0 - mask_ref[...]) * -1e9)[:, None, :]

    x = x_ref[...]                       # (Bt, S, H) bf16 residual stream
    x2d = x.reshape(Bt * S, H)

    def mha(xq2, sq):
        """Multi-head attention for `sq` query rows against all S keys.

        Per-head weights are indexed on their leading axis (no lane-offset
        slicing of activations); each head's context is contracted with its
        W_o slice and accumulated -- no concat, one live context at a time.
        The softmax 1/sqrt(hd) is already folded into W_q / b_q.
        """
        attn = jnp.zeros((Bt * sq, H), jnp.float32)
        for h in range(n_heads):
            q = (jnp.dot(xq2, wq_ref[h], preferred_element_type=jnp.float32)
                 + bq_ref[h]).astype(jnp.bfloat16).reshape(Bt, sq, hd)
            k = (jnp.dot(x2d, wk_ref[h], preferred_element_type=jnp.float32)
                 + bk_ref[h]).astype(jnp.bfloat16).reshape(Bt, S, hd)
            v = (jnp.dot(x2d, wv_ref[h], preferred_element_type=jnp.float32)
                 + bv_ref[h]).astype(jnp.bfloat16).reshape(Bt, S, hd)
            s = jnp.einsum("bqd,bkd->bqk", q, k,
                           preferred_element_type=jnp.float32) + bias
            s = s - jnp.max(s, axis=-1, keepdims=True)
            p = jnp.exp(s)
            p = p * pl.reciprocal(jnp.sum(p, axis=-1, keepdims=True),
                                  approx=True)
            ctx = jnp.einsum("bqk,bkd->bqd", p.astype(jnp.bfloat16), v,
                             preferred_element_type=jnp.float32)
            attn = attn + jnp.dot(
                ctx.reshape(Bt * sq, hd).astype(jnp.bfloat16), wo_ref[h],
                preferred_element_type=jnp.float32)
        return attn + bo_ref[...]

    def ffn(x1):
        h1 = (jnp.dot(x1.astype(jnp.bfloat16), w1_ref[...],
                      preferred_element_type=jnp.float32) + f1b_ref[...])
        # TODO(synk): HF BERT uses exact erf-GELU; tanh approximation here.
        h1 = jax.nn.gelu(h1, approximate=True)
        return (jnp.dot(h1.astype(jnp.bfloat16), w2_ref[...],
                        preferred_element_type=jnp.float32) + f2b_ref[...])

    def layer(xq2, sq):
        """Attention + residual + LN + FFN + residual + LN for `sq` rows."""
        attn = mha(xq2, sq)
        x1 = _layernorm_f32(xq2.astype(jnp.float32) + attn,
                            g1_ref[...], l1b_ref[...])
        return _layernorm_f32(x1 + ffn(x1), g2_ref[...], l2b_ref[...])

    # ---- intermediate layers: update all S rows of the residual stream ----
    @pl.when(l < n_layers - 1)
    def _():
        x_ref[...] = layer(x2d, S).astype(jnp.bfloat16).reshape(Bt, S, H)

    # ---- last layer: only [CLS] feeds the classifier, so run the attention
    #      output projection / FFN / LayerNorms on the Bt CLS rows only ----
    @pl.when(l == n_layers - 1)
    def _():
        cls = layer(x[:, 0, :], 1)                       # (Bt, H) f32
        o_ref[...] = (jnp.dot(cls.astype(jnp.bfloat16), cw_ref[...],
                              preferred_element_type=jnp.float32)
                      + cb_ref[...])


# ----------------------------------------------------------------------------
# Parameters (synthetic BERT-style encoder) and forward wrapper
# ----------------------------------------------------------------------------
def init_params(key, *, vocab, max_pos, hidden, n_heads, n_layers,
                intermediate, num_classes):
    def nrm(k, shape):
        return 0.02 * jax.random.normal(k, shape, jnp.float32)

    ks = jax.random.split(key, 10)
    zeros_h = jnp.zeros((n_layers, 1, hidden), jnp.float32)
    ones_h = jnp.ones((n_layers, 1, hidden), jnp.float32)
    return {
        "word_emb": nrm(ks[0], (vocab, hidden)),
        "pos_emb": nrm(ks[1], (max_pos, hidden)),
        "type_emb": nrm(ks[2], (2, hidden)),
        "emb_ln_g": jnp.ones((1, hidden), jnp.float32),
        "emb_ln_b": jnp.zeros((1, hidden), jnp.float32),
        "wq": nrm(ks[3], (n_layers, hidden, hidden)), "bq": zeros_h,
        "wk": nrm(ks[4], (n_layers, hidden, hidden)), "bk": zeros_h,
        "wv": nrm(ks[5], (n_layers, hidden, hidden)), "bv": zeros_h,
        "wo": nrm(ks[6], (n_layers, hidden, hidden)), "bo": zeros_h,
        "ln1_g": ones_h, "ln1_b": zeros_h,
        "w1": nrm(ks[7], (n_layers, hidden, intermediate)),
        "b1": jnp.zeros((n_layers, 1, intermediate), jnp.float32),
        "w2": nrm(ks[8], (n_layers, intermediate, hidden)), "b2": zeros_h,
        "ln2_g": ones_h, "ln2_b": zeros_h,
        "cls_w": nrm(ks[9], (hidden, num_classes)),
        "cls_b": jnp.zeros((1, num_classes), jnp.float32),
    }


def product_category_classifier_forward(params, input_ids, attention_mask,
                                         *, n_heads, batch_tile=None):
    B, S = input_ids.shape
    H = params["word_emb"].shape[1]
    L = params["wq"].shape[0]
    I = params["w1"].shape[-1]
    C = params["cls_w"].shape[1]
    Cp = ((C + 127) // 128) * 128        # lane-dense classifier output width
    hd = H // n_heads
    assert H % n_heads == 0
    scale = 1.0 / float(hd) ** 0.5
    if batch_tile is None:
        batch_tile = B
    assert B % batch_tile == 0
    n_b = B // batch_tile

    # ---- embeddings: gathers stay in XLA; everything after is the kernel ----
    emb = (params["word_emb"][input_ids]
           + params["pos_emb"][:S][None, :, :]
           + params["type_emb"][0][None, None, :]).astype(jnp.bfloat16)
    mask_f = attention_mask.astype(jnp.float32)

    bf16 = lambda a: a.astype(jnp.bfloat16)

    # Per-head split of attention weights on a leading head axis so the kernel
    # selects heads by leading-axis indexing (no lane-offset slicing).  The
    # softmax 1/sqrt(hd) is folded into W_q / b_q (weight-prep time; a one-off
    # in a real deployment where weights are prepared once).
    def split_cols(w):      # (L, H, H) -> (L, nH, H, hd)
        return w.reshape(L, H, n_heads, hd).transpose(0, 2, 1, 3)

    def split_cols_b(b):    # (L, 1, H) -> (L, nH, 1, hd)
        return b.reshape(L, 1, n_heads, hd).transpose(0, 2, 1, 3)

    wq = bf16(split_cols(params["wq"] * scale))
    bq = split_cols_b(params["bq"] * scale)
    wk = bf16(split_cols(params["wk"]))
    bk = split_cols_b(params["bk"])
    wv = bf16(split_cols(params["wv"]))
    bv = split_cols_b(params["bv"])
    wo = bf16(params["wo"].reshape(L, n_heads, hd, H))   # rows h*hd:(h+1)*hd
    bo = params["bo"]

    cls_w = bf16(jnp.pad(params["cls_w"], ((0, 0), (0, Cp - C))))
    cls_b = jnp.pad(params["cls_b"], ((0, 0), (0, Cp - C)))

    inputs = (
        emb, mask_f, params["emb_ln_g"], params["emb_ln_b"],
        wq, bq, wk, bk, wv, bv, wo, bo,
        params["ln1_g"], params["ln1_b"],
        bf16(params["w1"]), params["b1"], bf16(params["w2"]), params["b2"],
        params["ln2_g"], params["ln2_b"],
        cls_w, cls_b,
    )

    # index-map helpers: grid = (batch tile index b, layer index l)
    batch3 = lambda b, l: (b, 0, 0)
    batch2 = lambda b, l: (b, 0)
    layer3 = lambda b, l: (l, 0, 0)
    layer4 = lambda b, l: (l, 0, 0, 0)
    const2 = lambda b, l: (0, 0)

    in_specs = [
        pl.BlockSpec((batch_tile, S, H), batch3),                   # emb
        pl.BlockSpec((batch_tile, S), batch2),                      # mask
        pl.BlockSpec((1, H), const2),                               # emb_ln_g
        pl.BlockSpec((1, H), const2),                               # emb_ln_b
        pl.BlockSpec((pl.Squeezed(), n_heads, H, hd), layer4),      # wq
        pl.BlockSpec((pl.Squeezed(), n_heads, 1, hd), layer4),      # bq
        pl.BlockSpec((pl.Squeezed(), n_heads, H, hd), layer4),      # wk
        pl.BlockSpec((pl.Squeezed(), n_heads, 1, hd), layer4),      # bk
        pl.BlockSpec((pl.Squeezed(), n_heads, H, hd), layer4),      # wv
        pl.BlockSpec((pl.Squeezed(), n_heads, 1, hd), layer4),      # bv
        pl.BlockSpec((pl.Squeezed(), n_heads, hd, H), layer4),      # wo
        pl.BlockSpec((pl.Squeezed(), 1, H), layer3),                # bo
        pl.BlockSpec((pl.Squeezed(), 1, H), layer3),                # ln1_g
        pl.BlockSpec((pl.Squeezed(), 1, H), layer3),                # ln1_b
        pl.BlockSpec((pl.Squeezed(), H, I), layer3),                # w1
        pl.BlockSpec((pl.Squeezed(), 1, I), layer3),                # b1
        pl.BlockSpec((pl.Squeezed(), I, H), layer3),                # w2
        pl.BlockSpec((pl.Squeezed(), 1, H), layer3),                # b2
        pl.BlockSpec((pl.Squeezed(), 1, H), layer3),                # ln2_g
        pl.BlockSpec((pl.Squeezed(), 1, H), layer3),                # ln2_b
        pl.BlockSpec((H, Cp), const2),                              # cls_w
        pl.BlockSpec((1, Cp), const2),                              # cls_b
    ]
    out_spec = pl.BlockSpec((batch_tile, Cp), batch2)

    logits_padded = pl.pallas_call(
        functools.partial(encoder_classifier_kernel, n_heads),
        out_shape=jax.ShapeDtypeStruct((B, Cp), jnp.float32),
        grid_spec=pltpu.PrefetchScalarGridSpec(
            num_scalar_prefetch=0,
            grid=(n_b, L),
            in_specs=in_specs,
            out_specs=out_spec,
            scratch_shapes=[pltpu.VMEM((batch_tile, S, H), jnp.bfloat16)]),
        compiler_params=pltpu.CompilerParams(
            dimension_semantics=("parallel", "arbitrary"),
            vmem_limit_bytes=32 * 1024 * 1024),
    )(*inputs)

    return logits_padded[:, :C]


# ----------------------------------------------------------------------------
if __name__ == "__main__":
    VOCAB = 100
    MAX_POS = 16
    HIDDEN = 32
    N_HEADS = 4
    N_LAYERS = 2
    INTERMEDIATE = 64
    NUM_CLASSES = 8
    B, S = 2, 8

    root = jax.random.PRNGKey(0)
    k_param, k_ids = jax.random.split(root)

    params = init_params(k_param, vocab=VOCAB, max_pos=MAX_POS, hidden=HIDDEN,
                         n_heads=N_HEADS, n_layers=N_LAYERS,
                         intermediate=INTERMEDIATE, num_classes=NUM_CLASSES)

    input_ids = jax.random.randint(k_ids, (B, S), 0, VOCAB, dtype=jnp.int32)
    attention_mask = jnp.array(
        [[1, 1, 1, 1, 1, 1, 1, 1],
         [1, 1, 1, 1, 1, 0, 0, 0]], dtype=jnp.int32)

    forward = jax.jit(functools.partial(product_category_classifier_forward,
                                        n_heads=N_HEADS))
    logits = jax.block_until_ready(forward(params, input_ids, attention_mask))

    assert logits.shape == (B, NUM_CLASSES)
    assert bool(jnp.all(jnp.isfinite(logits)))
    print("KERNEL_OK")
</pallas_src>

<mosaic_0001>
module attributes {stable_mosaic.version = 11 : i64} {
  func.func @encoder_classifier_kernel(%arg0: i32, %arg1: i32, %arg2: memref<2x8x32xbf16, #tpu.memory_space<vmem>>, %arg3: memref<2x8xf32, #tpu.memory_space<vmem>>, %arg4: memref<1x32xf32, #tpu.memory_space<vmem>>, %arg5: memref<1x32xf32, #tpu.memory_space<vmem>>, %arg6: memref<1x4x32x8xbf16, #tpu.memory_space<vmem>>, %arg7: memref<1x4x1x8xf32, #tpu.memory_space<vmem>>, %arg8: memref<1x4x32x8xbf16, #tpu.memory_space<vmem>>, %arg9: memref<1x4x1x8xf32, #tpu.memory_space<vmem>>, %arg10: memref<1x4x32x8xbf16, #tpu.memory_space<vmem>>, %arg11: memref<1x4x1x8xf32, #tpu.memory_space<vmem>>, %arg12: memref<1x4x8x32xbf16, #tpu.memory_space<vmem>>, %arg13: memref<1x1x32xf32, #tpu.memory_space<vmem>>, %arg14: memref<1x1x32xf32, #tpu.memory_space<vmem>>, %arg15: memref<1x1x32xf32, #tpu.memory_space<vmem>>, %arg16: memref<1x32x64xbf16, #tpu.memory_space<vmem>>, %arg17: memref<1x1x64xf32, #tpu.memory_space<vmem>>, %arg18: memref<1x64x32xbf16, #tpu.memory_space<vmem>>, %arg19: memref<1x1x32xf32, #tpu.memory_space<vmem>>, %arg20: memref<1x1x32xf32, #tpu.memory_space<vmem>>, %arg21: memref<1x1x32xf32, #tpu.memory_space<vmem>>, %arg22: memref<32x128xbf16, #tpu.memory_space<vmem>>, %arg23: memref<1x128xf32, #tpu.memory_space<vmem>>, %arg24: memref<2x128xf32, #tpu.memory_space<vmem>>, %arg25: memref<2x8x32xbf16, #tpu.memory_space<vmem>>) attributes {dimension_semantics = [#tpu.dimension_semantics<parallel>, #tpu.dimension_semantics<arbitrary>], iteration_bounds = array<i64: 1, 2>, scalar_prefetch = 0 : i64, scratch_operands = 1 : i64, tpu.core_type = #tpu.core_type<tc>, window_params = [{transform_indices = @transform_0, window_bounds = array<i64: 2, 8, 32>}, {transform_indices = @transform_1, window_bounds = array<i64: 2, 8>}, {pipeline_mode = #tpu.pipeline_mode<synchronous>, transform_indices = @transform_2, window_bounds = array<i64: 1, 32>}, {pipeline_mode = #tpu.pipeline_mode<synchronous>, transform_indices = @transform_3, window_bounds = array<i64: 1, 32>}, {transform_indices = @transform_4, window_bounds = array<i64: 1, 4, 32, 8>}, {transform_indices = @transform_5, window_bounds = array<i64: 1, 4, 1, 8>}, {transform_indices = @transform_6, window_bounds = array<i64: 1, 4, 32, 8>}, {transform_indices = @transform_7, window_bounds = array<i64: 1, 4, 1, 8>}, {transform_indices = @transform_8, window_bounds = array<i64: 1, 4, 32, 8>}, {transform_indices = @transform_9, window_bounds = array<i64: 1, 4, 1, 8>}, {transform_indices = @transform_10, window_bounds = array<i64: 1, 4, 8, 32>}, {transform_indices = @transform_11, window_bounds = array<i64: 1, 1, 32>}, {transform_indices = @transform_12, window_bounds = array<i64: 1, 1, 32>}, {transform_indices = @transform_13, window_bounds = array<i64: 1, 1, 32>}, {transform_indices = @transform_14, window_bounds = array<i64: 1, 32, 64>}, {transform_indices = @transform_15, window_bounds = array<i64: 1, 1, 64>}, {transform_indices = @transform_16, window_bounds = array<i64: 1, 64, 32>}, {transform_indices = @transform_17, window_bounds = array<i64: 1, 1, 32>}, {transform_indices = @transform_18, window_bounds = array<i64: 1, 1, 32>}, {transform_indices = @transform_19, window_bounds = array<i64: 1, 1, 32>}, {pipeline_mode = #tpu.pipeline_mode<synchronous>, transform_indices = @transform_20, window_bounds = array<i64: 32, 128>}, {pipeline_mode = #tpu.pipeline_mode<synchronous>, transform_indices = @transform_21, window_bounds = array<i64: 1, 128>}, {transform_indices = @transform_22, window_bounds = array<i64: 2, 128>}]} {
    %c0_i32 = arith.constant 0 : i32
    %0 = arith.cmpi eq, %arg1, %c0_i32 : i32
    %1 = arith.extui %0 : i1 to i32
    %c0_i32_0 = arith.constant 0 : i32
    %2 = arith.cmpi ne, %1, %c0_i32_0 : i32
    scf.if %2 {
      %c0_9 = arith.constant 0 : index
      %c0_10 = arith.constant 0 : index
      %c0_11 = arith.constant 0 : index
      %17 = vector.load %arg2[%c0_9, %c0_10, %c0_11] : memref<2x8x32xbf16, #tpu.memory_space<vmem>>, vector<2x8x32xbf16>
      %c0_12 = arith.constant 0 : index
      %c0_13 = arith.constant 0 : index
      %18 = vector.load %arg4[%c0_12, %c0_13] : memref<1x32xf32, #tpu.memory_space<vmem>>, vector<1x32xf32>
      %c0_14 = arith.constant 0 : index
      %c0_15 = arith.constant 0 : index
      %19 = vector.load %arg5[%c0_14, %c0_15] : memref<1x32xf32, #tpu.memory_space<vmem>>, vector<1x32xf32>
      %20 = arith.extf %17 : vector<2x8x32xbf16> to vector<2x8x32xf32>
      %cst_16 = arith.constant dense<0.000000e+00> : vector<2x8xf32>
      %21 = vector.multi_reduction <add>, %20, %cst_16 [2] : vector<2x8x32xf32> to vector<2x8xf32>
      %22 = vector.shape_cast %21 : vector<2x8xf32> to vector<2x8x1xf32>
      %cst_17 = arith.constant 3.200000e+01 : f32
      %23 = vector.broadcast %cst_17 : f32 to vector<2x8x1xf32>
      %24 = arith.divf %22, %23 : vector<2x8x1xf32>
      %25 = vector.broadcast %24 : vector<2x8x1xf32> to vector<2x8x32xf32>
      %26 = arith.subf %20, %25 : vector<2x8x32xf32>
      %27 = arith.mulf %26, %26 : vector<2x8x32xf32>
      %cst_18 = arith.constant dense<0.000000e+00> : vector<2x8xf32>
      %28 = vector.multi_reduction <add>, %27, %cst_18 [2] : vector<2x8x32xf32> to vector<2x8xf32>
      %29 = vector.shape_cast %28 : vector<2x8xf32> to vector<2x8x1xf32>
      %cst_19 = arith.constant 3.200000e+01 : f32
      %30 = vector.broadcast %cst_19 : f32 to vector<2x8x1xf32>
      %31 = arith.divf %29, %30 : vector<2x8x1xf32>
      %32 = vector.broadcast %24 : vector<2x8x1xf32> to vector<2x8x32xf32>
      %33 = arith.subf %20, %32 : vector<2x8x32xf32>
      %cst_20 = arith.constant 9.99999996E-13 : f32
      %34 = vector.broadcast %cst_20 : f32 to vector<2x8x1xf32>
      %35 = arith.addf %31, %34 : vector<2x8x1xf32>
      %36 = math.rsqrt %35 : vector<2x8x1xf32>
      %37 = vector.broadcast %36 : vector<2x8x1xf32> to vector<2x8x32xf32>
      %38 = arith.mulf %33, %37 : vector<2x8x32xf32>
      %39 = vector.shape_cast %18 : vector<1x32xf32> to vector<1x1x32xf32>
      %40 = vector.broadcast %39 : vector<1x1x32xf32> to vector<2x8x32xf32>
      %41 = arith.mulf %38, %40 : vector<2x8x32xf32>
      %42 = vector.shape_cast %19 : vector<1x32xf32> to vector<1x1x32xf32>
      %43 = vector.broadcast %42 : vector<1x1x32xf32> to vector<2x8x32xf32>
      %44 = arith.addf %41, %43 : vector<2x8x32xf32>
      %45 = arith.truncf %44 : vector<2x8x32xf32> to vector<2x8x32xbf16>
      %c0_21 = arith.constant 0 : index
      %c0_22 = arith.constant 0 : index
      %c0_23 = arith.constant 0 : index
      %46 = vector.load %arg25[%c0_21, %c0_22, %c0_23] : memref<2x8x32xbf16, #tpu.memory_space<vmem>>, vector<2x8x32xbf16>
      tpu.vector_store %arg25[%c0_21, %c0_22, %c0_23], %45 {strides = array<i32>} : memref<2x8x32xbf16, #tpu.memory_space<vmem>>, vector<2x8x32xbf16>,
    } else {
    }
    %c0 = arith.constant 0 : index
    %c0_1 = arith.constant 0 : index
    %3 = vector.load %arg3[%c0, %c0_1] : memref<2x8xf32, #tpu.memory_space<vmem>>, vector<2x8xf32>
    %cst = arith.constant 1.000000e+00 : f32
    %4 = vector.broadcast %cst : f32 to vector<2x8xf32>
    %5 = arith.subf %4, %3 : vector<2x8xf32>
    %cst_2 = arith.constant -1.000000e+09 : f32
    %6 = vector.broadcast %cst_2 : f32 to vector<2x8xf32>
    %7 = arith.mulf %5, %6 : vector<2x8xf32>
    %8 = vector.shape_cast %7 : vector<2x8xf32> to vector<2x1x8xf32>
    %c0_3 = arith.constant 0 : index
    %c0_4 = arith.constant 0 : index
    %c0_5 = arith.constant 0 : index
    %9 = vector.load %arg25[%c0_3, %c0_4, %c0_5] : memref<2x8x32xbf16, #tpu.memory_space<vmem>>, vector<2x8x32xbf16>
    %10 = vector.shape_cast %9 : vector<2x8x32xbf16> to vector<16x32xbf16>
    %c1_i32 = arith.constant 1 : i32
    %11 = arith.cmpi slt, %arg1, %c1_i32 : i32
    %12 = arith.extui %11 : i1 to i32
    %c0_i32_6 = arith.constant 0 : i32
    %13 = arith.cmpi ne, %12, %c0_i32_6 : i32
    scf.if %13 {
      %cst_9 = arith.constant 0.000000e+00 : f32
      %17 = vector.broadcast %cst_9 : f32 to vector<16x32xf32>
      %c0_10 = arith.constant 0 : index
      %c0_11 = arith.constant 0 : index
      %c0_12 = arith.constant 0 : index
      %c0_13 = arith.constant 0 : index
      %18 = vector.load %arg6[%c0_10, %c0_11, %c0_12, %c0_13] : memref<1x4x32x8xbf16, #tpu.memory_space<vmem>>, vector<1x1x32x8xbf16>
      %19 = vector.shape_cast %18 : vector<1x1x32x8xbf16> to vector<32x8xbf16>
      %cst_14 = arith.constant dense<0.000000e+00> : vector<16x8xf32>
      %20 = tpu.matmul %10, %19, %cst_14 {dimension_numbers = #tpu.dot_dimension_numbers<[1], [0], [0], [1], [0, 0, 1, 1], [], []>} : vector<16x32xbf16>, vector<32x8xbf16>, vector<16x8xf32> -> vector<16x8xf32>
      %c0_15 = arith.constant 0 : index
      %c0_16 = arith.constant 0 : index
      %c0_17 = arith.constant 0 : index
      %c0_18 = arith.constant 0 : index
      %21 = vector.load %arg7[%c0_15, %c0_16, %c0_17, %c0_18] : memref<1x4x1x8xf32, #tpu.memory_space<vmem>>, vector<1x1x1x8xf32>
      %22 = vector.shape_cast %21 : vector<1x1x1x8xf32> to vector<1x8xf32>
      %23 = vector.broadcast %22 : vector<1x8xf32> to vector<16x8xf32>
      %24 = arith.addf %20, %23 : vector<16x8xf32>
      %25 = arith.truncf %24 : vector<16x8xf32> to vector<16x8xbf16>
      %26 = vector.shape_cast %25 : vector<16x8xbf16> to vector<2x8x8xbf16>
      %c0_19 = arith.constant 0 : index
      %c0_20 = arith.constant 0 : index
      %c0_21 = arith.constant 0 : index
      %c0_22 = arith.constant 0 : index
      %27 = vector.load %arg8[%c0_19, %c0_20, %c0_21, %c0_22] : memref<1x4x32x8xbf16, #tpu.memory_space<vmem>>, vector<1x1x32x8xbf16>
      %28 = vector.shape_cast %27 : vector<1x1x32x8xbf16> to vector<32x8xbf16>
      %cst_23 = arith.constant dense<0.000000e+00> : vector<16x8xf32>
      %29 = tpu.matmul %10, %28, %cst_23 {dimension_numbers = #tpu.dot_dimension_numbers<[1], [0], [0], [1], [0, 0, 1, 1], [], []>} : vector<16x32xbf16>, vector<32x8xbf16>, vector<16x8xf32> -> vector<16x8xf32>
      %c0_24 = arith.constant 0 : index
      %c0_25 = arith.constant 0 : index
      %c0_26 = arith.constant 0 : index
      %c0_27 = arith.constant 0 : index
      %30 = vector.load %arg9[%c0_24, %c0_25, %c0_26, %c0_27] : memref<1x4x1x8xf32, #tpu.memory_space<vmem>>, vector<1x1x1x8xf32>
      %31 = vector.shape_cast %30 : vector<1x1x1x8xf32> to vector<1x8xf32>
      %32 = vector.broadcast %31 : vector<1x8xf32> to vector<16x8xf32>
      %33 = arith.addf %29, %32 : vector<16x8xf32>
      %34 = arith.truncf %33 : vector<16x8xf32> to vector<16x8xbf16>
      %35 = vector.shape_cast %34 : vector<16x8xbf16> to vector<2x8x8xbf16>
      %c0_28 = arith.constant 0 : index
      %c0_29 = arith.constant 0 : index
      %c0_30 = arith.constant 0 : index
      %c0_31 = arith.constant 0 : index
      %36 = vector.load %arg10[%c0_28, %c0_29, %c0_30, %c0_31] : memref<1x4x32x8xbf16, #tpu.memory_space<vmem>>, vector<1x1x32x8xbf16>
      %37 = vector.shape_cast %36 : vector<1x1x32x8xbf16> to vector<32x8xbf16>
      %cst_32 = arith.constant dense<0.000000e+00> : vector<16x8xf32>
      %38 = tpu.matmul %10, %37, %cst_32 {dimension_numbers = #tpu.dot_dimension_numbers<[1], [0], [0], [1], [0, 0, 1, 1], [], []>} : vector<16x32xbf16>, vector<32x8xbf16>, vector<16x8xf32> -> vector<16x8xf32>
      %c0_33 = arith.constant 0 : index
      %c0_34 = arith.constant 0 : index
      %c0_35 = arith.constant 0 : index
      %c0_36 = arith.constant 0 : index
      %39 = vector.load %arg11[%c0_33, %c0_34, %c0_35, %c0_36] : memref<1x4x1x8xf32, #tpu.memory_space<vmem>>, vector<1x1x1x8xf32>
      %40 = vector.shape_cast %39 : vector<1x1x1x8xf32> to vector<1x8xf32>
      %41 = vector.broadcast %40 : vector<1x8xf32> to vector<16x8xf32>
      %42 = arith.addf %38, %41 : vector<16x8xf32>
      %43 = arith.truncf %42 : vector<16x8xf32> to vector<16x8xbf16>
      %44 = vector.shape_cast %43 : vector<16x8xbf16> to vector<2x8x8xbf16>
      "tpu.trace_start"() <{level = 10 : i32, message = "bqd,bkd->bqk"}> : () -> ()
      %cst_37 = arith.constant dense<0.000000e+00> : vector<2x8x8xf32>
      %45 = tpu.matmul %26, %35, %cst_37 {dimension_numbers = #tpu.dot_dimension_numbers<[2], [2], [1], [1], [0, 0, 0, 1, 1, 1], [0], [0]>} : vector<2x8x8xbf16>, vector<2x8x8xbf16>, vector<2x8x8xf32> -> vector<2x8x8xf32>
      "tpu.trace_stop"() : () -> ()
      %46 = vector.broadcast %8 : vector<2x1x8xf32> to vector<2x8x8xf32>
      %47 = arith.addf %45, %46 : vector<2x8x8xf32>
      %cst_38 = arith.constant dense<0xFF800000> : vector<2x8xf32>
      %48 = vector.multi_reduction <maximumf>, %47, %cst_38 [2] : vector<2x8x8xf32> to vector<2x8xf32>
      %49 = vector.shape_cast %48 : vector<2x8xf32> to vector<2x8x1xf32>
      %50 = vector.broadcast %49 : vector<2x8x1xf32> to vector<2x8x8xf32>
      %51 = arith.subf %47, %50 : vector<2x8x8xf32>
      %52 = math.exp %51 : vector<2x8x8xf32>
      %cst_39 = arith.constant dense<0.000000e+00> : vector<2x8xf32>
      %53 = vector.multi_reduction <add>, %52, %cst_39 [2] : vector<2x8x8xf32> to vector<2x8xf32>
      %54 = vector.shape_cast %53 : vector<2x8xf32> to vector<2x8x1xf32>
      %55 = tpu.reciprocal %54 {approx = true} : vector<2x8x1xf32> -> vector<2x8x1xf32>
      %56 = vector.broadcast %55 : vector<2x8x1xf32> to vector<2x8x8xf32>
      %57 = arith.mulf %52, %56 : vector<2x8x8xf32>
      %58 = arith.truncf %57 : vector<2x8x8xf32> to vector<2x8x8xbf16>
      "tpu.trace_start"() <{level = 10 : i32, message = "bqk,bkd->bqd"}> : () -> ()
      %cst_40 = arith.constant dense<0.000000e+00> : vector<2x8x8xf32>
      %59 = tpu.matmul %58, %44, %cst_40 {dimension_numbers = #tpu.dot_dimension_numbers<[2], [1], [1], [2], [0, 0, 0, 1, 1, 2], [0], [0]>} : vector<2x8x8xbf16>, vector<2x8x8xbf16>, vector<2x8x8xf32> -> vector<2x8x8xf32>
      "tpu.trace_stop"() : () -> ()
      %60 = vector.shape_cast %59 : vector<2x8x8xf32> to vector<16x8xf32>
      %61 = arith.truncf %60 : vector<16x8xf32> to vector<16x8xbf16>
      %c0_41 = arith.constant 0 : index
      %c0_42 = arith.constant 0 : index
      %c0_43 = arith.constant 0 : index
      %c0_44 = arith.constant 0 : index
      %62 = vector.load %arg12[%c0_41, %c0_42, %c0_43, %c0_44] : memref<1x4x8x32xbf16, #tpu.memory_space<vmem>>, vector<1x1x8x32xbf16>
      %63 = vector.shape_cast %62 : vector<1x1x8x32xbf16> to vector<8x32xbf16>
      %cst_45 = arith.constant dense<0.000000e+00> : vector<16x32xf32>
      %64 = tpu.matmul %61, %63, %cst_45 {dimension_numbers = #tpu.dot_dimension_numbers<[1], [0], [0], [1], [0, 0, 1, 1], [], []>} : vector<16x8xbf16>, vector<8x32xbf16>, vector<16x32xf32> -> vector<16x32xf32>
      %65 = arith.addf %17, %64 : vector<16x32xf32>
      %c0_46 = arith.constant 0 : index
      %c1 = arith.constant 1 : index
      %c0_47 = arith.constant 0 : index
      %c0_48 = arith.constant 0 : index
      %66 = vector.load %arg6[%c0_46, %c1, %c0_47, %c0_48] : memref<1x4x32x8xbf16, #tpu.memory_space<vmem>>, vector<1x1x32x8xbf16>
      %67 = vector.shape_cast %66 : vector<1x1x32x8xbf16> to vector<32x8xbf16>
      %cst_49 = arith.constant dense<0.000000e+00> : vector<16x8xf32>
      %68 = tpu.matmul %10, %67, %cst_49 {dimension_numbers = #tpu.dot_dimension_numbers<[1], [0], [0], [1], [0, 0, 1, 1], [], []>} : vector<16x32xbf16>, vector<32x8xbf16>, vector<16x8xf32> -> vector<16x8xf32>
      %c0_50 = arith.constant 0 : index
      %c1_51 = arith.constant 1 : index
      %c0_52 = arith.constant 0 : index
      %c0_53 = arith.constant 0 : index
      %69 = vector.load %arg7[%c0_50, %c1_51, %c0_52, %c0_53] : memref<1x4x1x8xf32, #tpu.memory_space<vmem>>, vector<1x1x1x8xf32>
      %70 = vector.shape_cast %69 : vector<1x1x1x8xf32> to vector<1x8xf32>
      %71 = vector.broadcast %70 : vector<1x8xf32> to vector<16x8xf32>
      %72 = arith.addf %68, %71 : vector<16x8xf32>
      %73 = arith.truncf %72 : vector<16x8xf32> to vector<16x8xbf16>
      %74 = vector.shape_cast %73 : vector<16x8xbf16> to vector<2x8x8xbf16>
      %c0_54 = arith.constant 0 : index
      %c1_55 = arith.constant 1 : index
      %c0_56 = arith.constant 0 : index
      %c0_57 = arith.constant 0 : index
      %75 = vector.load %arg8[%c0_54, %c1_55, %c0_56, %c0_57] : memref<1x4x32x8xbf16, #tpu.memory_space<vmem>>, vector<1x1x32x8xbf16>
      %76 = vector.shape_cast %75 : vector<1x1x32x8xbf16> to vector<32x8xbf16>
      %cst_58 = arith.constant dense<0.000000e+00> : vector<16x8xf32>
      %77 = tpu.matmul %10, %76, %cst_58 {dimension_numbers = #tpu.dot_dimension_numbers<[1], [0], [0], [1], [0, 0, 1, 1], [], []>} : vector<16x32xbf16>, vector<32x8xbf16>, vector<16x8xf32> -> vector<16x8xf32>
      %c0_59 = arith.constant 0 : index
      %c1_60 = arith.constant 1 : index
      %c0_61 = arith.constant 0 : index
      %c0_62 = arith.constant 0 : index
      %78 = vector.load %arg9[%c0_59, %c1_60, %c0_61, %c0_62] : memref<1x4x1x8xf32, #tpu.memory_space<vmem>>, vector<1x1x1x8xf32>
      %79 = vector.shape_cast %78 : vector<1x1x1x8xf32> to vector<1x8xf32>
      %80 = vector.broadcast %79 : vector<1x8xf32> to vector<16x8xf32>
      %81 = arith.addf %77, %80 : vector<16x8xf32>
      %82 = arith.truncf %81 : vector<16x8xf32> to vector<16x8xbf16>
      %83 = vector.shape_cast %82 : vector<16x8xbf16> to vector<2x8x8xbf16>
      %c0_63 = arith.constant 0 : index
      %c1_64 = arith.constant 1 : index
      %c0_65 = arith.constant 0 : index
      %c0_66 = arith.constant 0 : index
      %84 = vector.load %arg10[%c0_63, %c1_64, %c0_65, %c0_66] : memref<1x4x32x8xbf16, #tpu.memory_space<vmem>>, vector<1x1x32x8xbf16>
      %85 = vector.shape_cast %84 : vector<1x1x32x8xbf16> to vector<32x8xbf16>
      %cst_67 = arith.constant dense<0.000000e+00> : vector<16x8xf32>
      %86 = tpu.matmul %10, %85, %cst_67 {dimension_numbers = #tpu.dot_dimension_numbers<[1], [0], [0], [1], [0, 0, 1, 1], [], []>} : vector<16x32xbf16>, vector<32x8xbf16>, vector<16x8xf32> -> vector<16x8xf32>
      %c0_68 = arith.constant 0 : index
      %c1_69 = arith.constant 1 : index
      %c0_70 = arith.constant 0 : index
      %c0_71 = arith.constant 0 : index
      %87 = vector.load %arg11[%c0_68, %c1_69, %c0_70, %c0_71] : memref<1x4x1x8xf32, #tpu.memory_space<vmem>>, vector<1x1x1x8xf32>
      %88 = vector.shape_cast %87 : vector<1x1x1x8xf32> to vector<1x8xf32>
      %89 = vector.broadcast %88 : vector<1x8xf32> to vector<16x8xf32>
      %90 = arith.addf %86, %89 : vector<16x8xf32>
      %91 = arith.truncf %90 : vector<16x8xf32> to vector<16x8xbf16>
      %92 = vector.shape_cast %91 : vector<16x8xbf16> to vector<2x8x8xbf16>
      "tpu.trace_start"() <{level = 10 : i32, message = "bqd,bkd->bqk"}> : () -> ()
      %cst_72 = arith.constant dense<0.000000e+00> : vector<2x8x8xf32>
      %93 = tpu.matmul %74, %83, %cst_72 {dimension_numbers = #tpu.dot_dimension_numbers<[2], [2], [1], [1], [0, 0, 0, 1, 1, 1], [0], [0]>} : vector<2x8x8xbf16>, vector<2x8x8xbf16>, vector<2x8x8xf32> -> vector<2x8x8xf32>
      "tpu.trace_stop"() : () -> ()
      %94 = vector.broadcast %8 : vector<2x1x8xf32> to vector<2x8x8xf32>
      %95 = arith.addf %93, %94 : vector<2x8x8xf32>
      %cst_73 = arith.constant dense<0xFF800000> : vector<2x8xf32>
      %96 = vector.multi_reduction <maximumf>, %95, %cst_73 [2] : vector<2x8x8xf32> to vector<2x8xf32>
      %97 = vector.shape_cast %96 : vector<2x8xf32> to vector<2x8x1xf32>
      %98 = vector.broadcast %97 : vector<2x8x1xf32> to vector<2x8x8xf32>
      %99 = arith.subf %95, %98 : vector<2x8x8xf32>
      %100 = math.exp %99 : vector<2x8x8xf32>
      %cst_74 = arith.constant dense<0.000000e+00> : vector<2x8xf32>
      %101 = vector.multi_reduction <add>, %100, %cst_74 [2] : vector<2x8x8xf32> to vector<2x8xf32>
      %102 = vector.shape_cast %101 : vector<2x8xf32> to vector<2x8x1xf32>
      %103 = tpu.reciprocal %102 {approx = true} : vector<2x8x1xf32> -> vector<2x8x1xf32>
      %104 = vector.broadcast %103 : vector<2x8x1xf32> to vector<2x8x8xf32>
      %105 = arith.mulf %100, %104 : vector<2x8x8xf32>
      %106 = arith.truncf %105 : vector<2x8x8xf32> to vector<2x8x8xbf16>
      "tpu.trace_start"() <{level = 10 : i32, message = "bqk,bkd->bqd"}> : () -> ()
      %cst_75 = arith.constant dense<0.000000e+00> : vector<2x8x8xf32>
      %107 = tpu.matmul %106, %92, %cst_75 {dimension_numbers = #tpu.dot_dimension_numbers<[2], [1], [1], [2], [0, 0, 0, 1, 1, 2], [0], [0]>} : vector<2x8x8xbf16>, vector<2x8x8xbf16>, vector<2x8x8xf32> -> vector<2x8x8xf32>
      "tpu.trace_stop"() : () -> ()
      %108 = vector.shape_cast %107 : vector<2x8x8xf32> to vector<16x8xf32>
      %109 = arith.truncf %108 : vector<16x8xf32> to vector<16x8xbf16>
      %c0_76 = arith.constant 0 : index
      %c1_77 = arith.constant 1 : index
      %c0_78 = arith.constant 0 : index
      %c0_79 = arith.constant 0 : index
      %110 = vector.load %arg12[%c0_76, %c1_77, %c0_78, %c0_79] : memref<1x4x8x32xbf16, #tpu.memory_space<vmem>>, vector<1x1x8x32xbf16>
      %111 = vector.shape_cast %110 : vector<1x1x8x32xbf16> to vector<8x32xbf16>
      %cst_80 = arith.constant dense<0.000000e+00> : vector<16x32xf32>
      %112 = tpu.matmul %109, %111, %cst_80 {dimension_numbers = #tpu.dot_dimension_numbers<[1], [0], [0], [1], [0, 0, 1, 1], [], []>} : vector<16x8xbf16>, vector<8x32xbf16>, vector<16x32xf32> -> vector<16x32xf32>
      %113 = arith.addf %65, %112 : vector<16x32xf32>
      %c0_81 = arith.constant 0 : index
      %c2 = arith.constant 2 : index
      %c0_82 = arith.constant 0 : index
      %c0_83 = arith.constant 0 : index
      %114 = vector.load %arg6[%c0_81, %c2, %c0_82, %c0_83] : memref<1x4x32x8xbf16, #tpu.memory_space<vmem>>, vector<1x1x32x8xbf16>
      %115 = vector.shape_cast %114 : vector<1x1x32x8xbf16> to vector<32x8xbf16>
      %cst_84 = arith.constant dense<0.000000e+00> : vector<16x8xf32>
      %116 = tpu.matmul %10, %115, %cst_84 {dimension_numbers = #tpu.dot_dimension_numbers<[1], [0], [0], [1], [0, 0, 1, 1], [], []>} : vector<16x32xbf16>, vector<32x8xbf16>, vector<16x8xf32> -> vector<16x8xf32>
      %c0_85 = arith.constant 0 : index
      %c2_86 = arith.constant 2 : index
      %c0_87 = arith.constant 0 : index
      %c0_88 = arith.constant 0 : index
      %117 = vector.load %arg7[%c0_85, %c2_86, %c0_87, %c0_88] : memref<1x4x1x8xf32, #tpu.memory_space<vmem>>, vector<1x1x1x8xf32>
      %118 = vector.shape_cast %117 : vector<1x1x1x8xf32> to vector<1x8xf32>
      %119 = vector.broadcast %118 : vector<1x8xf32> to vector<16x8xf32>
      %120 = arith.addf %116, %119 : vector<16x8xf32>
      %121 = arith.truncf %120 : vector<16x8xf32> to vector<16x8xbf16>
      %122 = vector.shape_cast %121 : vector<16x8xbf16> to vector<2x8x8xbf16>
      %c0_89 = arith.constant 0 : index
      %c2_90 = arith.constant 2 : index
      %c0_91 = arith.constant 0 : index
      %c0_92 = arith.constant 0 : index
      %123 = vector.load %arg8[%c0_89, %c2_90, %c0_91, %c0_92] : memref<1x4x32x8xbf16, #tpu.memory_space<vmem>>, vector<1x1x32x8xbf16>
      %124 = vector.shape_cast %123 : vector<1x1x32x8xbf16> to vector<32x8xbf16>
      %cst_93 = arith.constant dense<0.000000e+00> : vector<16x8xf32>
      %125 = tpu.matmul %10, %124, %cst_93 {dimension_numbers = #tpu.dot_dimension_numbers<[1], [0], [0], [1], [0, 0, 1, 1], [], []>} : vector<16x32xbf16>, vector<32x8xbf16>, vector<16x8xf32> -> vector<16x8xf32>
      %c0_94 = arith.constant 0 : index
      %c2_95 = arith.constant 2 : index
      %c0_96 = arith.constant 0 : index
      %c0_97 = arith.constant 0 : index
      %126 = vector.load %arg9[%c0_94, %c2_95, %c0_96, %c0_97] : memref<1x4x1x8xf32, #tpu.memory_space<vmem>>, vector<1x1x1x8xf32>
      %127 = vector.shape_cast %126 : vector<1x1x1x8xf32> to vector<1x8xf32>
      %128 = vector.broadcast %127 : vector<1x8xf32> to vector<16x8xf32>
      %129 = arith.addf %125, %128 : vector<16x8xf32>
      %130 = arith.truncf %129 : vector<16x8xf32> to vector<16x8xbf16>
      %131 = vector.shape_cast %130 : vector<16x8xbf16> to vector<2x8x8xbf16>
      %c0_98 = arith.constant 0 : index
      %c2_99 = arith.constant 2 : index
      %c0_100 = arith.constant 0 : index
      %c0_101 = arith.constant 0 : index
      %132 = vector.load %arg10[%c0_98, %c2_99, %c0_100, %c0_101] : memref<1x4x32x8xbf16, #tpu.memory_space<vmem>>, vector<1x1x32x8xbf16>
      %133 = vector.shape_cast %132 : vector<1x1x32x8xbf16> to vector<32x8xbf16>
      %cst_102 = arith.constant dense<0.000000e+00> : vector<16x8xf32>
      %134 = tpu.matmul %10, %133, %cst_102 {dimension_numbers = #tpu.dot_dimension_numbers<[1], [0], [0], [1], [0, 0, 1, 1], [], []>} : vector<16x32xbf16>, vector<32x8xbf16>, vector<16x8xf32> -> vector<16x8xf32>
      %c0_103 = arith.constant 0 : index
      %c2_104 = arith.constant 2 : index
      %c0_105 = arith.constant 0 : index
      %c0_106 = arith.constant 0 : index
      %135 = vector.load %arg11[%c0_103, %c2_104, %c0_105, %c0_106] : memref<1x4x1x8xf32, #tpu.memory_space<vmem>>, vector<1x1x1x8xf32>
      %136 = vector.shape_cast %135 : vector<1x1x1x8xf32> to vector<1x8xf32>
      %137 = vector.broadcast %136 : vector<1x8xf32> to vector<16x8xf32>
      %138 = arith.addf %134, %137 : vector<16x8xf32>
      %139 = arith.truncf %138 : vector<16x8xf32> to vector<16x8xbf16>
      %140 = vector.shape_cast %139 : vector<16x8xbf16> to vector<2x8x8xbf16>
      "tpu.trace_start"() <{level = 10 : i32, message = "bqd,bkd->bqk"}> : () -> ()
      %cst_107 = arith.constant dense<0.000000e+00> : vector<2x8x8xf32>
      %141 = tpu.matmul %122, %131, %cst_107 {dimension_numbers = #tpu.dot_dimension_numbers<[2], [2], [1], [1], [0, 0, 0, 1, 1, 1], [0], [0]>} : vector<2x8x8xbf16>, vector<2x8x8xbf16>, vector<2x8x8xf32> -> vector<2x8x8xf32>
      "tpu.trace_stop"() : () -> ()
      %142 = vector.broadcast %8 : vector<2x1x8xf32> to vector<2x8x8xf32>
      %143 = arith.addf %141, %142 : vector<2x8x8xf32>
      %cst_108 = arith.constant dense<0xFF800000> : vector<2x8xf32>
      %144 = vector.multi_reduction <maximumf>, %143, %cst_108 [2] : vector<2x8x8xf32> to vector<2x8xf32>
      %145 = vector.shape_cast %144 : vector<2x8xf32> to vector<2x8x1xf32>
      %146 = vector.broadcast %145 : vector<2x8x1xf32> to vector<2x8x8xf32>
      %147 = arith.subf %143, %146 : vector<2x8x8xf32>
      %148 = math.exp %147 : vector<2x8x8xf32>
      %cst_109 = arith.constant dense<0.000000e+00> : vector<2x8xf32>
      %149 = vector.multi_reduction <add>, %148, %cst_109 [2] : vector<2x8x8xf32> to vector<2x8xf32>
      %150 = vector.shape_cast %149 : vector<2x8xf32> to vector<2x8x1xf32>
      %151 = tpu.reciprocal %150 {approx = true} : vector<2x8x1xf32> -> vector<2x8x1xf32>
      %152 = vector.broadcast %151 : vector<2x8x1xf32> to vector<2x8x8xf32>
      %153 = arith.mulf %148, %152 : vector<2x8x8xf32>
      %154 = arith.truncf %153 : vector<2x8x8xf32> to vector<2x8x8xbf16>
      "tpu.trace_start"() <{level = 10 : i32, message = "bqk,bkd->bqd"}> : () -> ()
      %cst_110 = arith.constant dense<0.000000e+00> : vector<2x8x8xf32>
      %155 = tpu.matmul %154, %140, %cst_110 {dimension_numbers = #tpu.dot_dimension_numbers<[2], [1], [1], [2], [0, 0, 0, 1, 1, 2], [0], [0]>} : vector<2x8x8xbf16>, vector<2x8x8xbf16>, vector<2x8x8xf32> -> vector<2x8x8xf32>
      "tpu.trace_stop"() : () -> ()
      %156 = vector.shape_cast %155 : vector<2x8x8xf32> to vector<16x8xf32>
      %157 = arith.truncf %156 : vector<16x8xf32> to vector<16x8xbf16>
      %c0_111 = arith.constant 0 : index
      %c2_112 = arith.constant 2 : index
      %c0_113 = arith.constant 0 : index
      %c0_114 = arith.constant 0 : index
      %158 = vector.load %arg12[%c0_111, %c2_112, %c0_113, %c0_114] : memref<1x4x8x32xbf16, #tpu.memory_space<vmem>>, vector<1x1x8x32xbf16>
      %159 = vector.shape_cast %158 : vector<1x1x8x32xbf16> to vector<8x32xbf16>
      %cst_115 = arith.constant dense<0.000000e+00> : vector<16x32xf32>
      %160 = tpu.matmul %157, %159, %cst_115 {dimension_numbers = #tpu.dot_dimension_numbers<[1], [0], [0], [1], [0, 0, 1, 1], [], []>} : vector<16x8xbf16>, vector<8x32xbf16>, vector<16x32xf32> -> vector<16x32xf32>
      %161 = arith.addf %113, %160 : vector<16x32xf32>
      %c0_116 = arith.constant 0 : index
      %c3 = arith.constant 3 : index
      %c0_117 = arith.constant 0 : index
      %c0_118 = arith.constant 0 : index
      %162 = vector.load %arg6[%c0_116, %c3, %c0_117, %c0_118] : memref<1x4x32x8xbf16, #tpu.memory_space<vmem>>, vector<1x1x32x8xbf16>
      %163 = vector.shape_cast %162 : vector<1x1x32x8xbf16> to vector<32x8xbf16>
      %cst_119 = arith.constant dense<0.000000e+00> : vector<16x8xf32>
      %164 = tpu.matmul %10, %163, %cst_119 {dimension_numbers = #tpu.dot_dimension_numbers<[1], [0], [0], [1], [0, 0, 1, 1], [], []>} : vector<16x32xbf16>, vector<32x8xbf16>, vector<16x8xf32> -> vector<16x8xf32>
      %c0_120 = arith.constant 0 : index
      %c3_121 = arith.constant 3 : index
      %c0_122 = arith.constant 0 : index
      %c0_123 = arith.constant 0 : index
      %165 = vector.load %arg7[%c0_120, %c3_121, %c0_122, %c0_123] : memref<1x4x1x8xf32, #tpu.memory_space<vmem>>, vector<1x1x1x8xf32>
      %166 = vector.shape_cast %165 : vector<1x1x1x8xf32> to vector<1x8xf32>
      %167 = vector.broadcast %166 : vector<1x8xf32> to vector<16x8xf32>
      %168 = arith.addf %164, %167 : vector<16x8xf32>
      %169 = arith.truncf %168 : vector<16x8xf32> to vector<16x8xbf16>
      %170 = vector.shape_cast %169 : vector<16x8xbf16> to vector<2x8x8xbf16>
      %c0_124 = arith.constant 0 : index
      %c3_125 = arith.constant 3 : index
      %c0_126 = arith.constant 0 : index
      %c0_127 = arith.constant 0 : index
      %171 = vector.load %arg8[%c0_124, %c3_125, %c0_126, %c0_127] : memref<1x4x32x8xbf16, #tpu.memory_space<vmem>>, vector<1x1x32x8xbf16>
      %172 = vector.shape_cast %171 : vector<1x1x32x8xbf16> to vector<32x8xbf16>
      %cst_128 = arith.constant dense<0.000000e+00> : vector<16x8xf32>
      %173 = tpu.matmul %10, %172, %cst_128 {dimension_numbers = #tpu.dot_dimension_numbers<[1], [0], [0], [1], [0, 0, 1, 1], [], []>} : vector<16x32xbf16>, vector<32x8xbf16>, vector<16x8xf32> -> vector<16x8xf32>
      %c0_129 = arith.constant 0 : index
      %c3_130 = arith.constant 3 : index
      %c0_131 = arith.constant 0 : index
      %c0_132 = arith.constant 0 : index
      %174 = vector.load %arg9[%c0_129, %c3_130, %c0_131, %c0_132] : memref<1x4x1x8xf32, #tpu.memory_space<vmem>>, vector<1x1x1x8xf32>
      %175 = vector.shape_cast %174 : vector<1x1x1x8xf32> to vector<1x8xf32>
      %176 = vector.broadcast %175 : vector<1x8xf32> to vector<16x8xf32>
      %177 = arith.addf %173, %176 : vector<16x8xf32>
      %178 = arith.truncf %177 : vector<16x8xf32> to vector<16x8xbf16>
      %179 = vector.shape_cast %178 : vector<16x8xbf16> to vector<2x8x8xbf16>
      %c0_133 = arith.constant 0 : index
      %c3_134 = arith.constant 3 : index
      %c0_135 = arith.constant 0 : index
      %c0_136 = arith.constant 0 : index
      %180 = vector.load %arg10[%c0_133, %c3_134, %c0_135, %c0_136] : memref<1x4x32x8xbf16, #tpu.memory_space<vmem>>, vector<1x1x32x8xbf16>
      %181 = vector.shape_cast %180 : vector<1x1x32x8xbf16> to vector<32x8xbf16>
      %cst_137 = arith.constant dense<0.000000e+00> : vector<16x8xf32>
      %182 = tpu.matmul %10, %181, %cst_137 {dimension_numbers = #tpu.dot_dimension_numbers<[1], [0], [0], [1], [0, 0, 1, 1], [], []>} : vector<16x32xbf16>, vector<32x8xbf16>, vector<16x8xf32> -> vector<16x8xf32>
      %c0_138 = arith.constant 0 : index
      %c3_139 = arith.constant 3 : index
      %c0_140 = arith.constant 0 : index
      %c0_141 = arith.constant 0 : index
      %183 = vector.load %arg11[%c0_138, %c3_139, %c0_140, %c0_141] : memref<1x4x1x8xf32, #tpu.memory_space<vmem>>, vector<1x1x1x8xf32>
      %184 = vector.shape_cast %183 : vector<1x1x1x8xf32> to vector<1x8xf32>
      %185 = vector.broadcast %184 : vector<1x8xf32> to vector<16x8xf32>
      %186 = arith.addf %182, %185 : vector<16x8xf32>
      %187 = arith.truncf %186 : vector<16x8xf32> to vector<16x8xbf16>
      %188 = vector.shape_cast %187 : vector<16x8xbf16> to vector<2x8x8xbf16>
      "tpu.trace_start"() <{level = 10 : i32, message = "bqd,bkd->bqk"}> : () -> ()
      %cst_142 = arith.constant dense<0.000000e+00> : vector<2x8x8xf32>
      %189 = tpu.matmul %170, %179, %cst_142 {dimension_numbers = #tpu.dot_dimension_numbers<[2], [2], [1], [1], [0, 0, 0, 1, 1, 1], [0], [0]>} : vector<2x8x8xbf16>, vector<2x8x8xbf16>, vector<2x8x8xf32> -> vector<2x8x8xf32>
      "tpu.trace_stop"() : () -> ()
      %190 = vector.broadcast %8 : vector<2x1x8xf32> to vector<2x8x8xf32>
      %191 = arith.addf %189, %190 : vector<2x8x8xf32>
      %cst_143 = arith.constant dense<0xFF800000> : vector<2x8xf32>
      %192 = vector.multi_reduction <maximumf>, %191, %cst_143 [2] : vector<2x8x8xf32> to vector<2x8xf32>
      %193 = vector.shape_cast %192 : vector<2x8xf32> to vector<2x8x1xf32>
      %194 = vector.broadcast %193 : vector<2x8x1xf32> to vector<2x8x8xf32>
      %195 = arith.subf %191, %194 : vector<2x8x8xf32>
      %196 = math.exp %195 : vector<2x8x8xf32>
      %cst_144 = arith.constant dense<0.000000e+00> : vector<2x8xf32>
      %197 = vector.multi_reduction <add>, %196, %cst_144 [2] : vector<2x8x8xf32> to vector<2x8xf32>
      %198 = vector.shape_cast %197 : vector<2x8xf32> to vector<2x8x1xf32>
      %199 = tpu.reciprocal %198 {approx = true} : vector<2x8x1xf32> -> vector<2x8x1xf32>
      %200 = vector.broadcast %199 : vector<2x8x1xf32> to vector<2x8x8xf32>
      %201 = arith.mulf %196, %200 : vector<2x8x8xf32>
      %202 = arith.truncf %201 : vector<2x8x8xf32> to vector<2x8x8xbf16>
      "tpu.trace_start"() <{level = 10 : i32, message = "bqk,bkd->bqd"}> : () -> ()
      %cst_145 = arith.constant dense<0.000000e+00> : vector<2x8x8xf32>
      %203 = tpu.matmul %202, %188, %cst_145 {dimension_numbers = #tpu.dot_dimension_numbers<[2], [1], [1], [2], [0, 0, 0, 1, 1, 2], [0], [0]>} : vector<2x8x8xbf16>, vector<2x8x8xbf16>, vector<2x8x8xf32> -> vector<2x8x8xf32>
      "tpu.trace_stop"() : () -> ()
      %204 = vector.shape_cast %203 : vector<2x8x8xf32> to vector<16x8xf32>
      %205 = arith.truncf %204 : vector<16x8xf32> to vector<16x8xbf16>
      %c0_146 = arith.constant 0 : index
      %c3_147 = arith.constant 3 : index
      %c0_148 = arith.constant 0 : index
      %c0_149 = arith.constant 0 : index
      %206 = vector.load %arg12[%c0_146, %c3_147, %c0_148, %c0_149] : memref<1x4x8x32xbf16, #tpu.memory_space<vmem>>, vector<1x1x8x32xbf16>
      %207 = vector.shape_cast %206 : vector<1x1x8x32xbf16> to vector<8x32xbf16>
      %cst_150 = arith.constant dense<0.000000e+00> : vector<16x32xf32>
      %208 = tpu.matmul %205, %207, %cst_150 {dimension_numbers = #tpu.dot_dimension_numbers<[1], [0], [0], [1], [0, 0, 1, 1], [], []>} : vector<16x8xbf16>, vector<8x32xbf16>, vector<16x32xf32> -> vector<16x32xf32>
      %209 = arith.addf %161, %208 : vector<16x32xf32>
      %c0_151 = arith.constant 0 : index
      %c0_152 = arith.constant 0 : index
      %c0_153 = arith.constant 0 : index
      %210 = vector.load %arg13[%c0_151, %c0_152, %c0_153] : memref<1x1x32xf32, #tpu.memory_space<vmem>>, vector<1x1x32xf32>
      %211 = vector.shape_cast %210 : vector<1x1x32xf32> to vector<1x32xf32>
      %212 = vector.broadcast %211 : vector<1x32xf32> to vector<16x32xf32>
      %213 = arith.addf %209, %212 : vector<16x32xf32>
      %214 = arith.extf %10 : vector<16x32xbf16> to vector<16x32xf32>
      %215 = arith.addf %214, %213 : vector<16x32xf32>
      %c0_154 = arith.constant 0 : index
      %c0_155 = arith.constant 0 : index
      %c0_156 = arith.constant 0 : index
      %216 = vector.load %arg14[%c0_154, %c0_155, %c0_156] : memref<1x1x32xf32, #tpu.memory_space<vmem>>, vector<1x1x32xf32>
      %217 = vector.shape_cast %216 : vector<1x1x32xf32> to vector<1x32xf32>
      %c0_157 = arith.constant 0 : index
      %c0_158 = arith.constant 0 : index
      %c0_159 = arith.constant 0 : index
      %218 = vector.load %arg15[%c0_157, %c0_158, %c0_159] : memref<1x1x32xf32, #tpu.memory_space<vmem>>, vector<1x1x32xf32>
      %219 = vector.shape_cast %218 : vector<1x1x32xf32> to vector<1x32xf32>
      %cst_160 = arith.constant dense<0.000000e+00> : vector<16xf32>
      %220 = vector.multi_reduction <add>, %215, %cst_160 [1] : vector<16x32xf32> to vector<16xf32>
      %221 = vector.shape_cast %220 : vector<16xf32> to vector<16x1xf32>
      %cst_161 = arith.constant 3.200000e+01 : f32
      %222 = vector.broadcast %cst_161 : f32 to vector<16x1xf32>
      %223 = arith.divf %221, %222 : vector<16x1xf32>
      %224 = vector.broadcast %223 : vector<16x1xf32> to vector<16x32xf32>
      %225 = arith.subf %215, %224 : vector<16x32xf32>
      %226 = arith.mulf %225, %225 : vector<16x32xf32>
      %cst_162 = arith.constant dense<0.000000e+00> : vector<16xf32>
      %227 = vector.multi_reduction <add>, %226, %cst_162 [1] : vector<16x32xf32> to vector<16xf32>
      %228 = vector.shape_cast %227 : vector<16xf32> to vector<16x1xf32>
      %cst_163 = arith.constant 3.200000e+01 : f32
      %229 = vector.broadcast %cst_163 : f32 to vector<16x1xf32>
      %230 = arith.divf %228, %229 : vector<16x1xf32>
      %231 = vector.broadcast %223 : vector<16x1xf32> to vector<16x32xf32>
      %232 = arith.subf %215, %231 : vector<16x32xf32>
      %cst_164 = arith.constant 9.99999996E-13 : f32
      %233 = vector.broadcast %cst_164 : f32 to vector<16x1xf32>
      %234 = arith.addf %230, %233 : vector<16x1xf32>
      %235 = math.rsqrt %234 : vector<16x1xf32>
      %236 = vector.broadcast %235 : vector<16x1xf32> to vector<16x32xf32>
      %237 = arith.mulf %232, %236 : vector<16x32xf32>
      %238 = vector.broadcast %217 : vector<1x32xf32> to vector<16x32xf32>
      %239 = arith.mulf %237, %238 : vector<16x32xf32>
      %240 = vector.broadcast %219 : vector<1x32xf32> to vector<16x32xf32>
      %241 = arith.addf %239, %240 : vector<16x32xf32>
      %242 = arith.truncf %241 : vector<16x32xf32> to vector<16x32xbf16>
      %c0_165 = arith.constant 0 : index
      %c0_166 = arith.constant 0 : index
      %c0_167 = arith.constant 0 : index
      %243 = vector.load %arg16[%c0_165, %c0_166, %c0_167] : memref<1x32x64xbf16, #tpu.memory_space<vmem>>, vector<1x32x64xbf16>
      %244 = vector.shape_cast %243 : vector<1x32x64xbf16> to vector<32x64xbf16>
      %cst_168 = arith.constant dense<0.000000e+00> : vector<16x64xf32>
      %245 = tpu.matmul %242, %244, %cst_168 {dimension_numbers = #tpu.dot_dimension_numbers<[1], [0], [0], [1], [0, 0, 1, 1], [], []>} : vector<16x32xbf16>, vector<32x64xbf16>, vector<16x64xf32> -> vector<16x64xf32>
      %c0_169 = arith.constant 0 : index
      %c0_170 = arith.constant 0 : index
      %c0_171 = arith.constant 0 : index
      %246 = vector.load %arg17[%c0_169, %c0_170, %c0_171] : memref<1x1x64xf32, #tpu.memory_space<vmem>>, vector<1x1x64xf32>
      %247 = vector.shape_cast %246 : vector<1x1x64xf32> to vector<1x64xf32>
      %248 = vector.broadcast %247 : vector<1x64xf32> to vector<16x64xf32>
      %249 = arith.addf %245, %248 : vector<16x64xf32>
      %250 = arith.mulf %249, %249 : vector<16x64xf32>
      %251 = arith.mulf %249, %250 : vector<16x64xf32>
      %cst_172 = arith.constant 4.471500e-02 : f32
      %252 = vector.broadcast %cst_172 : f32 to vector<16x64xf32>
      %253 = arith.mulf %252, %251 : vector<16x64xf32>
      %254 = arith.addf %249, %253 : vector<16x64xf32>
      %cst_173 = arith.constant 0.797884583 : f32
      %255 = vector.broadcast %cst_173 : f32 to vector<16x64xf32>
      %256 = arith.mulf %255, %254 : vector<16x64xf32>
      %257 = math.tanh %256 : vector<16x64xf32>
      %cst_174 = arith.constant 1.000000e+00 : f32
      %258 = vector.broadcast %cst_174 : f32 to vector<16x64xf32>
      %259 = arith.addf %258, %257 : vector<16x64xf32>
      %cst_175 = arith.constant 5.000000e-01 : f32
      %260 = vector.broadcast %cst_175 : f32 to vector<16x64xf32>
      %261 = arith.mulf %260, %259 : vector<16x64xf32>
      %262 = arith.mulf %249, %261 : vector<16x64xf32>
      %263 = arith.truncf %262 : vector<16x64xf32> to vector<16x64xbf16>
      %c0_176 = arith.constant 0 : index
      %c0_177 = arith.constant 0 : index
      %c0_178 = arith.constant 0 : index
      %264 = vector.load %arg18[%c0_176, %c0_177, %c0_178] : memref<1x64x32xbf16, #tpu.memory_space<vmem>>, vector<1x64x32xbf16>
      %265 = vector.shape_cast %264 : vector<1x64x32xbf16> to vector<64x32xbf16>
      %cst_179 = arith.constant dense<0.000000e+00> : vector<16x32xf32>
      %266 = tpu.matmul %263, %265, %cst_179 {dimension_numbers = #tpu.dot_dimension_numbers<[1], [0], [0], [1], [0, 0, 1, 1], [], []>} : vector<16x64xbf16>, vector<64x32xbf16>, vector<16x32xf32> -> vector<16x32xf32>
      %c0_180 = arith.constant 0 : index
      %c0_181 = arith.constant 0 : index
      %c0_182 = arith.constant 0 : index
      %267 = vector.load %arg19[%c0_180, %c0_181, %c0_182] : memref<1x1x32xf32, #tpu.memory_space<vmem>>, vector<1x1x32xf32>
      %268 = vector.shape_cast %267 : vector<1x1x32xf32> to vector<1x32xf32>
      %269 = vector.broadcast %268 : vector<1x32xf32> to vector<16x32xf32>
      %270 = arith.addf %266, %269 : vector<16x32xf32>
      %271 = arith.addf %241, %270 : vector<16x32xf32>
      %c0_183 = arith.constant 0 : index
      %c0_184 = arith.constant 0 : index
      %c0_185 = arith.constant 0 : index
      %272 = vector.load %arg20[%c0_183, %c0_184, %c0_185] : memref<1x1x32xf32, #tpu.memory_space<vmem>>, vector<1x1x32xf32>
      %273 = vector.shape_cast %272 : vector<1x1x32xf32> to vector<1x32xf32>
      %c0_186 = arith.constant 0 : index
      %c0_187 = arith.constant 0 : index
      %c0_188 = arith.constant 0 : index
      %274 = vector.load %arg21[%c0_186, %c0_187, %c0_188] : memref<1x1x32xf32, #tpu.memory_space<vmem>>, vector<1x1x32xf32>
      %275 = vector.shape_cast %274 : vector<1x1x32xf32> to vector<1x32xf32>
      %cst_189 = arith.constant dense<0.000000e+00> : vector<16xf32>
      %276 = vector.multi_reduction <add>, %271, %cst_189 [1] : vector<16x32xf32> to vector<16xf32>
      %277 = vector.shape_cast %276 : vector<16xf32> to vector<16x1xf32>
      %cst_190 = arith.constant 3.200000e+01 : f32
      %278 = vector.broadcast %cst_190 : f32 to vector<16x1xf32>
      %279 = arith.divf %277, %278 : vector<16x1xf32>
      %280 = vector.broadcast %279 : vector<16x1xf32> to vector<16x32xf32>
      %281 = arith.subf %271, %280 : vector<16x32xf32>
      %282 = arith.mulf %281, %281 : vector<16x32xf32>
      %cst_191 = arith.constant dense<0.000000e+00> : vector<16xf32>
      %283 = vector.multi_reduction <add>, %282, %cst_191 [1] : vector<16x32xf32> to vector<16xf32>
      %284 = vector.shape_cast %283 : vector<16xf32> to vector<16x1xf32>
      %cst_192 = arith.constant 3.200000e+01 : f32
      %285 = vector.broadcast %cst_192 : f32 to vector<16x1xf32>
      %286 = arith.divf %284, %285 : vector<16x1xf32>
      %287 = vector.broadcast %279 : vector<16x1xf32> to vector<16x32xf32>
      %288 = arith.subf %271, %287 : vector<16x32xf32>
      %cst_193 = arith.constant 9.99999996E-13 : f32
      %289 = vector.broadcast %cst_193 : f32 to vector<16x1xf32>
      %290 = arith.addf %286, %289 : vector<16x1xf32>
      %291 = math.rsqrt %290 : vector<16x1xf32>
      %292 = vector.broadcast %291 : vector<16x1xf32> to vector<16x32xf32>
      %293 = arith.mulf %288, %292 : vector<16x32xf32>
      %294 = vector.broadcast %273 : vector<1x32xf32> to vector<16x32xf32>
      %295 = arith.mulf %293, %294 : vector<16x32xf32>
      %296 = vector.broadcast %275 : vector<1x32xf32> to vector<16x32xf32>
      %297 = arith.addf %295, %296 : vector<16x32xf32>
      %298 = arith.truncf %297 : vector<16x32xf32> to vector<16x32xbf16>
      %299 = vector.shape_cast %298 : vector<16x32xbf16> to vector<2x8x32xbf16>
      %c0_194 = arith.constant 0 : index
      %c0_195 = arith.constant 0 : index
      %c0_196 = arith.constant 0 : index
      %300 = vector.load %arg25[%c0_194, %c0_195, %c0_196] : memref<2x8x32xbf16, #tpu.memory_space<vmem>>, vector<2x8x32xbf16>
      tpu.vector_store %arg25[%c0_194, %c0_195, %c0_196], %299 {strides = array<i32>} : memref<2x8x32xbf16, #tpu.memory_space<vmem>>, vector<2x8x32xbf16>,
    } else {
    }
    %c1_i32_7 = arith.constant 1 : i32
    %14 = arith.cmpi eq, %arg1, %c1_i32_7 : i32
    %15 = arith.extui %14 : i1 to i32
    %c0_i32_8 = arith.constant 0 : i32
    %16 = arith.cmpi ne, %15, %c0_i32_8 : i32
    scf.if %16 {
      %17 = vector.extract_strided_slice %9 {offsets = [0, 0, 0], sizes = [2, 1, 32], strides = [1, 1, 1]} : vector<2x8x32xbf16> to vector<2x1x32xbf16>
      %18 = vector.shape_cast %17 : vector<2x1x32xbf16> to vector<2x32xbf16>
      %cst_9 = arith.constant 0.000000e+00 : f32
      %19 = vector.broadcast %cst_9 : f32 to vector<2x32xf32>
      %c0_10 = arith.constant 0 : index
      %c0_11 = arith.constant 0 : index
      %c0_12 = arith.constant 0 : index
      %c0_13 = arith.constant 0 : index
      %20 = vector.load %arg6[%c0_10, %c0_11, %c0_12, %c0_13] : memref<1x4x32x8xbf16, #tpu.memory_space<vmem>>, vector<1x1x32x8xbf16>
      %21 = vector.shape_cast %20 : vector<1x1x32x8xbf16> to vector<32x8xbf16>
      %cst_14 = arith.constant dense<0.000000e+00> : vector<2x8xf32>
      %22 = tpu.matmul %18, %21, %cst_14 {dimension_numbers = #tpu.dot_dimension_numbers<[1], [0], [0], [1], [0, 0, 1, 1], [], []>} : vector<2x32xbf16>, vector<32x8xbf16>, vector<2x8xf32> -> vector<2x8xf32>
      %c0_15 = arith.constant 0 : index
      %c0_16 = arith.constant 0 : index
      %c0_17 = arith.constant 0 : index
      %c0_18 = arith.constant 0 : index
      %23 = vector.load %arg7[%c0_15, %c0_16, %c0_17, %c0_18] : memref<1x4x1x8xf32, #tpu.memory_space<vmem>>, vector<1x1x1x8xf32>
      %24 = vector.shape_cast %23 : vector<1x1x1x8xf32> to vector<1x8xf32>
      %25 = vector.broadcast %24 : vector<1x8xf32> to vector<2x8xf32>
      %26 = arith.addf %22, %25 : vector<2x8xf32>
      %27 = arith.truncf %26 : vector<2x8xf32> to vector<2x8xbf16>
      %28 = vector.shape_cast %27 : vector<2x8xbf16> to vector<2x1x8xbf16>
      %c0_19 = arith.constant 0 : index
      %c0_20 = arith.constant 0 : index
      %c0_21 = arith.constant 0 : index
      %c0_22 = arith.constant 0 : index
      %29 = vector.load %arg8[%c0_19, %c0_20, %c0_21, %c0_22] : memref<1x4x32x8xbf16, #tpu.memory_space<vmem>>, vector<1x1x32x8xbf16>
      %30 = vector.shape_cast %29 : vector<1x1x32x8xbf16> to vector<32x8xbf16>
      %cst_23 = arith.constant dense<0.000000e+00> : vector<16x8xf32>
      %31 = tpu.matmul %10, %30, %cst_23 {dimension_numbers = #tpu.dot_dimension_numbers<[1], [0], [0], [1], [0, 0, 1, 1], [], []>} : vector<16x32xbf16>, vector<32x8xbf16>, vector<16x8xf32> -> vector<16x8xf32>
      %c0_24 = arith.constant 0 : index
      %c0_25 = arith.constant 0 : index
      %c0_26 = arith.constant 0 : index
      %c0_27 = arith.constant 0 : index
      %32 = vector.load %arg9[%c0_24, %c0_25, %c0_26, %c0_27] : memref<1x4x1x8xf32, #tpu.memory_space<vmem>>, vector<1x1x1x8xf32>
      %33 = vector.shape_cast %32 : vector<1x1x1x8xf32> to vector<1x8xf32>
      %34 = vector.broadcast %33 : vector<1x8xf32> to vector<16x8xf32>
      %35 = arith.addf %31, %34 : vector<16x8xf32>
      %36 = arith.truncf %35 : vector<16x8xf32> to vector<16x8xbf16>
      %37 = vector.shape_cast %36 : vector<16x8xbf16> to vector<2x8x8xbf16>
      %c0_28 = arith.constant 0 : index
      %c0_29 = arith.constant 0 : index
      %c0_30 = arith.constant 0 : index
      %c0_31 = arith.constant 0 : index
      %38 = vector.load %arg10[%c0_28, %c0_29, %c0_30, %c0_31] : memref<1x4x32x8xbf16, #tpu.memory_space<vmem>>, vector<1x1x32x8xbf16>
      %39 = vector.shape_cast %38 : vector<1x1x32x8xbf16> to vector<32x8xbf16>
      %cst_32 = arith.constant dense<0.000000e+00> : vector<16x8xf32>
      %40 = tpu.matmul %10, %39, %cst_32 {dimension_numbers = #tpu.dot_dimension_numbers<[1], [0], [0], [1], [0, 0, 1, 1], [], []>} : vector<16x32xbf16>, vector<32x8xbf16>, vector<16x8xf32> -> vector<16x8xf32>
      %c0_33 = arith.constant 0 : index
      %c0_34 = arith.constant 0 : index
      %c0_35 = arith.constant 0 : index
      %c0_36 = arith.constant 0 : index
      %41 = vector.load %arg11[%c0_33, %c0_34, %c0_35, %c0_36] : memref<1x4x1x8xf32, #tpu.memory_space<vmem>>, vector<1x1x1x8xf32>
      %42 = vector.shape_cast %41 : vector<1x1x1x8xf32> to vector<1x8xf32>
      %43 = vector.broadcast %42 : vector<1x8xf32> to vector<16x8xf32>
      %44 = arith.addf %40, %43 : vector<16x8xf32>
      %45 = arith.truncf %44 : vector<16x8xf32> to vector<16x8xbf16>
      %46 = vector.shape_cast %45 : vector<16x8xbf16> to vector<2x8x8xbf16>
      "tpu.trace_start"() <{level = 10 : i32, message = "bqd,bkd->bqk"}> : () -> ()
      %cst_37 = arith.constant dense<0.000000e+00> : vector<2x1x8xf32>
      %47 = tpu.matmul %28, %37, %cst_37 {dimension_numbers = #tpu.dot_dimension_numbers<[2], [2], [1], [1], [0, 0, 0, 1, 1, 1], [0], [0]>} : vector<2x1x8xbf16>, vector<2x8x8xbf16>, vector<2x1x8xf32> -> vector<2x1x8xf32>
      "tpu.trace_stop"() : () -> ()
      %48 = arith.addf %47, %8 : vector<2x1x8xf32>
      %cst_38 = arith.constant dense<0xFF800000> : vector<2x1xf32>
      %49 = vector.multi_reduction <maximumf>, %48, %cst_38 [2] : vector<2x1x8xf32> to vector<2x1xf32>
      %50 = vector.shape_cast %49 : vector<2x1xf32> to vector<2x1x1xf32>
      %51 = vector.broadcast %50 : vector<2x1x1xf32> to vector<2x1x8xf32>
      %52 = arith.subf %48, %51 : vector<2x1x8xf32>
      %53 = math.exp %52 : vector<2x1x8xf32>
      %cst_39 = arith.constant dense<0.000000e+00> : vector<2x1xf32>
      %54 = vector.multi_reduction <add>, %53, %cst_39 [2] : vector<2x1x8xf32> to vector<2x1xf32>
      %55 = vector.shape_cast %54 : vector<2x1xf32> to vector<2x1x1xf32>
      %56 = tpu.reciprocal %55 {approx = true} : vector<2x1x1xf32> -> vector<2x1x1xf32>
      %57 = vector.broadcast %56 : vector<2x1x1xf32> to vector<2x1x8xf32>
      %58 = arith.mulf %53, %57 : vector<2x1x8xf32>
      %59 = arith.truncf %58 : vector<2x1x8xf32> to vector<2x1x8xbf16>
      "tpu.trace_start"() <{level = 10 : i32, message = "bqk,bkd->bqd"}> : () -> ()
      %cst_40 = arith.constant dense<0.000000e+00> : vector<2x1x8xf32>
      %60 = tpu.matmul %59, %46, %cst_40 {dimension_numbers = #tpu.dot_dimension_numbers<[2], [1], [1], [2], [0, 0, 0, 1, 1, 2], [0], [0]>} : vector<2x1x8xbf16>, vector<2x8x8xbf16>, vector<2x1x8xf32> -> vector<2x1x8xf32>
      "tpu.trace_stop"() : () -> ()
      %61 = vector.shape_cast %60 : vector<2x1x8xf32> to vector<2x8xf32>
      %62 = arith.truncf %61 : vector<2x8xf32> to vector<2x8xbf16>
      %c0_41 = arith.constant 0 : index
      %c0_42 = arith.constant 0 : index
      %c0_43 = arith.constant 0 : index
      %c0_44 = arith.constant 0 : index
      %63 = vector.load %arg12[%c0_41, %c0_42, %c0_43, %c0_44] : memref<1x4x8x32xbf16, #tpu.memory_space<vmem>>, vector<1x1x8x32xbf16>
      %64 = vector.shape_cast %63 : vector<1x1x8x32xbf16> to vector<8x32xbf16>
      %cst_45 = arith.constant dense<0.000000e+00> : vector<2x32xf32>
      %65 = tpu.matmul %62, %64, %cst_45 {dimension_numbers = #tpu.dot_dimension_numbers<[1], [0], [0], [1], [0, 0, 1, 1], [], []>} : vector<2x8xbf16>, vector<8x32xbf16>, vector<2x32xf32> -> vector<2x32xf32>
      %66 = arith.addf %19, %65 : vector<2x32xf32>
      %c0_46 = arith.constant 0 : index
      %c1 = arith.constant 1 : index
      %c0_47 = arith.constant 0 : index
      %c0_48 = arith.constant 0 : index
      %67 = vector.load %arg6[%c0_46, %c1, %c0_47, %c0_48] : memref<1x4x32x8xbf16, #tpu.memory_space<vmem>>, vector<1x1x32x8xbf16>
      %68 = vector.shape_cast %67 : vector<1x1x32x8xbf16> to vector<32x8xbf16>
      %cst_49 = arith.constant dense<0.000000e+00> : vector<2x8xf32>
      %69 = tpu.matmul %18, %68, %cst_49 {dimension_numbers = #tpu.dot_dimension_numbers<[1], [0], [0], [1], [0, 0, 1, 1], [], []>} : vector<2x32xbf16>, vector<32x8xbf16>, vector<2x8xf32> -> vector<2x8xf32>
      %c0_50 = arith.constant 0 : index
      %c1_51 = arith.constant 1 : index
      %c0_52 = arith.constant 0 : index
      %c0_53 = arith.constant 0 : index
      %70 = vector.load %arg7[%c0_50, %c1_51, %c0_52, %c0_53] : memref<1x4x1x8xf32, #tpu.memory_space<vmem>>, vector<1x1x1x8xf32>
      %71 = vector.shape_cast %70 : vector<1x1x1x8xf32> to vector<1x8xf32>
      %72 = vector.broadcast %71 : vector<1x8xf32> to vector<2x8xf32>
      %73 = arith.addf %69, %72 : vector<2x8xf32>
      %74 = arith.truncf %73 : vector<2x8xf32> to vector<2x8xbf16>
      %75 = vector.shape_cast %74 : vector<2x8xbf16> to vector<2x1x8xbf16>
      %c0_54 = arith.constant 0 : index
      %c1_55 = arith.constant 1 : index
      %c0_56 = arith.constant 0 : index
      %c0_57 = arith.constant 0 : index
      %76 = vector.load %arg8[%c0_54, %c1_55, %c0_56, %c0_57] : memref<1x4x32x8xbf16, #tpu.memory_space<vmem>>, vector<1x1x32x8xbf16>
      %77 = vector.shape_cast %76 : vector<1x1x32x8xbf16> to vector<32x8xbf16>
      %cst_58 = arith.constant dense<0.000000e+00> : vector<16x8xf32>
      %78 = tpu.matmul %10, %77, %cst_58 {dimension_numbers = #tpu.dot_dimension_numbers<[1], [0], [0], [1], [0, 0, 1, 1], [], []>} : vector<16x32xbf16>, vector<32x8xbf16>, vector<16x8xf32> -> vector<16x8xf32>
      %c0_59 = arith.constant 0 : index
      %c1_60 = arith.constant 1 : index
      %c0_61 = arith.constant 0 : index
      %c0_62 = arith.constant 0 : index
      %79 = vector.load %arg9[%c0_59, %c1_60, %c0_61, %c0_62] : memref<1x4x1x8xf32, #tpu.memory_space<vmem>>, vector<1x1x1x8xf32>
      %80 = vector.shape_cast %79 : vector<1x1x1x8xf32> to vector<1x8xf32>
      %81 = vector.broadcast %80 : vector<1x8xf32> to vector<16x8xf32>
      %82 = arith.addf %78, %81 : vector<16x8xf32>
      %83 = arith.truncf %82 : vector<16x8xf32> to vector<16x8xbf16>
      %84 = vector.shape_cast %83 : vector<16x8xbf16> to vector<2x8x8xbf16>
      %c0_63 = arith.constant 0 : index
      %c1_64 = arith.constant 1 : index
      %c0_65 = arith.constant 0 : index
      %c0_66 = arith.constant 0 : index
      %85 = vector.load %arg10[%c0_63, %c1_64, %c0_65, %c0_66] : memref<1x4x32x8xbf16, #tpu.memory_space<vmem>>, vector<1x1x32x8xbf16>
      %86 = vector.shape_cast %85 : vector<1x1x32x8xbf16> to vector<32x8xbf16>
      %cst_67 = arith.constant dense<0.000000e+00> : vector<16x8xf32>
      %87 = tpu.matmul %10, %86, %cst_67 {dimension_numbers = #tpu.dot_dimension_numbers<[1], [0], [0], [1], [0, 0, 1, 1], [], []>} : vector<16x32xbf16>, vector<32x8xbf16>, vector<16x8xf32> -> vector<16x8xf32>
      %c0_68 = arith.constant 0 : index
      %c1_69 = arith.constant 1 : index
      %c0_70 = arith.constant 0 : index
      %c0_71 = arith.constant 0 : index
      %88 = vector.load %arg11[%c0_68, %c1_69, %c0_70, %c0_71] : memref<1x4x1x8xf32, #tpu.memory_space<vmem>>, vector<1x1x1x8xf32>
      %89 = vector.shape_cast %88 : vector<1x1x1x8xf32> to vector<1x8xf32>
      %90 = vector.broadcast %89 : vector<1x8xf32> to vector<16x8xf32>
      %91 = arith.addf %87, %90 : vector<16x8xf32>
      %92 = arith.truncf %91 : vector<16x8xf32> to vector<16x8xbf16>
      %93 = vector.shape_cast %92 : vector<16x8xbf16> to vector<2x8x8xbf16>
      "tpu.trace_start"() <{level = 10 : i32, message = "bqd,bkd->bqk"}> : () -> ()
      %cst_72 = arith.constant dense<0.000000e+00> : vector<2x1x8xf32>
      %94 = tpu.matmul %75, %84, %cst_72 {dimension_numbers = #tpu.dot_dimension_numbers<[2], [2], [1], [1], [0, 0, 0, 1, 1, 1], [0], [0]>} : vector<2x1x8xbf16>, vector<2x8x8xbf16>, vector<2x1x8xf32> -> vector<2x1x8xf32>
      "tpu.trace_stop"() : () -> ()
      %95 = arith.addf %94, %8 : vector<2x1x8xf32>
      %cst_73 = arith.constant dense<0xFF800000> : vector<2x1xf32>
      %96 = vector.multi_reduction <maximumf>, %95, %cst_73 [2] : vector<2x1x8xf32> to vector<2x1xf32>
      %97 = vector.shape_cast %96 : vector<2x1xf32> to vector<2x1x1xf32>
      %98 = vector.broadcast %97 : vector<2x1x1xf32> to vector<2x1x8xf32>
      %99 = arith.subf %95, %98 : vector<2x1x8xf32>
      %100 = math.exp %99 : vector<2x1x8xf32>
      %cst_74 = arith.constant dense<0.000000e+00> : vector<2x1xf32>
      %101 = vector.multi_reduction <add>, %100, %cst_74 [2] : vector<2x1x8xf32> to vector<2x1xf32>
      %102 = vector.shape_cast %101 : vector<2x1xf32> to vector<2x1x1xf32>
      %103 = tpu.reciprocal %102 {approx = true} : vector<2x1x1xf32> -> vector<2x1x1xf32>
      %104 = vector.broadcast %103 : vector<2x1x1xf32> to vector<2x1x8xf32>
      %105 = arith.mulf %100, %104 : vector<2x1x8xf32>
      %106 = arith.truncf %105 : vector<2x1x8xf32> to vector<2x1x8xbf16>
      "tpu.trace_start"() <{level = 10 : i32, message = "bqk,bkd->bqd"}> : () -> ()
      %cst_75 = arith.constant dense<0.000000e+00> : vector<2x1x8xf32>
      %107 = tpu.matmul %106, %93, %cst_75 {dimension_numbers = #tpu.dot_dimension_numbers<[2], [1], [1], [2], [0, 0, 0, 1, 1, 2], [0], [0]>} : vector<2x1x8xbf16>, vector<2x8x8xbf16>, vector<2x1x8xf32> -> vector<2x1x8xf32>
      "tpu.trace_stop"() : () -> ()
      %108 = vector.shape_cast %107 : vector<2x1x8xf32> to vector<2x8xf32>
      %109 = arith.truncf %108 : vector<2x8xf32> to vector<2x8xbf16>
      %c0_76 = arith.constant 0 : index
      %c1_77 = arith.constant 1 : index
      %c0_78 = arith.constant 0 : index
      %c0_79 = arith.constant 0 : index
      %110 = vector.load %arg12[%c0_76, %c1_77, %c0_78, %c0_79] : memref<1x4x8x32xbf16, #tpu.memory_space<vmem>>, vector<1x1x8x32xbf16>
      %111 = vector.shape_cast %110 : vector<1x1x8x32xbf16> to vector<8x32xbf16>
      %cst_80 = arith.constant dense<0.000000e+00> : vector<2x32xf32>
      %112 = tpu.matmul %109, %111, %cst_80 {dimension_numbers = #tpu.dot_dimension_numbers<[1], [0], [0], [1], [0, 0, 1, 1], [], []>} : vector<2x8xbf16>, vector<8x32xbf16>, vector<2x32xf32> -> vector<2x32xf32>
      %113 = arith.addf %66, %112 : vector<2x32xf32>
      %c0_81 = arith.constant 0 : index
      %c2 = arith.constant 2 : index
      %c0_82 = arith.constant 0 : index
      %c0_83 = arith.constant 0 : index
      %114 = vector.load %arg6[%c0_81, %c2, %c0_82, %c0_83] : memref<1x4x32x8xbf16, #tpu.memory_space<vmem>>, vector<1x1x32x8xbf16>
      %115 = vector.shape_cast %114 : vector<1x1x32x8xbf16> to vector<32x8xbf16>
      %cst_84 = arith.constant dense<0.000000e+00> : vector<2x8xf32>
      %116 = tpu.matmul %18, %115, %cst_84 {dimension_numbers = #tpu.dot_dimension_numbers<[1], [0], [0], [1], [0, 0, 1, 1], [], []>} : vector<2x32xbf16>, vector<32x8xbf16>, vector<2x8xf32> -> vector<2x8xf32>
      %c0_85 = arith.constant 0 : index
      %c2_86 = arith.constant 2 : index
      %c0_87 = arith.constant 0 : index
      %c0_88 = arith.constant 0 : index
      %117 = vector.load %arg7[%c0_85, %c2_86, %c0_87, %c0_88] : memref<1x4x1x8xf32, #tpu.memory_space<vmem>>, vector<1x1x1x8xf32>
      %118 = vector.shape_cast %117 : vector<1x1x1x8xf32> to vector<1x8xf32>
      %119 = vector.broadcast %118 : vector<1x8xf32> to vector<2x8xf32>
      %120 = arith.addf %116, %119 : vector<2x8xf32>
      %121 = arith.truncf %120 : vector<2x8xf32> to vector<2x8xbf16>
      %122 = vector.shape_cast %121 : vector<2x8xbf16> to vector<2x1x8xbf16>
      %c0_89 = arith.constant 0 : index
      %c2_90 = arith.constant 2 : index
      %c0_91 = arith.constant 0 : index
      %c0_92 = arith.constant 0 : index
      %123 = vector.load %arg8[%c0_89, %c2_90, %c0_91, %c0_92] : memref<1x4x32x8xbf16, #tpu.memory_space<vmem>>, vector<1x1x32x8xbf16>
      %124 = vector.shape_cast %123 : vector<1x1x32x8xbf16> to vector<32x8xbf16>
      %cst_93 = arith.constant dense<0.000000e+00> : vector<16x8xf32>
      %125 = tpu.matmul %10, %124, %cst_93 {dimension_numbers = #tpu.dot_dimension_numbers<[1], [0], [0], [1], [0, 0, 1, 1], [], []>} : vector<16x32xbf16>, vector<32x8xbf16>, vector<16x8xf32> -> vector<16x8xf32>
      %c0_94 = arith.constant 0 : index
      %c2_95 = arith.constant 2 : index
      %c0_96 = arith.constant 0 : index
      %c0_97 = arith.constant 0 : index
      %126 = vector.load %arg9[%c0_94, %c2_95, %c0_96, %c0_97] : memref<1x4x1x8xf32, #tpu.memory_space<vmem>>, vector<1x1x1x8xf32>
      %127 = vector.shape_cast %126 : vector<1x1x1x8xf32> to vector<1x8xf32>
      %128 = vector.broadcast %127 : vector<1x8xf32> to vector<16x8xf32>
      %129 = arith.addf %125, %128 : vector<16x8xf32>
      %130 = arith.truncf %129 : vector<16x8xf32> to vector<16x8xbf16>
      %131 = vector.shape_cast %130 : vector<16x8xbf16> to vector<2x8x8xbf16>
      %c0_98 = arith.constant 0 : index
      %c2_99 = arith.constant 2 : index
      %c0_100 = arith.constant 0 : index
      %c0_101 = arith.constant 0 : index
      %132 = vector.load %arg10[%c0_98, %c2_99, %c0_100, %c0_101] : memref<1x4x32x8xbf16, #tpu.memory_space<vmem>>, vector<1x1x32x8xbf16>
      %133 = vector.shape_cast %132 : vector<1x1x32x8xbf16> to vector<32x8xbf16>
      %cst_102 = arith.constant dense<0.000000e+00> : vector<16x8xf32>
      %134 = tpu.matmul %10, %133, %cst_102 {dimension_numbers = #tpu.dot_dimension_numbers<[1], [0], [0], [1], [0, 0, 1, 1], [], []>} : vector<16x32xbf16>, vector<32x8xbf16>, vector<16x8xf32> -> vector<16x8xf32>
      %c0_103 = arith.constant 0 : index
      %c2_104 = arith.constant 2 : index
      %c0_105 = arith.constant 0 : index
      %c0_106 = arith.constant 0 : index
      %135 = vector.load %arg11[%c0_103, %c2_104, %c0_105, %c0_106] : memref<1x4x1x8xf32, #tpu.memory_space<vmem>>, vector<1x1x1x8xf32>
      %136 = vector.shape_cast %135 : vector<1x1x1x8xf32> to vector<1x8xf32>
      %137 = vector.broadcast %136 : vector<1x8xf32> to vector<16x8xf32>
      %138 = arith.addf %134, %137 : vector<16x8xf32>
      %139 = arith.truncf %138 : vector<16x8xf32> to vector<16x8xbf16>
      %140 = vector.shape_cast %139 : vector<16x8xbf16> to vector<2x8x8xbf16>
      "tpu.trace_start"() <{level = 10 : i32, message = "bqd,bkd->bqk"}> : () -> ()
      %cst_107 = arith.constant dense<0.000000e+00> : vector<2x1x8xf32>
      %141 = tpu.matmul %122, %131, %cst_107 {dimension_numbers = #tpu.dot_dimension_numbers<[2], [2], [1], [1], [0, 0, 0, 1, 1, 1], [0], [0]>} : vector<2x1x8xbf16>, vector<2x8x8xbf16>, vector<2x1x8xf32> -> vector<2x1x8xf32>
      "tpu.trace_stop"() : () -> ()
      %142 = arith.addf %141, %8 : vector<2x1x8xf32>
      %cst_108 = arith.constant dense<0xFF800000> : vector<2x1xf32>
      %143 = vector.multi_reduction <maximumf>, %142, %cst_108 [2] : vector<2x1x8xf32> to vector<2x1xf32>
      %144 = vector.shape_cast %143 : vector<2x1xf32> to vector<2x1x1xf32>
      %145 = vector.broadcast %144 : vector<2x1x1xf32> to vector<2x1x8xf32>
      %146 = arith.subf %142, %145 : vector<2x1x8xf32>
      %147 = math.exp %146 : vector<2x1x8xf32>
      %cst_109 = arith.constant dense<0.000000e+00> : vector<2x1xf32>
      %148 = vector.multi_reduction <add>, %147, %cst_109 [2] : vector<2x1x8xf32> to vector<2x1xf32>
      %149 = vector.shape_cast %148 : vector<2x1xf32> to vector<2x1x1xf32>
      %150 = tpu.reciprocal %149 {approx = true} : vector<2x1x1xf32> -> vector<2x1x1xf32>
      %151 = vector.broadcast %150 : vector<2x1x1xf32> to vector<2x1x8xf32>
      %152 = arith.mulf %147, %151 : vector<2x1x8xf32>
      %153 = arith.truncf %152 : vector<2x1x8xf32> to vector<2x1x8xbf16>
      "tpu.trace_start"() <{level = 10 : i32, message = "bqk,bkd->bqd"}> : () -> ()
      %cst_110 = arith.constant dense<0.000000e+00> : vector<2x1x8xf32>
      %154 = tpu.matmul %153, %140, %cst_110 {dimension_numbers = #tpu.dot_dimension_numbers<[2], [1], [1], [2], [0, 0, 0, 1, 1, 2], [0], [0]>} : vector<2x1x8xbf16>, vector<2x8x8xbf16>, vector<2x1x8xf32> -> vector<2x1x8xf32>
      "tpu.trace_stop"() : () -> ()
      %155 = vector.shape_cast %154 : vector<2x1x8xf32> to vector<2x8xf32>
      %156 = arith.truncf %155 : vector<2x8xf32> to vector<2x8xbf16>
      %c0_111 = arith.constant 0 : index
      %c2_112 = arith.constant 2 : index
      %c0_113 = arith.constant 0 : index
      %c0_114 = arith.constant 0 : index
      %157 = vector.load %arg12[%c0_111, %c2_112, %c0_113, %c0_114] : memref<1x4x8x32xbf16, #tpu.memory_space<vmem>>, vector<1x1x8x32xbf16>
      %158 = vector.shape_cast %157 : vector<1x1x8x32xbf16> to vector<8x32xbf16>
      %cst_115 = arith.constant dense<0.000000e+00> : vector<2x32xf32>
      %159 = tpu.matmul %156, %158, %cst_115 {dimension_numbers = #tpu.dot_dimension_numbers<[1], [0], [0], [1], [0, 0, 1, 1], [], []>} : vector<2x8xbf16>, vector<8x32xbf16>, vector<2x32xf32> -> vector<2x32xf32>
      %160 = arith.addf %113, %159 : vector<2x32xf32>
      %c0_116 = arith.constant 0 : index
      %c3 = arith.constant 3 : index
      %c0_117 = arith.constant 0 : index
      %c0_118 = arith.constant 0 : index
      %161 = vector.load %arg6[%c0_116, %c3, %c0_117, %c0_118] : memref<1x4x32x8xbf16, #tpu.memory_space<vmem>>, vector<1x1x32x8xbf16>
      %162 = vector.shape_cast %161 : vector<1x1x32x8xbf16> to vector<32x8xbf16>
      %cst_119 = arith.constant dense<0.000000e+00> : vector<2x8xf32>
      %163 = tpu.matmul %18, %162, %cst_119 {dimension_numbers = #tpu.dot_dimension_numbers<[1], [0], [0], [1], [0, 0, 1, 1], [], []>} : vector<2x32xbf16>, vector<32x8xbf16>, vector<2x8xf32> -> vector<2x8xf32>
      %c0_120 = arith.constant 0 : index
      %c3_121 = arith.constant 3 : index
      %c0_122 = arith.constant 0 : index
      %c0_123 = arith.constant 0 : index
      %164 = vector.load %arg7[%c0_120, %c3_121, %c0_122, %c0_123] : memref<1x4x1x8xf32, #tpu.memory_space<vmem>>, vector<1x1x1x8xf32>
      %165 = vector.shape_cast %164 : vector<1x1x1x8xf32> to vector<1x8xf32>
      %166 = vector.broadcast %165 : vector<1x8xf32> to vector<2x8xf32>
      %167 = arith.addf %163, %166 : vector<2x8xf32>
      %168 = arith.truncf %167 : vector<2x8xf32> to vector<2x8xbf16>
      %169 = vector.shape_cast %168 : vector<2x8xbf16> to vector<2x1x8xbf16>
      %c0_124 = arith.constant 0 : index
      %c3_125 = arith.constant 3 : index
      %c0_126 = arith.constant 0 : index
      %c0_127 = arith.constant 0 : index
      %170 = vector.load %arg8[%c0_124, %c3_125, %c0_126, %c0_127] : memref<1x4x32x8xbf16, #tpu.memory_space<vmem>>, vector<1x1x32x8xbf16>
      %171 = vector.shape_cast %170 : vector<1x1x32x8xbf16> to vector<32x8xbf16>
      %cst_128 = arith.constant dense<0.000000e+00> : vector<16x8xf32>
      %172 = tpu.matmul %10, %171, %cst_128 {dimension_numbers = #tpu.dot_dimension_numbers<[1], [0], [0], [1], [0, 0, 1, 1], [], []>} : vector<16x32xbf16>, vector<32x8xbf16>, vector<16x8xf32> -> vector<16x8xf32>
      %c0_129 = arith.constant 0 : index
      %c3_130 = arith.constant 3 : index
      %c0_131 = arith.constant 0 : index
      %c0_132 = arith.constant 0 : index
      %173 = vector.load %arg9[%c0_129, %c3_130, %c0_131, %c0_132] : memref<1x4x1x8xf32, #tpu.memory_space<vmem>>, vector<1x1x1x8xf32>
      %174 = vector.shape_cast %173 : vector<1x1x1x8xf32> to vector<1x8xf32>
      %175 = vector.broadcast %174 : vector<1x8xf32> to vector<16x8xf32>
      %176 = arith.addf %172, %175 : vector<16x8xf32>
      %177 = arith.truncf %176 : vector<16x8xf32> to vector<16x8xbf16>
      %178 = vector.shape_cast %177 : vector<16x8xbf16> to vector<2x8x8xbf16>
      %c0_133 = arith.constant 0 : index
      %c3_134 = arith.constant 3 : index
      %c0_135 = arith.constant 0 : index
      %c0_136 = arith.constant 0 : index
      %179 = vector.load %arg10[%c0_133, %c3_134, %c0_135, %c0_136] : memref<1x4x32x8xbf16, #tpu.memory_space<vmem>>, vector<1x1x32x8xbf16>
      %180 = vector.shape_cast %179 : vector<1x1x32x8xbf16> to vector<32x8xbf16>
      %cst_137 = arith.constant dense<0.000000e+00> : vector<16x8xf32>
      %181 = tpu.matmul %10, %180, %cst_137 {dimension_numbers = #tpu.dot_dimension_numbers<[1], [0], [0], [1], [0, 0, 1, 1], [], []>} : vector<16x32xbf16>, vector<32x8xbf16>, vector<16x8xf32> -> vector<16x8xf32>
      %c0_138 = arith.constant 0 : index
      %c3_139 = arith.constant 3 : index
      %c0_140 = arith.constant 0 : index
      %c0_141 = arith.constant 0 : index
      %182 = vector.load %arg11[%c0_138, %c3_139, %c0_140, %c0_141] : memref<1x4x1x8xf32, #tpu.memory_space<vmem>>, vector<1x1x1x8xf32>
      %183 = vector.shape_cast %182 : vector<1x1x1x8xf32> to vector<1x8xf32>
      %184 = vector.broadcast %183 : vector<1x8xf32> to vector<16x8xf32>
      %185 = arith.addf %181, %184 : vector<16x8xf32>
      %186 = arith.truncf %185 : vector<16x8xf32> to vector<16x8xbf16>
      %187 = vector.shape_cast %186 : vector<16x8xbf16> to vector<2x8x8xbf16>
      "tpu.trace_start"() <{level = 10 : i32, message = "bqd,bkd->bqk"}> : () -> ()
      %cst_142 = arith.constant dense<0.000000e+00> : vector<2x1x8xf32>
      %188 = tpu.matmul %169, %178, %cst_142 {dimension_numbers = #tpu.dot_dimension_numbers<[2], [2], [1], [1], [0, 0, 0, 1, 1, 1], [0], [0]>} : vector<2x1x8xbf16>, vector<2x8x8xbf16>, vector<2x1x8xf32> -> vector<2x1x8xf32>
      "tpu.trace_stop"() : () -> ()
      %189 = arith.addf %188, %8 : vector<2x1x8xf32>
      %cst_143 = arith.constant dense<0xFF800000> : vector<2x1xf32>
      %190 = vector.multi_reduction <maximumf>, %189, %cst_143 [2] : vector<2x1x8xf32> to vector<2x1xf32>
      %191 = vector.shape_cast %190 : vector<2x1xf32> to vector<2x1x1xf32>
      %192 = vector.broadcast %191 : vector<2x1x1xf32> to vector<2x1x8xf32>
      %193 = arith.subf %189, %192 : vector<2x1x8xf32>
      %194 = math.exp %193 : vector<2x1x8xf32>
      %cst_144 = arith.constant dense<0.000000e+00> : vector<2x1xf32>
      %195 = vector.multi_reduction <add>, %194, %cst_144 [2] : vector<2x1x8xf32> to vector<2x1xf32>
      %196 = vector.shape_cast %195 : vector<2x1xf32> to vector<2x1x1xf32>
      %197 = tpu.reciprocal %196 {approx = true} : vector<2x1x1xf32> -> vector<2x1x1xf32>
      %198 = vector.broadcast %197 : vector<2x1x1xf32> to vector<2x1x8xf32>
      %199 = arith.mulf %194, %198 : vector<2x1x8xf32>
      %200 = arith.truncf %199 : vector<2x1x8xf32> to vector<2x1x8xbf16>
      "tpu.trace_start"() <{level = 10 : i32, message = "bqk,bkd->bqd"}> : () -> ()
      %cst_145 = arith.constant dense<0.000000e+00> : vector<2x1x8xf32>
      %201 = tpu.matmul %200, %187, %cst_145 {dimension_numbers = #tpu.dot_dimension_numbers<[2], [1], [1], [2], [0, 0, 0, 1, 1, 2], [0], [0]>} : vector<2x1x8xbf16>, vector<2x8x8xbf16>, vector<2x1x8xf32> -> vector<2x1x8xf32>
      "tpu.trace_stop"() : () -> ()
      %202 = vector.shape_cast %201 : vector<2x1x8xf32> to vector<2x8xf32>
      %203 = arith.truncf %202 : vector<2x8xf32> to vector<2x8xbf16>
      %c0_146 = arith.constant 0 : index
      %c3_147 = arith.constant 3 : index
      %c0_148 = arith.constant 0 : index
      %c0_149 = arith.constant 0 : index
      %204 = vector.load %arg12[%c0_146, %c3_147, %c0_148, %c0_149] : memref<1x4x8x32xbf16, #tpu.memory_space<vmem>>, vector<1x1x8x32xbf16>
      %205 = vector.shape_cast %204 : vector<1x1x8x32xbf16> to vector<8x32xbf16>
      %cst_150 = arith.constant dense<0.000000e+00> : vector<2x32xf32>
      %206 = tpu.matmul %203, %205, %cst_150 {dimension_numbers = #tpu.dot_dimension_numbers<[1], [0], [0], [1], [0, 0, 1, 1], [], []>} : vector<2x8xbf16>, vector<8x32xbf16>, vector<2x32xf32> -> vector<2x32xf32>
      %207 = arith.addf %160, %206 : vector<2x32xf32>
      %c0_151 = arith.constant 0 : index
      %c0_152 = arith.constant 0 : index
      %c0_153 = arith.constant 0 : index
      %208 = vector.load %arg13[%c0_151, %c0_152, %c0_153] : memref<1x1x32xf32, #tpu.memory_space<vmem>>, vector<1x1x32xf32>
      %209 = vector.shape_cast %208 : vector<1x1x32xf32> to vector<1x32xf32>
      %210 = vector.broadcast %209 : vector<1x32xf32> to vector<2x32xf32>
      %211 = arith.addf %207, %210 : vector<2x32xf32>
      %212 = arith.extf %18 : vector<2x32xbf16> to vector<2x32xf32>
      %213 = arith.addf %212, %211 : vector<2x32xf32>
      %c0_154 = arith.constant 0 : index
      %c0_155 = arith.constant 0 : index
      %c0_156 = arith.constant 0 : index
      %214 = vector.load %arg14[%c0_154, %c0_155, %c0_156] : memref<1x1x32xf32, #tpu.memory_space<vmem>>, vector<1x1x32xf32>
      %215 = vector.shape_cast %214 : vector<1x1x32xf32> to vector<1x32xf32>
      %c0_157 = arith.constant 0 : index
      %c0_158 = arith.constant 0 : index
      %c0_159 = arith.constant 0 : index
      %216 = vector.load %arg15[%c0_157, %c0_158, %c0_159] : memref<1x1x32xf32, #tpu.memory_space<vmem>>, vector<1x1x32xf32>
      %217 = vector.shape_cast %216 : vector<1x1x32xf32> to vector<1x32xf32>
      %cst_160 = arith.constant dense<0.000000e+00> : vector<2xf32>
      %218 = vector.multi_reduction <add>, %213, %cst_160 [1] : vector<2x32xf32> to vector<2xf32>
      %219 = vector.shape_cast %218 : vector<2xf32> to vector<2x1xf32>
      %cst_161 = arith.constant 3.200000e+01 : f32
      %220 = vector.broadcast %cst_161 : f32 to vector<2x1xf32>
      %221 = arith.divf %219, %220 : vector<2x1xf32>
      %222 = vector.broadcast %221 : vector<2x1xf32> to vector<2x32xf32>
      %223 = arith.subf %213, %222 : vector<2x32xf32>
      %224 = arith.mulf %223, %223 : vector<2x32xf32>
      %cst_162 = arith.constant dense<0.000000e+00> : vector<2xf32>
      %225 = vector.multi_reduction <add>, %224, %cst_162 [1] : vector<2x32xf32> to vector<2xf32>
      %226 = vector.shape_cast %225 : vector<2xf32> to vector<2x1xf32>
      %cst_163 = arith.constant 3.200000e+01 : f32
      %227 = vector.broadcast %cst_163 : f32 to vector<2x1xf32>
      %228 = arith.divf %226, %227 : vector<2x1xf32>
      %229 = vector.broadcast %221 : vector<2x1xf32> to vector<2x32xf32>
      %230 = arith.subf %213, %229 : vector<2x32xf32>
      %cst_164 = arith.constant 9.99999996E-13 : f32
      %231 = vector.broadcast %cst_164 : f32 to vector<2x1xf32>
      %232 = arith.addf %228, %231 : vector<2x1xf32>
      %233 = math.rsqrt %232 : vector<2x1xf32>
      %234 = vector.broadcast %233 : vector<2x1xf32> to vector<2x32xf32>
      %235 = arith.mulf %230, %234 : vector<2x32xf32>
      %236 = vector.broadcast %215 : vector<1x32xf32> to vector<2x32xf32>
      %237 = arith.mulf %235, %236 : vector<2x32xf32>
      %238 = vector.broadcast %217 : vector<1x32xf32> to vector<2x32xf32>
      %239 = arith.addf %237, %238 : vector<2x32xf32>
      %240 = arith.truncf %239 : vector<2x32xf32> to vector<2x32xbf16>
      %c0_165 = arith.constant 0 : index
      %c0_166 = arith.constant 0 : index
      %c0_167 = arith.constant 0 : index
      %241 = vector.load %arg16[%c0_165, %c0_166, %c0_167] : memref<1x32x64xbf16, #tpu.memory_space<vmem>>, vector<1x32x64xbf16>
      %242 = vector.shape_cast %241 : vector<1x32x64xbf16> to vector<32x64xbf16>
      %cst_168 = arith.constant dense<0.000000e+00> : vector<2x64xf32>
      %243 = tpu.matmul %240, %242, %cst_168 {dimension_numbers = #tpu.dot_dimension_numbers<[1], [0], [0], [1], [0, 0, 1, 1], [], []>} : vector<2x32xbf16>, vector<32x64xbf16>, vector<2x64xf32> -> vector<2x64xf32>
      %c0_169 = arith.constant 0 : index
      %c0_170 = arith.constant 0 : index
      %c0_171 = arith.constant 0 : index
      %244 = vector.load %arg17[%c0_169, %c0_170, %c0_171] : memref<1x1x64xf32, #tpu.memory_space<vmem>>, vector<1x1x64xf32>
      %245 = vector.shape_cast %244 : vector<1x1x64xf32> to vector<1x64xf32>
      %246 = vector.broadcast %245 : vector<1x64xf32> to vector<2x64xf32>
      %247 = arith.addf %243, %246 : vector<2x64xf32>
      %248 = arith.mulf %247, %247 : vector<2x64xf32>
      %249 = arith.mulf %247, %248 : vector<2x64xf32>
      %cst_172 = arith.constant 4.471500e-02 : f32
      %250 = vector.broadcast %cst_172 : f32 to vector<2x64xf32>
      %251 = arith.mulf %250, %249 : vector<2x64xf32>
      %252 = arith.addf %247, %251 : vector<2x64xf32>
      %cst_173 = arith.constant 0.797884583 : f32
      %253 = vector.broadcast %cst_173 : f32 to vector<2x64xf32>
      %254 = arith.mulf %253, %252 : vector<2x64xf32>
      %255 = math.tanh %254 : vector<2x64xf32>
      %cst_174 = arith.constant 1.000000e+00 : f32
      %256 = vector.broadcast %cst_174 : f32 to vector<2x64xf32>
      %257 = arith.addf %256, %255 : vector<2x64xf32>
      %cst_175 = arith.constant 5.000000e-01 : f32
      %258 = vector.broadcast %cst_175 : f32 to vector<2x64xf32>
      %259 = arith.mulf %258, %257 : vector<2x64xf32>
      %260 = arith.mulf %247, %259 : vector<2x64xf32>
      %261 = arith.truncf %260 : vector<2x64xf32> to vector<2x64xbf16>
      %c0_176 = arith.constant 0 : index
      %c0_177 = arith.constant 0 : index
      %c0_178 = arith.constant 0 : index
      %262 = vector.load %arg18[%c0_176, %c0_177, %c0_178] : memref<1x64x32xbf16, #tpu.memory_space<vmem>>, vector<1x64x32xbf16>
      %263 = vector.shape_cast %262 : vector<1x64x32xbf16> to vector<64x32xbf16>
      %cst_179 = arith.constant dense<0.000000e+00> : vector<2x32xf32>
      %264 = tpu.matmul %261, %263, %cst_179 {dimension_numbers = #tpu.dot_dimension_numbers<[1], [0], [0], [1], [0, 0, 1, 1], [], []>} : vector<2x64xbf16>, vector<64x32xbf16>, vector<2x32xf32> -> vector<2x32xf32>
      %c0_180 = arith.constant 0 : index
      %c0_181 = arith.constant 0 : index
      %c0_182 = arith.constant 0 : index
      %265 = vector.load %arg19[%c0_180, %c0_181, %c0_182] : memref<1x1x32xf32, #tpu.memory_space<vmem>>, vector<1x1x32xf32>
      %266 = vector.shape_cast %265 : vector<1x1x32xf32> to vector<1x32xf32>
      %267 = vector.broadcast %266 : vector<1x32xf32> to vector<2x32xf32>
      %268 = arith.addf %264, %267 : vector<2x32xf32>
      %269 = arith.addf %239, %268 : vector<2x32xf32>
      %c0_183 = arith.constant 0 : index
      %c0_184 = arith.constant 0 : index
      %c0_185 = arith.constant 0 : index
      %270 = vector.load %arg20[%c0_183, %c0_184, %c0_185] : memref<1x1x32xf32, #tpu.memory_space<vmem>>, vector<1x1x32xf32>
      %271 = vector.shape_cast %270 : vector<1x1x32xf32> to vector<1x32xf32>
      %c0_186 = arith.constant 0 : index
      %c0_187 = arith.constant 0 : index
      %c0_188 = arith.constant 0 : index
      %272 = vector.load %arg21[%c0_186, %c0_187, %c0_188] : memref<1x1x32xf32, #tpu.memory_space<vmem>>, vector<1x1x32xf32>
      %273 = vector.shape_cast %272 : vector<1x1x32xf32> to vector<1x32xf32>
      %cst_189 = arith.constant dense<0.000000e+00> : vector<2xf32>
      %274 = vector.multi_reduction <add>, %269, %cst_189 [1] : vector<2x32xf32> to vector<2xf32>
      %275 = vector.shape_cast %274 : vector<2xf32> to vector<2x1xf32>
      %cst_190 = arith.constant 3.200000e+01 : f32
      %276 = vector.broadcast %cst_190 : f32 to vector<2x1xf32>
      %277 = arith.divf %275, %276 : vector<2x1xf32>
      %278 = vector.broadcast %277 : vector<2x1xf32> to vector<2x32xf32>
      %279 = arith.subf %269, %278 : vector<2x32xf32>
      %280 = arith.mulf %279, %279 : vector<2x32xf32>
      %cst_191 = arith.constant dense<0.000000e+00> : vector<2xf32>
      %281 = vector.multi_reduction <add>, %280, %cst_191 [1] : vector<2x32xf32> to vector<2xf32>
      %282 = vector.shape_cast %281 : vector<2xf32> to vector<2x1xf32>
      %cst_192 = arith.constant 3.200000e+01 : f32
      %283 = vector.broadcast %cst_192 : f32 to vector<2x1xf32>
      %284 = arith.divf %282, %283 : vector<2x1xf32>
      %285 = vector.broadcast %277 : vector<2x1xf32> to vector<2x32xf32>
      %286 = arith.subf %269, %285 : vector<2x32xf32>
      %cst_193 = arith.constant 9.99999996E-13 : f32
      %287 = vector.broadcast %cst_193 : f32 to vector<2x1xf32>
      %288 = arith.addf %284, %287 : vector<2x1xf32>
      %289 = math.rsqrt %288 : vector<2x1xf32>
      %290 = vector.broadcast %289 : vector<2x1xf32> to vector<2x32xf32>
      %291 = arith.mulf %286, %290 : vector<2x32xf32>
      %292 = vector.broadcast %271 : vector<1x32xf32> to vector<2x32xf32>
      %293 = arith.mulf %291, %292 : vector<2x32xf32>
      %294 = vector.broadcast %273 : vector<1x32xf32> to vector<2x32xf32>
      %295 = arith.addf %293, %294 : vector<2x32xf32>
      %296 = arith.truncf %295 : vector<2x32xf32> to vector<2x32xbf16>
      %c0_194 = arith.constant 0 : index
      %c0_195 = arith.constant 0 : index
      %297 = vector.load %arg22[%c0_194, %c0_195] : memref<32x128xbf16, #tpu.memory_space<vmem>>, vector<32x128xbf16>
      %cst_196 = arith.constant dense<0.000000e+00> : vector<2x128xf32>
      %298 = tpu.matmul %296, %297, %cst_196 {dimension_numbers = #tpu.dot_dimension_numbers<[1], [0], [0], [1], [0, 0, 1, 1], [], []>} : vector<2x32xbf16>, vector<32x128xbf16>, vector<2x128xf32> -> vector<2x128xf32>
      %c0_197 = arith.constant 0 : index
      %c0_198 = arith.constant 0 : index
      %299 = vector.load %arg23[%c0_197, %c0_198] : memref<1x128xf32, #tpu.memory_space<vmem>>, vector<1x128xf32>
      %300 = vector.broadcast %299 : vector<1x128xf32> to vector<2x128xf32>
      %301 = arith.addf %298, %300 : vector<2x128xf32>
      %c0_199 = arith.constant 0 : index
      %c0_200 = arith.constant 0 : index
      %302 = vector.load %arg24[%c0_199, %c0_200] : memref<2x128xf32, #tpu.memory_space<vmem>>, vector<2x128xf32>
      tpu.vector_store %arg24[%c0_199, %c0_200], %301 {strides = array<i32>} : memref<2x128xf32, #tpu.memory_space<vmem>>, vector<2x128xf32>,
    } else {
    }
    return
  }
  func.func @transform_0(%arg0: i32, %arg1: i32) -> (i32, i32, i32) {
    %c0_i32 = arith.constant 0 : i32
    %c0_i32_0 = arith.constant 0 : i32
    %c0_i32_1 = arith.constant 0 : i32
    return %arg0, %c0_i32, %c0_i32_0 : i32, i32, i32
  }
  func.func @transform_1(%arg0: i32, %arg1: i32) -> (i32, i32) {
    %c0_i32 = arith.constant 0 : i32
    %c0_i32_0 = arith.constant 0 : i32
    return %arg0, %c0_i32 : i32, i32
  }
  func.func @transform_2(%arg0: i32, %arg1: i32) -> (i32, i32) {
    %c0_i32 = arith.constant 0 : i32
    %c0_i32_0 = arith.constant 0 : i32
    %c0_i32_1 = arith.constant 0 : i32
    return %c0_i32, %c0_i32_0 : i32, i32
  }
  func.func @transform_3(%arg0: i32, %arg1: i32) -> (i32, i32) {
    %c0_i32 = arith.constant 0 : i32
    %c0_i32_0 = arith.constant 0 : i32
    %c0_i32_1 = arith.constant 0 : i32
    return %c0_i32, %c0_i32_0 : i32, i32
  }
  func.func @transform_4(%arg0: i32, %arg1: i32) -> (i32, i32, i32, i32) {
    %c0_i32 = arith.constant 0 : i32
    %c0_i32_0 = arith.constant 0 : i32
    %c0_i32_1 = arith.constant 0 : i32
    %c0_i32_2 = arith.constant 0 : i32
    return %arg1, %c0_i32, %c0_i32_0, %c0_i32_1 : i32, i32, i32, i32
  }
  func.func @transform_5(%arg0: i32, %arg1: i32) -> (i32, i32, i32, i32) {
    %c0_i32 = arith.constant 0 : i32
    %c0_i32_0 = arith.constant 0 : i32
    %c0_i32_1 = arith.constant 0 : i32
    %c0_i32_2 = arith.constant 0 : i32
    return %arg1, %c0_i32, %c0_i32_0, %c0_i32_1 : i32, i32, i32, i32
  }
  func.func @transform_6(%arg0: i32, %arg1: i32) -> (i32, i32, i32, i32) {
    %c0_i32 = arith.constant 0 : i32
    %c0_i32_0 = arith.constant 0 : i32
    %c0_i32_1 = arith.constant 0 : i32
    %c0_i32_2 = arith.constant 0 : i32
    return %arg1, %c0_i32, %c0_i32_0, %c0_i32_1 : i32, i32, i32, i32
  }
  func.func @transform_7(%arg0: i32, %arg1: i32) -> (i32, i32, i32, i32) {
    %c0_i32 = arith.constant 0 : i32
    %c0_i32_0 = arith.constant 0 : i32
    %c0_i32_1 = arith.constant 0 : i32
    %c0_i32_2 = arith.constant 0 : i32
    return %arg1, %c0_i32, %c0_i32_0, %c0_i32_1 : i32, i32, i32, i32
  }
  func.func @transform_8(%arg0: i32, %arg1: i32) -> (i32, i32, i32, i32) {
    %c0_i32 = arith.constant 0 : i32
    %c0_i32_0 = arith.constant 0 : i32
    %c0_i32_1 = arith.constant 0 : i32
    %c0_i32_2 = arith.constant 0 : i32
    return %arg1, %c0_i32, %c0_i32_0, %c0_i32_1 : i32, i32, i32, i32
  }
  func.func @transform_9(%arg0: i32, %arg1: i32) -> (i32, i32, i32, i32) {
    %c0_i32 = arith.constant 0 : i32
    %c0_i32_0 = arith.constant 0 : i32
    %c0_i32_1 = arith.constant 0 : i32
    %c0_i32_2 = arith.constant 0 : i32
    return %arg1, %c0_i32, %c0_i32_0, %c0_i32_1 : i32, i32, i32, i32
  }
  func.func @transform_10(%arg0: i32, %arg1: i32) -> (i32, i32, i32, i32) {
    %c0_i32 = arith.constant 0 : i32
    %c0_i32_0 = arith.constant 0 : i32
    %c0_i32_1 = arith.constant 0 : i32
    %c0_i32_2 = arith.constant 0 : i32
    return %arg1, %c0_i32, %c0_i32_0, %c0_i32_1 : i32, i32, i32, i32
  }
  func.func @transform_11(%arg0: i32, %arg1: i32) -> (i32, i32, i32) {
    %c0_i32 = arith.constant 0 : i32
    %c0_i32_0 = arith.constant 0 : i32
    %c0_i32_1 = arith.constant 0 : i32
    return %arg1, %c0_i32, %c0_i32_0 : i32, i32, i32
  }
  func.func @transform_12(%arg0: i32, %arg1: i32) -> (i32, i32, i32) {
    %c0_i32 = arith.constant 0 : i32
    %c0_i32_0 = arith.constant 0 : i32
    %c0_i32_1 = arith.constant 0 : i32
    return %arg1, %c0_i32, %c0_i32_0 : i32, i32, i32
  }
  func.func @transform_13(%arg0: i32, %arg1: i32) -> (i32, i32, i32) {
    %c0_i32 = arith.constant 0 : i32
    %c0_i32_0 = arith.constant 0 : i32
    %c0_i32_1 = arith.constant 0 : i32
    return %arg1, %c0_i32, %c0_i32_0 : i32, i32, i32
  }
  func.func @transform_14(%arg0: i32, %arg1: i32) -> (i32, i32, i32) {
    %c0_i32 = arith.constant 0 : i32
    %c0_i32_0 = arith.constant 0 : i32
    %c0_i32_1 = arith.constant 0 : i32
    return %arg1, %c0_i32, %c0_i32_0 : i32, i32, i32
  }
  func.func @transform_15(%arg0: i32, %arg1: i32) -> (i32, i32, i32) {
    %c0_i32 = arith.constant 0 : i32
    %c0_i32_0 = arith.constant 0 : i32
    %c0_i32_1 = arith.constant 0 : i32
    return %arg1, %c0_i32, %c0_i32_0 : i32, i32, i32
  }
  func.func @transform_16(%arg0: i32, %arg1: i32) -> (i32, i32, i32) {
    %c0_i32 = arith.constant 0 : i32
    %c0_i32_0 = arith.constant 0 : i32
    %c0_i32_1 = arith.constant 0 : i32
    return %arg1, %c0_i32, %c0_i32_0 : i32, i32, i32
  }
  func.func @transform_17(%arg0: i32, %arg1: i32) -> (i32, i32, i32) {
    %c0_i32 = arith.constant 0 : i32
    %c0_i32_0 = arith.constant 0 : i32
    %c0_i32_1 = arith.constant 0 : i32
    return %arg1, %c0_i32, %c0_i32_0 : i32, i32, i32
  }
  func.func @transform_18(%arg0: i32, %arg1: i32) -> (i32, i32, i32) {
    %c0_i32 = arith.constant 0 : i32
    %c0_i32_0 = arith.constant 0 : i32
    %c0_i32_1 = arith.constant 0 : i32
    return %arg1, %c0_i32, %c0_i32_0 : i32, i32, i32
  }
  func.func @transform_19(%arg0: i32, %arg1: i32) -> (i32, i32, i32) {
    %c0_i32 = arith.constant 0 : i32
    %c0_i32_0 = arith.constant 0 : i32
    %c0_i32_1 = arith.constant 0 : i32
    return %arg1, %c0_i32, %c0_i32_0 : i32, i32, i32
  }
  func.func @transform_20(%arg0: i32, %arg1: i32) -> (i32, i32) {
    %c0_i32 = arith.constant 0 : i32
    %c0_i32_0 = arith.constant 0 : i32
    %c0_i32_1 = arith.constant 0 : i32
    return %c0_i32, %c0_i32_0 : i32, i32
  }
  func.func @transform_21(%arg0: i32, %arg1: i32) -> (i32, i32) {
    %c0_i32 = arith.constant 0 : i32
    %c0_i32_0 = arith.constant 0 : i32
    %c0_i32_1 = arith.constant 0 : i32
    return %c0_i32, %c0_i32_0 : i32, i32
  }
  func.func @transform_22(%arg0: i32, %arg1: i32) -> (i32, i32) {
    %c0_i32 = arith.constant 0 : i32
    %c0_i32_0 = arith.constant 0 : i32
    return %arg0, %c0_i32 : i32, i32
  }
}

</mosaic_0001>

<bundles_post_ra>
// kernel: product_category_classifier_forward.1
= control target key start
LH: loop header
LB: loop body
LE: loop exit
PB: predicated region body
PF: predicated region fallthrough
CT: control target
= control target key end

     0   :  { %s8130_s0 = inlined_call_operand.vmem [shape: bf16[2,8,32], index: 0, kind: input, shape index: {}]   ;;  %s8131_s1 = inlined_call_operand.vmem [shape: f32[2,8], index: 1, kind: input, shape index: {}]   ;;  %s8132_s2 = inlined_call_operand.vmem [shape: f32[1,32], index: 2, kind: input, shape index: {}]   ;;  %s8133_s3 = inlined_call_operand.vmem [shape: f32[1,32], index: 3, kind: input, shape index: {}]   ;;  %s8134_s4 = inlined_call_operand.vmem [shape: bf16[2,4,32,8], index: 4, kind: input, shape index: {}]   ;;  %s8135_s5 = inlined_call_operand.vmem [shape: f32[2,4,1,8], index: 5, kind: input, shape index: {}]   ;;  %s8136_s6 = inlined_call_operand.vmem [shape: bf16[2,4,32,8], index: 6, kind: input, shape index: {}]   ;;  %s8137_s7 = inlined_call_operand.vmem [shape: f32[2,4,1,8], index: 7, kind: input, shape index: {}]   ;;  %s8138_s8 = inlined_call_operand.vmem [shape: bf16[2,4,32,8], index: 8, kind: input, shape index: {}]   ;;  %s8139_s9 = inlined_call_operand.vmem [shape: f32[2,4,1,8], index: 9, kind: input, shape index: {}]   ;;  %s8140_s10 = inlined_call_operand.vmem [shape: bf16[2,4,8,32], index: 10, kind: input, shape index: {}]   ;;  %s8141_s11 = inlined_call_operand.vmem [shape: f32[2,1,32], index: 11, kind: input, shape index: {}]   ;;  %s8142_s12 = inlined_call_operand.vmem [shape: f32[2,1,32], index: 12, kind: input, shape index: {}]   ;;  %s8143_s13 = inlined_call_operand.vmem [shape: f32[2,1,32], index: 13, kind: input, shape index: {}]   ;;  %s8144_s14 = inlined_call_operand.vmem [shape: bf16[2,32,64], index: 14, kind: input, shape index: {}]   ;;  %s8145_s15 = inlined_call_operand.vmem [shape: f32[2,1,64], index: 15, kind: input, shape index: {}]   ;;  %s8146_s16 = inlined_call_operand.vmem [shape: bf16[2,64,32], index: 16, kind: input, shape index: {}]   ;;  %s8147_s17 = inlined_call_operand.vmem [shape: f32[2,1,32], index: 17, kind: input, shape index: {}]   ;;  %s8148_s18 = inlined_call_operand.vmem [shape: f32[2,1,32], index: 18, kind: input, shape index: {}]   ;;  %s8149_s19 = inlined_call_operand.vmem [shape: f32[2,1,32], index: 19, kind: input, shape index: {}]   ;;  %s8150_s20 = inlined_call_operand.vmem [shape: bf16[32,128], index: 20, kind: input, shape index: {}]   ;;  %s8151_s21 = inlined_call_operand.vmem [shape: f32[1,128], index: 21, kind: input, shape index: {}]   ;;  %s8152_s22 = inlined_call_operand.hbm [shape: f32[2,128], index: 22, kind: output, shape index: {}]  }
   0x1   :  { %8157 = sst [smem:[#allocation10_spill]] %s8130_s0 }
   0x2   :  { %8158 = sst [smem:[#allocation11_spill]] %s8131_s1 }
   0x3   :  { %8159 = sst [smem:[#allocation12_spill]] %s8132_s2 }
   0x4   :  { %8160 = sst [smem:[#allocation13_spill]] %s8133_s3 }
   0x5   :  { %8161 = sst [smem:[#allocation14_spill]] %s8134_s4 }
   0x6   :  { %8162 = sst [smem:[#allocation15_spill]] %s8135_s5 }
   0x7   :  { %8163 = sst [smem:[#allocation16_spill]] %s8136_s6 }
   0x8   :  { %8164 = sst [smem:[#allocation17_spill]] %s8137_s7 }
   0x9   :  { %8165 = sst [smem:[#allocation18_spill]] %s8138_s8 }
   0xa   :  { %8166 = sst [smem:[#allocation19_spill]] %s8139_s9 }
   0xb   :  { %8167 = sst [smem:[#allocation20_spill]] %s8140_s10 }
   0xc   :  { %8168 = sst [smem:[#allocation21_spill]] %s8141_s11 }
   0xd   :  { %8169 = sst [smem:[#allocation22_spill]] %s8142_s12 }
   0xe   :  { %8170 = sst [smem:[#allocation23_spill]] %s8143_s13 }
   0xf   :  { %8171 = sst [smem:[#allocation24_spill]] %s8144_s14 }
  0x10   :  { %8172 = sst [smem:[#allocation25_spill]] %s8145_s15 }
  0x11   :  { %8173 = sst [smem:[#allocation26_spill]] %s8148_s18 }
  0x12   :  { %8174 = sst [smem:[#allocation27_spill]] %s8149_s19 }
  0x13   :  { %8175 = sst [smem:[#allocation28_spill]] %s8150_s20 }
  0x14   :  { %8176 = sst [smem:[#allocation29_spill]] %s8151_s21 }
  0x15   :  { %8177 = sst [smem:[#allocation30_spill]] %s8152_s22 }
  0x16   :  { %27 = vsyncpa [#allocation4], 0  ;;  %s7325_s3 = smov 0   ;;  %s7327_s28 = smov 0  }
  0x17   :  { %s7329_s29 = smov 0  }
  0x18 LB: > { %8178 = sst [smem:[#allocation6_spill]] %s7194_s3  ;;  %s42_s4 = sadd.s32 1, %s7198_s28  ;;  %s7202_s29 = sphi %s7329_s29, %s33_s29   ;;  %s7198_s28 = sphi %s7327_s28, %s8211_s28   ;;  %s7194_s3 = sphi %s7325_s3, %s8210_s3  }
  0x19   : > { %8179 = sst [smem:[#allocation7_spill]] %s7198_s28  ;;  %p43_p0 = scmp.ge.s32.totalorder %s42_s4, 2 }
  0x1a   : > { %8180 = sst [smem:[#allocation8_spill]] %s7202_s29  ;;  %p5924_p1 = scmp.ge.s32.totalorder %s7202_s29, 1 }
  0x1b   : > { %p778_p2 = scmp.lt.s32.totalorder %s7202_s29, 3  ;;  %s8213_s4 = smov (%p43_p0, %s42_s4), 0 }
  0x1c   : > { %8181 = sst [smem:[#allocation9_spill]] %s8213_s4 }
  0x1d   : > { %p779_p3 = pnand %p5924_p1, %p778_p2 }
  0x1e   : > { %p912_p4 = scmp.lt.s32.totalorder (!%p779_p3), %s7194_s3, 1  ;;  %s8182_s6 = sld [smem:[#allocation14_spill]] (!%p779_p3) }
  0x1f   : > { %782 = sbr.rel (%p779_p3) target bundleno = 10167 (0x27b7), region = 108  ;;  %s8183_s27 = sld [smem:[#allocation15_spill]] (!%p779_p3) }
  0x20   : > { %s8184_s22 = sld [smem:[#allocation16_spill]] (!%p779_p3) }
  0x21   : > { %s8185_s7 = sld [smem:[#allocation17_spill]] (!%p779_p3) }
  0x22   : > { %s8186_s8 = sld [smem:[#allocation18_spill]] (!%p779_p3) }
  0x23   : > { %s8187_s9 = sld [smem:[#allocation19_spill]] (!%p779_p3) }
  0x24   : > { %s913_s0 = scalar_select %p912_p4, %s7194_s3, 1 }
  0x25   : > { %s8188_s11 = sld [smem:[#allocation21_spill]] }
  0x26   : > { %s6265_s23 = sshll.u32 %s913_s0, 6  ;;  %s5927_s1 = sshll.u32 %s913_s0, 2 }
  0x27   : > { %s7351_s25 = scalar_lea.vmem %s8182_s6, %s6265_s23  ;;  %s7356_s30 = scalar_lea.vmem %s8183_s27, %s5927_s1 }
  0x28   : > { %s7361_s29 = scalar_lea.vmem %s8184_s22, %s6265_s23  ;;  %s7366_s3 = scalar_lea.vmem %s8185_s7, %s5927_s1 }
  0x29   : > { %s7371_s5 = scalar_lea.vmem %s8186_s8, %s6265_s23  ;;  %s7376_s26 = scalar_lea.vmem %s8187_s9, %s5927_s1 }
  0x2a   : > { %s6268_s2 = sshll.u32 %s913_s0, 4  ;;  %s8189_s10 = sld [smem:[#allocation20_spill]] }
  0x2b   : > { %s7381_s22 = scalar_lea.vmem %s8188_s11, %s913_s0  ;;  %s8190_s12 = sld [smem:[#allocation22_spill]] }
  0x2c   : > { %s8191_s13 = sld [smem:[#allocation23_spill]]  ;;  %s6270_s20 = sshll.u32 %s913_s0, 5 }
  0x2d   : > { %s8192_s14 = sld [smem:[#allocation24_spill]]  ;;  %s7411_s18 = scalar_lea.vmem %s8146_s16, %s6270_s20 }
  0x2e   : > { %s8193_s15 = sld [smem:[#allocation25_spill]]  ;;  %s7416_s24 = scalar_lea.vmem %s8147_s17, %s913_s0 }
  0x2f   : > { %s8195_s28 = sld [smem:[#allocation27_spill]] }
  0x30   : > { %s7386_s21 = scalar_lea.vmem %s8189_s10, %s6268_s2 }
  0x31   : > { %s7391_s19 = scalar_lea.vmem %s8190_s12, %s913_s0 }
  0x32   : > { %s7396_s1 = scalar_lea.vmem %s8191_s13, %s913_s0 }
  0x33   : > { %s7401_s27 = scalar_lea.vmem %s8192_s14, %s6268_s2  ;;  %s8194_s2 = sld [smem:[#allocation26_spill]] }
  0x34   : > { %s7406_s4 = scalar_lea.vmem %s8193_s15, %s913_s0  ;;  %s8196_s15 = sld [smem:[#allocation6_spill]] }
  0x35   : > { %s7426_s14 = scalar_lea.vmem %s8195_s28, %s913_s0 }
  0x39   : > { %s7421_s6 = scalar_lea.vmem %s8194_s2, %s913_s0 }
  0x3a   : > { %p5940_p5 = scmp.ne.s32.totalorder %s8196_s15, 0 }
  0x3b   : > { %s8197_s7 = sld [smem:[#allocation10_spill]] (!%p5940_p5) }
  0x3c   : > { %979 = sbr.rel (%p5940_p5) target bundleno = 383 (0x17f), region = 112  ;;  %s8198_s13 = sld [smem:[#allocation12_spill]] (!%p5940_p5) }
  0x3d   : > { %s8199_s23 = sld [smem:[#allocation13_spill]] (!%p5940_p5) }
  0x41   : > { %v6314_v0 = vld [vmem:[%s8197_s7] sm:$0xff]   ;;  %vm986_vm0 = vcmask 261120   ;;  %vm1032_vm1 = vcmask 257024  }
  0x42   : > { %v6315_v1 = vunpack.c.l.bf16 %v6314_v0  ;;  %v6316_v2 = vunpack.c.h.bf16 %v6314_v0  ;;  %v5941_v22 = vld [vmem:[%s8198_s13] ss:$0 sm:$0xff] }
  0x43   : > { %v5942_v24 = vld [vmem:[%s8199_s23] ss:$0 sm:$0xff] }
  0x44   : > { %v987_v3 = vsel %vm986_vm0, %v6315_v1, 0.0  ;;  %v990_v4 = vsel %vm986_vm0, %v6316_v2, 0.0 }
  0x45   : > { %988 = vadd.xlane.f32.xlu0 %v987_v3 }
  0x49   : > { %991 = vadd.xlane.f32.xlu0 %v990_v4 }
  0xce   : > { %v989_v5 = vpop.xlane.xlu0 %988 }
  0xcf   : > { %v994_v6 = vmul.f32 0.03125, %v989_v5 }
  0xd1   : > { %v996_v7 = vsub.f32 %v6315_v1, %v994_v6 }
  0xd2   : > { %v992_v8 = vpop.xlane.xlu0 %991 }
  0xd3   : > { %v995_v9 = vmul.f32 0.03125, %v992_v8  ;;  %v998_v10 = vmul.f32 %v996_v7, %v996_v7 }
  0xd5   : > { %v997_v11 = vsub.f32 %v6316_v2, %v995_v9  ;;  %v1000_v12 = vsel %vm986_vm0, %v998_v10, 0.0 }
  0xd6   : > { %1001 = vadd.xlane.f32.xlu1 %v1000_v12 }
  0xd7   : > { %v999_v13 = vmul.f32 %v997_v11, %v997_v11 }
  0xd9   : > { %v1003_v14 = vsel %vm986_vm0, %v999_v13, 0.0 }
  0xda   : > { %1004 = vadd.xlane.f32.xlu1 %v1003_v14 }
 0x15f   : > { %v1002_v15 = vpop.xlane.xlu1 %1001 }
 0x160   : > { %v1006_v16 = vmul.f32 0.03125, %v1002_v15 }
 0x162   : > { %v1008_v17 = vadd.f32 1e-12, %v1006_v16 }
 0x163   : > { %v1005_v18 = vpop.xlane.xlu1 %1004 }
 0x164   : > { %7004 = vrsqrt.f32 %v1008_v17  ;;  %v1007_v19 = vmul.f32 0.03125, %v1005_v18 }
 0x166   : > { %v1009_v20 = vadd.f32 1e-12, %v1007_v19 }
 0x168   : > { %7006 = vrsqrt.f32 %v1009_v20 }
 0x171   : > { %v7005_v21 = vpop.eup %7004 }
 0x172   : > { %v1012_v23 = vmul.f32 %v7005_v21, %v996_v7 }
 0x174   : > { %v1020_v25 = vmul.f32 %v5941_v22, %v1012_v23 }
 0x175   : > { %v7007_v26 = vpop.eup %7006 }
 0x176   : > { %v1028_v27 = vadd.f32 %v5942_v24, %v1020_v25  ;;  %v1013_v28 = vmul.f32 %v7007_v26, %v997_v11 }
 0x178   : > { %v1030_v29 = vpack.c.bf16 %v1028_v27, %v1028_v27  ;;  %v1021_v30 = vmul.f32 %v5941_v22, %v1013_v28 }
 0x17a   : > { %1033 = vst.msk [vmem:[#allocation2] sm:$0xf] %vm1032_vm1, %v1030_v29  ;;  %v1029_v31 = vadd.f32 %v5942_v24, %v1021_v30 }
 0x17c   : > { %v1031_v32 = vpack.c.bf16 %v1029_v31, %v1029_v31 }
 0x17e   : > { %1034 = vst.msk [vmem:[#allocation2 + $0x4] sm:$0xf] %vm1032_vm1, %v1031_v32 }
 0x17f PF: > { %s8200_s9 = sld [smem:[#allocation11_spill]]  ;;  %v1042_v34 = vlaneseq  ;;  %v7204_v37 = vmov 1966171168  }
 0x180   : > { %v1040_v38 = vunpack.c.l.s4 %v7204_v37  ;;  %s8201_s28 = sld [smem:[#allocation6_spill]] }
 0x181   : > { %v7445_v35 = vld [vmem:[#allocation2] sm:$0xf]  ;;  %v7449_v40 = vshrl.u32 %v1042_v34, 7 }
 0x182   : > { %v1041_v42 = vunpack.c.0.s8 %v1040_v38 }
 0x184   : > { %v7452_v43 = vsub.s32 %v1041_v42, %v7449_v40 }
 0x185   : > { %v1035_v33 = vld [vmem:[%s8200_s9] sm:$0x3]  ;;  %v7447_v39 = vld [vmem:[#allocation2 + $0x4] sm:$0xf] }
 0x186   : > { %v1036_v36 = vsub.f32 1.0, %v1035_v33  ;;  %p5943_p6 = scmp.ge.s32.totalorder %s8201_s28, 1 }
 0x188   : > { %v1037_v41 = vmul.f32 -1e+09, %v1036_v36 }
 0x18a   : > { %v1045_v44 = vrot.slane %v1037_v41, %v7452_v43  ;;  %1068 = sbr.rel (%p5943_p6) target bundleno = 5137 (0x1411), region = 116 }
 0x18c   : > { %v1046_v45 = vcombine.high %v1045_v44, %v1045_v44  ;;  %v7456_v46 = vrot.slane %v1045_v44, %v7452_v43 }
 0x18e   : > { %v7459_v47 = vrot.slane %v1046_v45, %v7452_v43 }
 0x18f   : > { %v7008_v48 = vld [vmem:[%s7361_s29 + $0x8] sm:$0xff]   ;;  %v7205_v49 = vmov 0.0   ;;  %v7010_v51 = vld [vmem:[%s7361_s29] sm:$0xff]   ;;  %vm7206_vm2 = vmmov 0   ;;  %v7476_v53 = vcombine.low %v7445_v35, %v7447_v39  ;;  %vm1097_vm3 = vcmask 261120  }
 0x190   : > { %6496 = vmatprep.subr.bf16.mxu1 %v7205_v49  ;;  %6488 = vmatprep.subr.bf16.mxu0 %v7205_v49  ;;  %v7009_v50 = vld [vmem:[%s7351_s25 + $0x8] sm:$0xff]   ;;  %v7011_v52 = vld [vmem:[%s7351_s25] sm:$0xff]   ;;  %vm1298_vm4 = vcmask 64512   ;;  %vm1418_vm5 = vcmask 1043456   ;;  %v1290_v23 = vsub.s32 0, %v7449_v40  ;;  %vm3167_vm6 = vcmask 523264  }
 0x191   : > { %6497 = vmatpush3.bf16.msra.mxu1 %v7008_v48  ;;  %6500 = vmatprep.mubr.msk.bf16.mxu1 %vm7206_vm2, %v7205_v49  ;;  %v7012_v54 = vld [vmem:[%s7371_s5 + $0x8] sm:$0xff]   ;;  %v7013_v55 = vld [vmem:[%s7371_s5] sm:$0xff]   ;;  %vm3266_vm7 = vcmask 257024  }
 0x192   : > { %6489 = vmatpush3.bf16.msra.mxu0 %v7009_v50  ;;  %6498 = vmatprep.subr.bf16.mxu1 %v7205_v49  ;;  %v5951_v56 = vld [vmem:[%s7366_s3] ss:$0 sm:$0xff]  ;;  %v7515_v25 = vrot.slane %v7459_v47, %v1290_v23  ;;  %v7518_v27 = vrot.slane %v7456_v46, %v1290_v23 }
 0x193   : > { %6490 = vmatprep.subr.bf16.mxu0 %v7205_v49  ;;  %6492 = vmatprep.mubr.msk.bf16.mxu0 %vm7206_vm2, %v7205_v49  ;;  %v5944_v60 = vld [vmem:[%s7356_s30] ss:$0 sm:$0xff] }
 0x194   : > { %v5957_v12 = vld [vmem:[%s7376_s26] ss:$0 sm:$0xff] }
 0x195   : > { %6499 = vmatpush3.bf16.msra.mxu1 %v7010_v51 }
 0x196   : > { %6491 = vmatpush3.bf16.msra.mxu0 %v7011_v52  ;;  %6512 = vmatprep.subr.bf16.mxu1 %v7205_v49 }
 0x197   : > { %6504 = vmatprep.subr.bf16.mxu0 %v7205_v49 }
 0x198   : > { %6501 = vmatmul.mubr.msk.bf16.vlgmr.msra.gmra.mxu1 %vm1097_vm3, %v7476_v53 }
 0x199   : > { %6493 = vmatmul.mubr.msk.bf16.vlgmr.msra.gmra.mxu0 %vm1097_vm3, %v7476_v53  ;;  %6514 = vmatprep.mubr.msk.bf16.mxu1 %vm7206_vm2, %v7205_v49 }
 0x19a   : > { %6505 = vmatpush3.bf16.msra.mxu0 %v7012_v54  ;;  %6508 = vmatprep.mubr.msk.bf16.mxu0 %vm7206_vm2, %v7205_v49 }
 0x19b   : > { %6506 = vmatprep.subr.bf16.mxu0 %v7205_v49 }
 0x19e   : > { %6507 = vmatpush3.bf16.msra.mxu0 %v7013_v55 }
 0x19f   : > { %6518 = vmatprep.subr.bf16.mxu0 %v7205_v49 }
 0x1a1   : > { %6509 = vmatmul.mubr.msk.bf16.vlgmr.msra.gmra.mxu0 %vm1097_vm3, %v7476_v53 }
 0x1a2   : > { %6520 = vmatprep.mubr.msk.bf16.mxu0 %vm7206_vm2, %v7205_v49 }
 0x258   : > { %v1205_v57 = vpop.f32.mrf.mxu1 }
 0x259   : > { %v1206_v58 = vadd.f32 %v5951_v56, %v1205_v57  ;;  %v1135_v59 = vpop.f32.mrf.mxu0 }
 0x25a   : > { %v6502_v61 = vpop.f32.mrf.mxu1  ;;  %v1136_v2 = vadd.f32 %v5944_v60, %v1135_v59 }
 0x25b   : > { %v6273_v62 = vpack.c.bf16 %v1206_v58, %v1206_v58  ;;  %v6494_v63 = vpop.f32.mrf.mxu0 }
 0x25c   : > { %v1208_v0 = vpop.f32.mrf.mxu1  ;;  %v6271_v8 = vpack.c.bf16 %v1136_v2, %v1136_v2 }
 0x25d   : > { %v1303_v1 = vsel %vm1298_vm4, %v6273_v62, 0  ;;  %v1209_v3 = vadd.f32 %v5951_v56, %v1208_v0  ;;  %v1138_v4 = vpop.f32.mrf.mxu0  ;;  %v7015_v0 = vld [vmem:[%s7351_s25 + $0x18] sm:$0xff]  }
 0x25e   : > { %v6503_v5 = vpop.f32.mrf.mxu1  ;;  %6513 = vmatpush3.bf16.xpose.msra.mxu1 %v1303_v1  ;;  %v1139_v10 = vadd.f32 %v5944_v60, %v1138_v4  ;;  %v7014_v60 = vld [vmem:[%s7361_s29 + $0x18] sm:$0xff]   ;;  %v7016_v1 = vld [vmem:[%s7361_s29 + $0x10] sm:$0xff]  }
 0x25f   : > { %v6274_v6 = vpack.c.bf16 %v1209_v3, %v1209_v3  ;;  %v6495_v7 = vpop.f32.mrf.mxu0  ;;  %6524 = vmatprep.subr.bf16.mxu1 %v7205_v49  ;;  %v7017_v3 = vld [vmem:[%s7351_s25 + $0x10] sm:$0xff]   ;;  %v7018_v4 = vld [vmem:[%s7371_s5 + $0x18] sm:$0xff]  }
 0x260   : > { %v6272_v11 = vpack.c.bf16 %v1139_v10, %v1139_v10  ;;  %v7019_v5 = vld [vmem:[%s7371_s5 + $0x10] sm:$0xff]  }
 0x261   : > { %v1349_v9 = vsel %vm1298_vm4, %v6274_v6, 0  ;;  %v1275_v13 = vpop.f32.mrf.mxu0 }
 0x262   : > { %6519 = vmatpush3.bf16.xpose.msra.mxu0 %v1349_v9  ;;  %v1276_v14 = vadd.f32 %v5957_v12, %v1275_v13  ;;  %v5983_v13 = vld [vmem:[%s7366_s3 + $0x1] ss:$0 sm:$0xff] }
 0x263   : > { %6530 = vmatprep.subr.bf16.mxu0 %v7205_v49  ;;  %v6510_v15 = vpop.f32.mrf.mxu0 }
 0x264   : > { %v6275_v16 = vpack.c.bf16 %v1276_v14, %v1276_v14 }
 0x265   : > { %6515 = vmatmul.mubr.msk.bf16.vlgmr.msra.gmra.mxu1 %vm1298_vm4, %v6271_v8  ;;  %v1278_v17 = vpop.f32.mrf.mxu0 }
 0x266   : > { %6526 = vmatprep.mubr.msk.bf16.mxu1 %vm7206_vm2, %v7205_v49  ;;  %v1420_v18 = vsel %vm1418_vm5, %v6275_v16, 0  ;;  %v1279_v19 = vadd.f32 %v5957_v12, %v1278_v17 }
 0x267   : > { %v6511_v20 = vpop.f32.mrf.mxu0  ;;  %6525 = vmatpush3.bf16.msra.mxu1 %v1420_v18 }
 0x268   : > { %v6276_v21 = vpack.c.bf16 %v1279_v19, %v1279_v19  ;;  %6536 = vmatprep.subr.bf16.mxu1 %v7205_v49  ;;  %v5972_v19 = vld [vmem:[%s7356_s30 + $0x1] ss:$0 sm:$0xff] }
 0x269   : > { %6521 = vmatmul.mubr.msk.bf16.vlgmr.msra.gmra.mxu0 %vm1298_vm4, %v6272_v11 }
 0x26a   : > { %6532 = vmatprep.mubr.msk.bf16.mxu0 %vm7206_vm2, %v7205_v49  ;;  %v1466_v22 = vsel %vm1418_vm5, %v6276_v21, 0 }
 0x26b   : > { %6531 = vmatpush3.bf16.msra.mxu0 %v1466_v22 }
 0x26c   : > { %6544 = vmatprep.subr.bf16.mxu0 %v7205_v49 }
 0x325   : > { %v1339_v24 = vpop.f32.mrf.mxu1 }
 0x326   : > { %v1340_v33 = vadd.f32 %v1339_v24, %v7518_v27 }
 0x327   : > { %v6516_v26 = vpop.f32.mrf.mxu1 }
 0x328   : > { %v1391_v38 = vsel %vm1298_vm4, %v1340_v33, -inf }
 0x329   : > { %v1342_v28 = vpop.f32.mrf.mxu1  ;;  %v1385_v29 = vpop.f32.mrf.mxu0 }
 0x32a   : > { %v1386_v30 = vadd.f32 %v1385_v29, %v7515_v25 }
 0x32b   : > { %v6517_v31 = vpop.f32.mrf.mxu1  ;;  %v6522_v32 = vpop.f32.mrf.mxu0 }
 0x32c   : > { %v1394_v34 = vsel %vm1298_vm4, %v1386_v30, -inf }
 0x32d   : > { %1395 = vmax.xlane.f32.xlu0 %v1394_v34  ;;  %v1388_v36 = vpop.f32.mrf.mxu0 }
 0x32f   : > { %v6523_v37 = vpop.f32.mrf.mxu0 }
 0x331   : > { %1392 = vmax.xlane.f32.xlu0 %v1391_v38  ;;  %v5994_v38 = vld [vmem:[%s7376_s26 + $0x1] ss:$0 sm:$0xff] }
 0x3b6   : > { %v1396_v41 = vpop.xlane.xlu0 %1395 }
 0x3b7   : > { %v1398_v42 = vsub.f32 %v1386_v30, %v1396_v41 }
 0x3b9   : > { %v1401_v44 = vmul.f32 1.442695, %v1398_v42 }
 0x3ba   : > { %v1393_v45 = vpop.xlane.xlu0 %1392 }
 0x3bb   : > { %7038 = vpow2.f32 %v1401_v44  ;;  %v1397_v48 = vsub.f32 %v1340_v33, %v1393_v45 }
 0x3bd   : > { %v1399_v50 = vmul.f32 1.442695, %v1397_v48 }
 0x3bf   : > { %7040 = vpow2.f32 %v1399_v50 }
 0x3c8   : > { %v7039_v51 = vpop.eup %7038 }
 0x3c9   : > { %v1406_v52 = vsel %vm1298_vm4, %v7039_v51, 0.0 }
 0x3ca   : > { %1407 = vadd.xlane.f32.xlu1 %v1406_v52 }
 0x3cc   : > { %v7041_v54 = vpop.eup %7040 }
 0x3cd   : > { %v1403_v55 = vsel %vm1298_vm4, %v7041_v54, 0.0 }
 0x3ce   : > { %1404 = vadd.xlane.f32.xlu1 %v1403_v55 }
 0x453   : > { %v1408_v56 = vpop.xlane.xlu1 %1407 }
 0x454   : > { %7042 = vrcp.f32 %v1408_v56 }
 0x457   : > { %v1405_v57 = vpop.xlane.xlu1 %1404 }
 0x458   : > { %7044 = vrcp.f32 %v1405_v57 }
 0x461   : > { %v7043_v58 = vpop.eup %7042 }
 0x462   : > { %v1412_v59 = vmul.f32 %v7043_v58, %v7039_v51 }
 0x464   : > { %v1414_v61 = vpack.c.bf16 %v1412_v59, %v1412_v59 }
 0x465   : > { %v7045_v62 = vpop.eup %7044 }
 0x466   : > { %6533 = vmatmul.mubr.msk.bf16.vlgmr.msra.gmra.mxu0 %vm1298_vm4, %v1414_v61  ;;  %v1411_v63 = vmul.f32 %v7045_v62, %v7041_v54 }
 0x467   : > { %6545 = vmatpush3.bf16.msra.mxu0 %v7014_v60  ;;  %6548 = vmatprep.mubr.msk.bf16.mxu0 %vm7206_vm2, %v7205_v49 }
 0x468   : > { %v1413_v2 = vpack.c.bf16 %v1411_v63, %v1411_v63  ;;  %6546 = vmatprep.subr.bf16.mxu0 %v7205_v49 }
 0x46a   : > { %6527 = vmatmul.mubr.msk.bf16.vlgmr.msra.gmra.mxu1 %vm1298_vm4, %v1413_v2 }
 0x46b   : > { %6537 = vmatpush3.bf16.msra.mxu1 %v7015_v0  ;;  %6547 = vmatpush3.bf16.msra.mxu0 %v7016_v1 }
 0x46c   : > { %6538 = vmatprep.subr.bf16.mxu1 %v7205_v49  ;;  %6540 = vmatprep.mubr.msk.bf16.mxu1 %vm7206_vm2, %v7205_v49 }
 0x46d   : > { %6560 = vmatprep.subr.bf16.mxu0 %v7205_v49 }
 0x46e   : > { %6549 = vmatmul.mubr.msk.bf16.vlgmr.msra.gmra.mxu0 %vm1097_vm3, %v7476_v53 }
 0x46f   : > { %6539 = vmatpush3.bf16.msra.mxu1 %v7017_v3  ;;  %6562 = vmatprep.mubr.msk.bf16.mxu0 %vm7206_vm2, %v7205_v49 }
 0x470   : > { %6552 = vmatprep.subr.bf16.mxu1 %v7205_v49 }
 0x472   : > { %6541 = vmatmul.mubr.msk.bf16.vlgmr.msra.gmra.mxu1 %vm1097_vm3, %v7476_v53 }
 0x473   : > { %6556 = vmatprep.mubr.msk.bf16.mxu1 %vm7206_vm2, %v7205_v49  ;;  %6553 = vmatpush3.bf16.msra.mxu1 %v7018_v4 }
 0x474   : > { %6554 = vmatprep.subr.bf16.mxu1 %v7205_v49 }
 0x477   : > { %6555 = vmatpush3.bf16.msra.mxu1 %v7019_v5 }
 0x478   : > { %6566 = vmatprep.subr.bf16.mxu1 %v7205_v49 }
 0x47a   : > { %6557 = vmatmul.mubr.msk.bf16.vlgmr.msra.gmra.mxu1 %vm1097_vm3, %v7476_v53 }
 0x47b   : > { %6568 = vmatprep.mubr.msk.bf16.mxu1 %vm7206_vm2, %v7205_v49 }
 0x526   : > { %v7556_v6 = vpop.f32.mrf.mxu0 }
 0x528   : > { %v6534_v7 = vpop.f32.mrf.mxu0 }
 0x52a   : > { %v7558_v8 = vpop.f32.mrf.mxu1  ;;  %v1505_v9 = vpop.f32.mrf.mxu0 }
 0x52b   : > { %v1508_v10 = vpack.c.bf16 %v7556_v6, %v7558_v8  ;;  %v6004_v6 = vld [vmem:[%s7386_s21 + $0x4] sm:$0xf] }
 0x52c   : > { %v6528_v11 = vpop.f32.mrf.mxu1  ;;  %v6535_v12 = vpop.f32.mrf.mxu0  ;;  %v1941_v8 = vsel %vm1418_vm5, %v6004_v6, 0 }
 0x52e   : > { %v1459_v14 = vpop.f32.mrf.mxu1  ;;  %v1641_v15 = vpop.f32.mrf.mxu0 }
 0x52f   : > { %v1642_v16 = vadd.f32 %v5983_v13, %v1641_v15 }
 0x530   : > { %v6529_v17 = vpop.f32.mrf.mxu1  ;;  %v6550_v18 = vpop.f32.mrf.mxu0 }
 0x531   : > { %v6279_v20 = vpack.c.bf16 %v1642_v16, %v1642_v16 }
 0x532   : > { %v1569_v21 = vpop.f32.mrf.mxu1  ;;  %v1644_v22 = vpop.f32.mrf.mxu0 }
 0x533   : > { %v1730_v23 = vsel %vm1298_vm4, %v6279_v20, 0  ;;  %v1570_v24 = vadd.f32 %v5972_v19, %v1569_v21  ;;  %v1645_v26 = vadd.f32 %v5983_v13, %v1644_v22 }
 0x534   : > { %v6542_v28 = vpop.f32.mrf.mxu1  ;;  %v6551_v29 = vpop.f32.mrf.mxu0  ;;  %6561 = vmatpush3.bf16.xpose.msra.mxu0 %v1730_v23  ;;  %v1509_v23 = vld [vmem:[%s7386_s21] sm:$0xf] }
 0x535   : > { %v6280_v30 = vpack.c.bf16 %v1645_v26, %v1645_v26  ;;  %6572 = vmatprep.subr.bf16.mxu0 %v7205_v49  ;;  %v6277_v32 = vpack.c.bf16 %v1570_v24, %v1570_v24  ;;  %v1988_v28 = vsel %vm1418_vm5, %v1509_v23, 0  ;;  %v7020_v29 = vld [vmem:[%s7361_s29 + $0x28] sm:$0xff]  }
 0x536   : > { %v1572_v31 = vpop.f32.mrf.mxu1 }
 0x537   : > { %v1776_v33 = vsel %vm1298_vm4, %v6280_v30, 0  ;;  %v1573_v36 = vadd.f32 %v5972_v19, %v1572_v31  ;;  %v7021_v30 = vld [vmem:[%s7361_s29 + $0x20] sm:$0xff]  }
 0x538   : > { %v6543_v34 = vpop.f32.mrf.mxu1  ;;  %6567 = vmatpush3.bf16.xpose.msra.mxu1 %v1776_v33 }
 0x539   : > { %6578 = vmatprep.subr.bf16.mxu1 %v7205_v49  ;;  %v6278_v37 = vpack.c.bf16 %v1573_v36, %v1573_v36  ;;  %v7022_v34 = vld [vmem:[%s7351_s25 + $0x28] sm:$0xff]  }
 0x53a   : > { %v1713_v41 = vpop.f32.mrf.mxu1 }
 0x53b   : > { %6563 = vmatmul.mubr.msk.bf16.vlgmr.msra.gmra.mxu0 %vm1298_vm4, %v6277_v32  ;;  %v1714_v42 = vadd.f32 %v5994_v38, %v1713_v41 }
 0x53c   : > { %6574 = vmatprep.mubr.msk.bf16.mxu0 %vm7206_vm2, %v7205_v49  ;;  %v6558_v44 = vpop.f32.mrf.mxu1 }
 0x53d   : > { %v6281_v45 = vpack.c.bf16 %v1714_v42, %v1714_v42  ;;  %v7023_v42 = vld [vmem:[%s7351_s25 + $0x20] sm:$0xff]  }
 0x53e   : > { %v1716_v48 = vpop.f32.mrf.mxu1 }
 0x53f   : > { %6569 = vmatmul.mubr.msk.bf16.vlgmr.msra.gmra.mxu1 %vm1298_vm4, %v6278_v37  ;;  %v1846_v50 = vsel %vm1418_vm5, %v6281_v45, 0  ;;  %v1717_v51 = vadd.f32 %v5994_v38, %v1716_v48  ;;  %v7024_v48 = vld [vmem:[%s7371_s5 + $0x28] sm:$0xff]  }
 0x540   : > { %6580 = vmatprep.mubr.msk.bf16.mxu1 %vm7206_vm2, %v7205_v49  ;;  %v6559_v52 = vpop.f32.mrf.mxu1  ;;  %6573 = vmatpush3.bf16.msra.mxu0 %v1846_v50 }
 0x541   : > { %v6282_v54 = vpack.c.bf16 %v1717_v51, %v1717_v51  ;;  %6584 = vmatprep.subr.bf16.mxu0 %v7205_v49 }
 0x543   : > { %v1892_v55 = vsel %vm1418_vm5, %v6282_v54, 0  ;;  %v6023_v54 = vld [vmem:[%s7366_s3 + $0x2] ss:$0 sm:$0xff] }
 0x544   : > { %6579 = vmatpush3.bf16.msra.mxu1 %v1892_v55 }
 0x545   : > { %6590 = vmatprep.subr.bf16.mxu1 %v7205_v49 }
 0x5fb   : > { %v1766_v56 = vpop.f32.mrf.mxu0 }
 0x5fc   : > { %v1767_v57 = vadd.f32 %v1766_v56, %v7518_v27 }
 0x5fd   : > { %v6564_v58 = vpop.f32.mrf.mxu0 }
 0x5fe   : > { %v1818_v59 = vsel %vm1298_vm4, %v1767_v57, -inf }
 0x5ff   : > { %v1812_v60 = vpop.f32.mrf.mxu1  ;;  %1819 = vmax.xlane.f32.xlu0 %v1818_v59  ;;  %v1769_v61 = vpop.f32.mrf.mxu0 }
 0x600   : > { %v1813_v62 = vadd.f32 %v1812_v60, %v7515_v25 }
 0x601   : > { %v6565_v63 = vpop.f32.mrf.mxu0  ;;  %v6570_v0 = vpop.f32.mrf.mxu1 }
 0x602   : > { %v1821_v1 = vsel %vm1298_vm4, %v1813_v62, -inf  ;;  %v7025_v0 = vld [vmem:[%s7371_s5 + $0x20] sm:$0xff]  }
 0x603   : > { %1822 = vmax.xlane.f32.xlu1 %v1821_v1  ;;  %v1815_v2 = vpop.f32.mrf.mxu1 }
 0x605   : > { %v6571_v3 = vpop.f32.mrf.mxu1 }
 0x688   : > { %v1820_v4 = vpop.xlane.xlu0 %1819 }
 0x689   : > { %v1824_v5 = vsub.f32 %v1767_v57, %v1820_v4 }
 0x68b   : > { %v1826_v7 = vmul.f32 1.442695, %v1824_v5 }
 0x68c   : > { %v1823_v9 = vpop.xlane.xlu1 %1822 }
 0x68d   : > { %7046 = vpow2.f32 %v1826_v7  ;;  %v1825_v11 = vsub.f32 %v1813_v62, %v1823_v9  ;;  %v6012_v7 = vld [vmem:[%s7356_s30 + $0x2] ss:$0 sm:$0xff] }
 0x68f   : > { %v1828_v12 = vmul.f32 1.442695, %v1825_v11 }
 0x691   : > { %7048 = vpow2.f32 %v1828_v12 }
 0x69a   : > { %v7047_v13 = vpop.eup %7046 }
 0x69b   : > { %v1830_v14 = vsel %vm1298_vm4, %v7047_v13, 0.0 }
 0x69c   : > { %1831 = vadd.xlane.f32.xlu0 %v1830_v14 }
 0x69e   : > { %v7049_v15 = vpop.eup %7048 }
 0x69f   : > { %v1833_v16 = vsel %vm1298_vm4, %v7049_v15, 0.0 }
 0x6a0   : > { %1834 = vadd.xlane.f32.xlu1 %v1833_v16 }
 0x725   : > { %v1832_v17 = vpop.xlane.xlu0 %1831 }
 0x726   : > { %7050 = vrcp.f32 %v1832_v17 }
 0x729   : > { %v1835_v18 = vpop.xlane.xlu1 %1834 }
 0x72a   : > { %7052 = vrcp.f32 %v1835_v18  ;;  %v6034_v18 = vld [vmem:[%s7376_s26 + $0x2] ss:$0 sm:$0xff] }
 0x733   : > { %v7051_v19 = vpop.eup %7050 }
 0x734   : > { %v1838_v20 = vmul.f32 %v7051_v19, %v7047_v13 }
 0x736   : > { %v1840_v21 = vpack.c.bf16 %v1838_v20, %v1838_v20 }
 0x737   : > { %v7053_v22 = vpop.eup %7052 }
 0x738   : > { %6575 = vmatmul.mubr.msk.bf16.vlgmr.msra.gmra.mxu0 %vm1298_vm4, %v1840_v21  ;;  %v1839_v24 = vmul.f32 %v7053_v22, %v7049_v15 }
 0x739   : > { %6586 = vmatprep.mubr.msk.bf16.mxu0 %vm7206_vm2, %v7205_v49  ;;  %6585 = vmatpush3.bf16.msra.mxu0 %v1941_v8 }
 0x73a   : > { %v1841_v26 = vpack.c.bf16 %v1839_v24, %v1839_v24  ;;  %6596 = vmatprep.subr.bf16.mxu0 %v7205_v49 }
 0x73c   : > { %6581 = vmatmul.mubr.msk.bf16.vlgmr.msra.gmra.mxu1 %vm1298_vm4, %v1841_v26 }
 0x73d   : > { %6591 = vmatpush3.bf16.msra.mxu1 %v1988_v28  ;;  %6592 = vmatprep.mubr.msk.bf16.mxu1 %vm7206_vm2, %v7205_v49 }
 0x73e   : > { %6604 = vmatprep.subr.bf16.mxu1 %v7205_v49 }
 0x744   : > { %6593 = vmatmul.mubr.msk.bf16.vlgmr.msra.gmra.mxu1 %vm1298_vm4, %v1508_v10 }
 0x745   : > { %6605 = vmatpush3.bf16.msra.mxu1 %v7020_v29  ;;  %6608 = vmatprep.mubr.msk.bf16.mxu1 %vm7206_vm2, %v7205_v49 }
 0x746   : > { %6606 = vmatprep.subr.bf16.mxu1 %v7205_v49 }
 0x749   : > { %6607 = vmatpush3.bf16.msra.mxu1 %v7021_v30 }
 0x74a   : > { %6620 = vmatprep.subr.bf16.mxu1 %v7205_v49 }
 0x74c   : > { %6609 = vmatmul.mubr.msk.bf16.vlgmr.msra.gmra.mxu1 %vm1097_vm3, %v7476_v53 }
 0x74d   : > { %6622 = vmatprep.mubr.msk.bf16.mxu1 %vm7206_vm2, %v7205_v49 }
 0x7f8   : > { %v1882_v10 = vpop.f32.mrf.mxu0 }
 0x7fa   : > { %v6576_v31 = vpop.f32.mrf.mxu0 }
 0x7fc   : > { %v1885_v32 = vpop.f32.mrf.mxu0  ;;  %v1928_v33 = vpop.f32.mrf.mxu1 }
 0x7fd   : > { %v1934_v36 = vpack.c.bf16 %v1928_v33, %v1882_v10 }
 0x7fe   : > { %v6577_v37 = vpop.f32.mrf.mxu0  ;;  %v6582_v38 = vpop.f32.mrf.mxu1 }
 0x7ff   : > { %6587 = vmatmul.mubr.msk.bf16.vlgmr.msra.gmra.mxu0 %vm1298_vm4, %v1934_v36 }
 0x800   : > { %v1931_v41 = vpop.f32.mrf.mxu1  ;;  %6597 = vmatpush3.bf16.msra.mxu0 %v7022_v34  ;;  %6600 = vmatprep.mubr.msk.bf16.mxu0 %vm7206_vm2, %v7205_v49 }
 0x801   : > { %6598 = vmatprep.subr.bf16.mxu0 %v7205_v49 }
 0x802   : > { %v6583_v44 = vpop.f32.mrf.mxu1 }
 0x804   : > { %v7617_v45 = vpop.f32.mrf.mxu1  ;;  %6599 = vmatpush3.bf16.msra.mxu0 %v7023_v42 }
 0x805   : > { %6612 = vmatprep.subr.bf16.mxu0 %v7205_v49 }
 0x806   : > { %v6594_v50 = vpop.f32.mrf.mxu1 }
 0x807   : > { %6601 = vmatmul.mubr.msk.bf16.vlgmr.msra.gmra.mxu0 %vm1097_vm3, %v7476_v53 }
 0x808   : > { %v7623_v51 = vpop.f32.mrf.mxu1  ;;  %6613 = vmatpush3.bf16.msra.mxu0 %v7024_v48  ;;  %6616 = vmatprep.mubr.msk.bf16.mxu0 %vm7206_vm2, %v7205_v49 }
 0x809   : > { %6614 = vmatprep.subr.bf16.mxu0 %v7205_v49 }
 0x80a   : > { %v6595_v52 = vpop.f32.mrf.mxu1 }
 0x80c   : > { %v2162_v55 = vpop.f32.mrf.mxu1  ;;  %6615 = vmatpush3.bf16.msra.mxu0 %v7025_v0 }
 0x80d   : > { %v2163_v56 = vadd.f32 %v6023_v54, %v2162_v55  ;;  %6626 = vmatprep.subr.bf16.mxu0 %v7205_v49 }
 0x80e   : > { %v6610_v57 = vpop.f32.mrf.mxu1 }
 0x80f   : > { %v6285_v58 = vpack.c.bf16 %v2163_v56, %v2163_v56  ;;  %6617 = vmatmul.mubr.msk.bf16.vlgmr.msra.gmra.mxu0 %vm1097_vm3, %v7476_v53 }
 0x810   : > { %v2165_v59 = vpop.f32.mrf.mxu1  ;;  %6628 = vmatprep.mubr.msk.bf16.mxu0 %vm7206_vm2, %v7205_v49 }
 0x811   : > { %v2251_v60 = vsel %vm1298_vm4, %v6285_v58, 0  ;;  %v2166_v62 = vadd.f32 %v6023_v54, %v2165_v59 }
 0x812   : > { %v6611_v61 = vpop.f32.mrf.mxu1  ;;  %6621 = vmatpush3.bf16.xpose.msra.mxu1 %v2251_v60 }
 0x813   : > { %6632 = vmatprep.subr.bf16.mxu1 %v7205_v49  ;;  %v6286_v63 = vpack.c.bf16 %v2166_v62, %v2166_v62 }
 0x815   : > { %v2297_v1 = vsel %vm1298_vm4, %v6286_v63, 0 }
 0x816   : > { %6627 = vmatpush3.bf16.xpose.msra.mxu0 %v2297_v1 }
 0x817   : > { %6638 = vmatprep.subr.bf16.mxu0 %v7205_v49 }
 0x8bf   : > { %v7639_v2 = vpop.f32.mrf.mxu0 }
 0x8c1   : > { %v6588_v3 = vpop.f32.mrf.mxu0 }
 0x8c3   : > { %v7641_v4 = vpop.f32.mrf.mxu0 }
 0x8c5   : > { %v6589_v5 = vpop.f32.mrf.mxu0 }
 0x8c7   : > { %v2090_v9 = vpop.f32.mrf.mxu0 }
 0x8c8   : > { %v2091_v11 = vadd.f32 %v6012_v7, %v2090_v9 }
 0x8c9   : > { %v6602_v12 = vpop.f32.mrf.mxu0 }
 0x8ca   : > { %v6283_v13 = vpack.c.bf16 %v2091_v11, %v2091_v11  ;;  %v7027_v11 = vld [vmem:[%s7351_s25 + $0x38] sm:$0xff]   ;;  %v7029_v12 = vld [vmem:[%s7351_s25 + $0x30] sm:$0xff]  }
 0x8cb   : > { %v2093_v14 = vpop.f32.mrf.mxu0 }
 0x8cc   : > { %v2094_v15 = vadd.f32 %v6012_v7, %v2093_v14  ;;  %6623 = vmatmul.mubr.msk.bf16.vlgmr.msra.gmra.mxu1 %vm1298_vm4, %v6283_v13  ;;  %v6044_v7 = vld [vmem:[%s7386_s21 + $0x8] sm:$0xf] }
 0x8cd   : > { %v6603_v16 = vpop.f32.mrf.mxu0  ;;  %6634 = vmatprep.mubr.msk.bf16.mxu1 %vm7206_vm2, %v7205_v49  ;;  %v2462_v9 = vsel %vm1418_vm5, %v6044_v7, 0 }
 0x8ce   : > { %v6284_v17 = vpack.c.bf16 %v2094_v15, %v2094_v15 }
 0x8cf   : > { %v2234_v19 = vpop.f32.mrf.mxu0 }
 0x8d0   : > { %6629 = vmatmul.mubr.msk.bf16.vlgmr.msra.gmra.mxu0 %vm1298_vm4, %v6284_v17  ;;  %v2235_v20 = vadd.f32 %v6034_v18, %v2234_v19  ;;  %v7026_v17 = vld [vmem:[%s7361_s29 + $0x38] sm:$0xff]  }
 0x8d1   : > { %6640 = vmatprep.mubr.msk.bf16.mxu0 %vm7206_vm2, %v7205_v49  ;;  %v6618_v21 = vpop.f32.mrf.mxu0 }
 0x8d2   : > { %v6287_v22 = vpack.c.bf16 %v2235_v20, %v2235_v20 }
 0x8d3   : > { %v2237_v23 = vpop.f32.mrf.mxu0 }
 0x8d4   : > { %v2367_v24 = vsel %vm1418_vm5, %v6287_v22, 0  ;;  %v2238_v26 = vadd.f32 %v6034_v18, %v2237_v23  ;;  %v7028_v22 = vld [vmem:[%s7361_s29 + $0x30] sm:$0xff]  }
 0x8d5   : > { %v6619_v28 = vpop.f32.mrf.mxu0  ;;  %6633 = vmatpush3.bf16.msra.mxu1 %v2367_v24  ;;  %v7030_v24 = vld [vmem:[%s7371_s5 + $0x38] sm:$0xff]  }
 0x8d6   : > { %v6288_v29 = vpack.c.bf16 %v2238_v26, %v2238_v26  ;;  %6644 = vmatprep.subr.bf16.mxu1 %v7205_v49  ;;  %v7031_v26 = vld [vmem:[%s7371_s5 + $0x30] sm:$0xff]  }
 0x8d8   : > { %v2413_v30 = vsel %vm1418_vm5, %v6288_v29, 0 }
 0x8d9   : > { %6639 = vmatpush3.bf16.msra.mxu0 %v2413_v30 }
 0x8da   : > { %6650 = vmatprep.subr.bf16.mxu0 %v7205_v49 }
 0x98c   : > { %v2287_v6 = vpop.f32.mrf.mxu1 }
 0x98d   : > { %v2288_v8 = vadd.f32 %v2287_v6, %v7518_v27 }
 0x98e   : > { %v6624_v10 = vpop.f32.mrf.mxu1 }
 0x98f   : > { %v2339_v31 = vsel %vm1298_vm4, %v2288_v8, -inf }
 0x990   : > { %2340 = vmax.xlane.f32.xlu0 %v2339_v31  ;;  %v2290_v32 = vpop.f32.mrf.mxu1  ;;  %v2333_v33 = vpop.f32.mrf.mxu0 }
 0x991   : > { %v2334_v34 = vadd.f32 %v2333_v33, %v7515_v25  ;;  %v2028_v33 = vadd.f32 %v7623_v51, %v7641_v4 }
 0x992   : > { %v6625_v36 = vpop.f32.mrf.mxu1  ;;  %v6630_v37 = vpop.f32.mrf.mxu0 }
 0x993   : > { %v2342_v38 = vsel %vm1298_vm4, %v2334_v34, -inf  ;;  %v6062_v37 = vld [vmem:[%s7366_s3 + $0x3] ss:$0 sm:$0xff] }
 0x994   : > { %2343 = vmax.xlane.f32.xlu1 %v2342_v38  ;;  %v2336_v41 = vpop.f32.mrf.mxu0 }
 0x996   : > { %v6631_v42 = vpop.f32.mrf.mxu0 }
 0xa19   : > { %v2341_v44 = vpop.xlane.xlu0 %2340 }
 0xa1a   : > { %v2345_v48 = vsub.f32 %v2288_v8, %v2341_v44  ;;  %v2025_v8 = vadd.f32 %v7617_v45, %v7639_v2  ;;  %v6051_v44 = vld [vmem:[%s7356_s30 + $0x3] ss:$0 sm:$0xff] }
 0xa1c   : > { %v2347_v50 = vmul.f32 1.442695, %v2345_v48 }
 0xa1d   : > { %v2344_v52 = vpop.xlane.xlu1 %2343 }
 0xa1e   : > { %7054 = vpow2.f32 %v2347_v50  ;;  %v2346_v54 = vsub.f32 %v2334_v34, %v2344_v52 }
 0xa20   : > { %v2349_v55 = vmul.f32 1.442695, %v2346_v54 }
 0xa22   : > { %7056 = vpow2.f32 %v2349_v55 }
 0xa2b   : > { %v7055_v56 = vpop.eup %7054 }
 0xa2c   : > { %v2351_v57 = vsel %vm1298_vm4, %v7055_v56, 0.0 }
 0xa2d   : > { %2352 = vadd.xlane.f32.xlu0 %v2351_v57 }
 0xa2f   : > { %v7057_v58 = vpop.eup %7056 }
 0xa30   : > { %v2354_v59 = vsel %vm1298_vm4, %v7057_v58, 0.0 }
 0xa31   : > { %2355 = vadd.xlane.f32.xlu1 %v2354_v59 }
 0xab6   : > { %v2353_v60 = vpop.xlane.xlu0 %2352 }
 0xab7   : > { %7058 = vrcp.f32 %v2353_v60 }
 0xaba   : > { %v2356_v61 = vpop.xlane.xlu1 %2355 }
 0xabb   : > { %7060 = vrcp.f32 %v2356_v61 }
 0xac4   : > { %v7059_v62 = vpop.eup %7058 }
 0xac5   : > { %v2359_v63 = vmul.f32 %v7059_v62, %v7055_v56 }
 0xac7   : > { %v2361_v0 = vpack.c.bf16 %v2359_v63, %v2359_v63 }
 0xac8   : > { %v7061_v1 = vpop.eup %7060 }
 0xac9   : > { %6635 = vmatmul.mubr.msk.bf16.vlgmr.msra.gmra.mxu1 %vm1298_vm4, %v2361_v0  ;;  %v2360_v3 = vmul.f32 %v7061_v1, %v7057_v58  ;;  %v6073_v58 = vld [vmem:[%s7376_s26 + $0x3] ss:$0 sm:$0xff] }
 0xaca   : > { %6646 = vmatprep.mubr.msk.bf16.mxu1 %vm7206_vm2, %v7205_v49  ;;  %6645 = vmatpush3.bf16.msra.mxu1 %v2462_v9 }
 0xacb   : > { %v2362_v5 = vpack.c.bf16 %v2360_v3, %v2360_v3  ;;  %6658 = vmatprep.subr.bf16.mxu1 %v7205_v49 }
 0xacd   : > { %6641 = vmatmul.mubr.msk.bf16.vlgmr.msra.gmra.mxu0 %vm1298_vm4, %v2362_v5 }
 0xace   : > { %6654 = vmatprep.mubr.msk.bf16.mxu0 %vm7206_vm2, %v7205_v49  ;;  %6651 = vmatpush3.bf16.msra.mxu0 %v7027_v11 }
 0xacf   : > { %6652 = vmatprep.subr.bf16.mxu0 %v7205_v49 }
 0xad2   : > { %6653 = vmatpush3.bf16.msra.mxu0 %v7029_v12 }
 0xad3   : > { %6666 = vmatprep.subr.bf16.mxu0 %v7205_v49 }
 0xad5   : > { %6655 = vmatmul.mubr.msk.bf16.vlgmr.msra.gmra.mxu0 %vm1097_vm3, %v7476_v53 }
 0xad6   : > { %6670 = vmatprep.mubr.msk.bf16.mxu0 %vm7206_vm2, %v7205_v49  ;;  %6667 = vmatpush3.bf16.msra.mxu0 %v7030_v24 }
 0xad7   : > { %6668 = vmatprep.subr.bf16.mxu0 %v7205_v49 }
 0xada   : > { %6669 = vmatpush3.bf16.msra.mxu0 %v7031_v26 }
 0xadb   : > { %6680 = vmatprep.subr.bf16.mxu0 %v7205_v49 }
 0xadd   : > { %6671 = vmatmul.mubr.msk.bf16.vlgmr.msra.gmra.mxu0 %vm1097_vm3, %v7476_v53 }
 0xade   : > { %6682 = vmatprep.mubr.msk.bf16.mxu0 %vm7206_vm2, %v7205_v49 }
 0xb89   : > { %v2403_v13 = vpop.f32.mrf.mxu1 }
 0xb8b   : > { %v6636_v14 = vpop.f32.mrf.mxu1 }
 0xb8d   : > { %v2406_v15 = vpop.f32.mrf.mxu1  ;;  %v2449_v16 = vpop.f32.mrf.mxu0 }
 0xb8e   : > { %v2455_v18 = vpack.c.bf16 %v2449_v16, %v2403_v13 }
 0xb8f   : > { %v6637_v19 = vpop.f32.mrf.mxu1  ;;  %v6642_v20 = vpop.f32.mrf.mxu0 }
 0xb90   : > { %6647 = vmatmul.mubr.msk.bf16.vlgmr.msra.gmra.mxu1 %vm1298_vm4, %v2455_v18 }
 0xb91   : > { %v2452_v21 = vpop.f32.mrf.mxu0  ;;  %6659 = vmatpush3.bf16.msra.mxu1 %v7026_v17  ;;  %6662 = vmatprep.mubr.msk.bf16.mxu1 %vm7206_vm2, %v7205_v49 }
 0xb92   : > { %6660 = vmatprep.subr.bf16.mxu1 %v7205_v49 }
 0xb93   : > { %v6643_v23 = vpop.f32.mrf.mxu0 }
 0xb95   : > { %6661 = vmatpush3.bf16.msra.mxu1 %v7028_v22  ;;  %v2566_v28 = vpop.f32.mrf.mxu0 }
 0xb96   : > { %6674 = vmatprep.subr.bf16.mxu1 %v7205_v49  ;;  %v2567_v2 = vadd.f32 %v6051_v44, %v2566_v28 }
 0xb97   : > { %v6656_v29 = vpop.f32.mrf.mxu0 }
 0xb98   : > { %6663 = vmatmul.mubr.msk.bf16.vlgmr.msra.gmra.mxu1 %vm1097_vm3, %v7476_v53  ;;  %v6289_v51 = vpack.c.bf16 %v2567_v2, %v2567_v2 }
 0xb99   : > { %6676 = vmatprep.mubr.msk.bf16.mxu1 %vm7206_vm2, %v7205_v49  ;;  %v2569_v30 = vpop.f32.mrf.mxu0 }
 0xb9a   : > { %v2570_v56 = vadd.f32 %v6051_v44, %v2569_v30 }
 0xb9b   : > { %v6657_v6 = vpop.f32.mrf.mxu0 }
 0xb9c   : > { %v6290_v57 = vpack.c.bf16 %v2570_v56, %v2570_v56  ;;  %v6085_v56 = vld [vmem:[%s7381_s22] ss:$0 sm:$0xff] }
 0xb9d   : > { %v2710_v59 = vpop.f32.mrf.mxu0 }
 0xb9e   : > { %v2711_v60 = vadd.f32 %v6073_v58, %v2710_v59 }
 0xb9f   : > { %v6672_v61 = vpop.f32.mrf.mxu0 }
 0xba0   : > { %v6293_v62 = vpack.c.bf16 %v2711_v60, %v2711_v60 }
 0xba1   : > { %v2713_v63 = vpop.f32.mrf.mxu0 }
 0xba2   : > { %v2843_v0 = vsel %vm1418_vm5, %v6293_v62, 0  ;;  %v2714_v1 = vadd.f32 %v6073_v58, %v2713_v63  ;;  %v2992_v58 = vunpack.c.l.bf16 %v7445_v35 }
 0xba3   : > { %v6673_v3 = vpop.f32.mrf.mxu0 }
 0xba4   : > { %v6294_v5 = vpack.c.bf16 %v2714_v1, %v2714_v1 }
 0xba6   : > { %v2889_v7 = vsel %vm1418_vm5, %v6294_v5, 0 }
 0xc50   : > { %v2498_v10 = vpop.f32.mrf.mxu1 }
 0xc51   : > { %v7699_v31 = vadd.f32 %v2498_v10, %v2025_v8 }
 0xc52   : > { %v6648_v32 = vpop.f32.mrf.mxu1 }
 0xc54   : > { %v2501_v34 = vpop.f32.mrf.mxu1 }
 0xc55   : > { %v7703_v36 = vadd.f32 %v2501_v34, %v2028_v33 }
 0xc56   : > { %v6649_v53 = vpop.f32.mrf.mxu1 }
 0xc58   : > { %v2638_v38 = vpop.f32.mrf.mxu1 }
 0xc59   : > { %v2639_v41 = vadd.f32 %v6062_v37, %v2638_v38 }
 0xc5a   : > { %v6664_v42 = vpop.f32.mrf.mxu1 }
 0xc5b   : > { %v6291_v48 = vpack.c.bf16 %v2639_v41, %v2639_v41  ;;  %v6083_v41 = vld [vmem:[%s7386_s21 + $0xc] sm:$0xf] }
 0xc5c   : > { %v2641_v50 = vpop.f32.mrf.mxu1  ;;  %v2938_v42 = vsel %vm1418_vm5, %v6083_v41, 0  ;;  %v7036_v41 = vld [vmem:[%s7411_s18 + $0x8] sm:$0xff]  }
 0xc5d   : > { %v2727_v45 = vsel %vm1298_vm4, %v6291_v48, 0  ;;  %v2642_v52 = vadd.f32 %v6062_v37, %v2641_v50 }
 0xc5e   : > { %v6665_v54 = vpop.f32.mrf.mxu1  ;;  %6675 = vmatpush3.bf16.xpose.msra.mxu1 %v2727_v45 }
 0xc5f   : > { %v6292_v55 = vpack.c.bf16 %v2642_v52, %v2642_v52  ;;  %6686 = vmatprep.subr.bf16.mxu1 %v7205_v49 }
 0xc61   : > { %v2773_v4 = vsel %vm1298_vm4, %v6292_v55, 0 }
 0xc62   : > { %6681 = vmatpush3.bf16.xpose.msra.mxu0 %v2773_v4 }
 0xc63   : > { %6692 = vmatprep.subr.bf16.mxu0 %v7205_v49 }
 0xc65   : > { %6677 = vmatmul.mubr.msk.bf16.vlgmr.msra.gmra.mxu1 %vm1298_vm4, %v6289_v51 }
 0xc66   : > { %6688 = vmatprep.mubr.msk.bf16.mxu1 %vm7206_vm2, %v7205_v49  ;;  %6687 = vmatpush3.bf16.msra.mxu1 %v2843_v0  ;;  %v2993_v0 = vunpack.c.l.bf16 %v7447_v39 }
 0xc67   : > { %6698 = vmatprep.subr.bf16.mxu1 %v7205_v49 }
 0xc69   : > { %6683 = vmatmul.mubr.msk.bf16.vlgmr.msra.gmra.mxu0 %vm1298_vm4, %v6290_v57 }
 0xc6a   : > { %6694 = vmatprep.mubr.msk.bf16.mxu0 %vm7206_vm2, %v7205_v49  ;;  %6693 = vmatpush3.bf16.msra.mxu0 %v2889_v7 }
 0xc6b   : > { %6704 = vmatprep.subr.bf16.mxu0 %v7205_v49 }
 0xd25   : > { %v2763_v9 = vpop.f32.mrf.mxu1 }
 0xd26   : > { %v2764_v11 = vadd.f32 %v2763_v9, %v7518_v27 }
 0xd27   : > { %v6678_v12 = vpop.f32.mrf.mxu1 }
 0xd28   : > { %v2815_v13 = vsel %vm1298_vm4, %v2764_v11, -inf }
 0xd29   : > { %2816 = vmax.xlane.f32.xlu0 %v2815_v13  ;;  %v2766_v14 = vpop.f32.mrf.mxu1  ;;  %v2809_v15 = vpop.f32.mrf.mxu0 }
 0xd2a   : > { %v2810_v16 = vadd.f32 %v2809_v15, %v7515_v25 }
 0xd2b   : > { %v6679_v17 = vpop.f32.mrf.mxu1  ;;  %v6684_v18 = vpop.f32.mrf.mxu0 }
 0xd2c   : > { %v2818_v19 = vsel %vm1298_vm4, %v2810_v16, -inf }
 0xd2d   : > { %2819 = vmax.xlane.f32.xlu1 %v2818_v19  ;;  %v2812_v20 = vpop.f32.mrf.mxu0  ;;  %v7032_v19 = vld [vmem:[%s7401_s27 + $0x8] sm:$0xff]  }
 0xd2e   : > { %v7033_v20 = vld [vmem:[%s7401_s27] sm:$0xff]  }
 0xd2f   : > { %v6685_v21 = vpop.f32.mrf.mxu0 }
 0xdb2   : > { %v2817_v22 = vpop.xlane.xlu0 %2816 }
 0xdb3   : > { %v2821_v23 = vsub.f32 %v2764_v11, %v2817_v22 }
 0xdb5   : > { %v2823_v24 = vmul.f32 1.442695, %v2821_v23 }
 0xdb6   : > { %v2820_v26 = vpop.xlane.xlu1 %2819 }
 0xdb7   : > { %7062 = vpow2.f32 %v2823_v24  ;;  %v2822_v27 = vsub.f32 %v2810_v16, %v2820_v26 }
 0xdb9   : > { %v2825_v28 = vmul.f32 1.442695, %v2822_v27 }
 0xdbb   : > { %7064 = vpow2.f32 %v2825_v28 }
 0xdc4   : > { %v7063_v29 = vpop.eup %7062 }
 0xdc5   : > { %v2827_v30 = vsel %vm1298_vm4, %v7063_v29, 0.0 }
 0xdc6   : > { %2828 = vadd.xlane.f32.xlu0 %v2827_v30  ;;  %v6086_v30 = vld [vmem:[%s7391_s19] ss:$0 sm:$0xff] }
 0xdc8   : > { %v7065_v25 = vpop.eup %7064 }
 0xdc9   : > { %v2830_v6 = vsel %vm1298_vm4, %v7065_v25, 0.0 }
 0xdca   : > { %2831 = vadd.xlane.f32.xlu1 %v2830_v6 }
 0xe4f   : > { %v2829_v8 = vpop.xlane.xlu0 %2828 }
 0xe50   : > { %7066 = vrcp.f32 %v2829_v8 }
 0xe53   : > { %v2832_v10 = vpop.xlane.xlu1 %2831 }
 0xe54   : > { %7068 = vrcp.f32 %v2832_v10  ;;  %v6087_v10 = vld [vmem:[%s7396_s1] ss:$0 sm:$0xff] }
 0xe5d   : > { %v7067_v32 = vpop.eup %7066 }
 0xe5e   : > { %v2835_v33 = vmul.f32 %v7067_v32, %v7063_v29 }
 0xe60   : > { %v2837_v34 = vpack.c.bf16 %v2835_v33, %v2835_v33 }
 0xe61   : > { %v7069_v53 = vpop.eup %7068 }
 0xe62   : > { %6689 = vmatmul.mubr.msk.bf16.vlgmr.msra.gmra.mxu1 %vm1298_vm4, %v2837_v34  ;;  %v2836_v37 = vmul.f32 %v7069_v53, %v7065_v25 }
 0xe63   : > { %6700 = vmatprep.mubr.msk.bf16.mxu1 %vm7206_vm2, %v7205_v49  ;;  %6699 = vmatpush3.bf16.msra.mxu1 %v2938_v42  ;;  %v7037_v42 = vld [vmem:[%s7411_s18] sm:$0xff]  }
 0xe64   : > { %v2838_v38 = vpack.c.bf16 %v2836_v37, %v2836_v37  ;;  %6712 = vmatprep.subr.bf16.mxu1 %v7205_v49  ;;  %v7034_v37 = vld [vmem:[%s7411_s18 + $0x18] sm:$0xff]  }
 0xe66   : > { %6695 = vmatmul.mubr.msk.bf16.vlgmr.msra.gmra.mxu0 %vm1298_vm4, %v2838_v38  ;;  %v7035_v38 = vld [vmem:[%s7411_s18 + $0x10] sm:$0xff]  }
 0xe67   : > { %6708 = vmatprep.mubr.msk.bf16.mxu0 %vm7206_vm2, %v7205_v49  ;;  %6705 = vmatpush3.bf16.msra.mxu0 %v7032_v19 }
 0xe68   : > { %6706 = vmatprep.subr.bf16.mxu0 %v7205_v49 }
 0xe6b   : > { %6707 = vmatpush3.bf16.msra.mxu0 %v7033_v20 }
 0xf22   : > { %v2879_v44 = vpop.f32.mrf.mxu1 }
 0xf24   : > { %v6690_v48 = vpop.f32.mrf.mxu1 }
 0xf26   : > { %v2882_v50 = vpop.f32.mrf.mxu1  ;;  %v2925_v45 = vpop.f32.mrf.mxu0 }
 0xf27   : > { %v2931_v2 = vpack.c.bf16 %v2925_v45, %v2879_v44  ;;  %v6088_v44 = vld [vmem:[%s7406_s4] ss:$0 sm:$0xff] }
 0xf28   : > { %v6691_v52 = vpop.f32.mrf.mxu1  ;;  %v6696_v54 = vpop.f32.mrf.mxu0 }
 0xf29   : > { %6701 = vmatmul.mubr.msk.bf16.vlgmr.msra.gmra.mxu1 %vm1298_vm4, %v2931_v2 }
 0xf2a   : > { %v2928_v55 = vpop.f32.mrf.mxu0  ;;  %6720 = vmatprep.mubr.msk.bf16.mxu1 %vm7206_vm2, %v7205_v49  ;;  %6713 = vmatpush3.bf16.msra.mxu1 %v7034_v37  ;;  %v6098_v37 = vld [vmem:[%s7421_s6] ss:$0 sm:$0xff] }
 0xf2b   : > { %6714 = vmatprep.subr.bf16.mxu1 %v7205_v49 }
 0xf2c   : > { %v6697_v51 = vpop.f32.mrf.mxu0 }
 0xf2e   : > { %6715 = vmatpush3.bf16.msra.mxu1 %v7035_v38 }
 0xf2f   : > { %6716 = vmatprep.subr.bf16.mxu1 %v7205_v49 }
 0xf32   : > { %6717 = vmatpush3.bf16.msra.mxu1 %v7036_v41  ;;  %v6099_v41 = vld [vmem:[%s7426_s14] ss:$0 sm:$0xff] }
 0xf33   : > { %6718 = vmatprep.subr.bf16.mxu1 %v7205_v49 }
 0xf36   : > { %6719 = vmatpush3.bf16.msra.mxu1 %v7037_v42 }
 0xfe9   : > { %v2974_v4 = vpop.f32.mrf.mxu1 }
 0xfea   : > { %v2981_v57 = vadd.f32 %v2974_v4, %v7699_v31 }
 0xfeb   : > { %v6702_v59 = vpop.f32.mrf.mxu1 }
 0xfec   : > { %v2990_v60 = vadd.f32 %v6085_v56, %v2981_v57 }
 0xfed   : > { %v2977_v61 = vpop.f32.mrf.mxu1 }
 0xfee   : > { %v2982_v62 = vadd.f32 %v2977_v61, %v7703_v36  ;;  %v2994_v63 = vadd.f32 %v2992_v58, %v2990_v60 }
 0xfef   : > { %v6703_v1 = vpop.f32.mrf.mxu1 }
 0xff0   : > { %v2991_v3 = vadd.f32 %v6085_v56, %v2982_v62  ;;  %v2998_v5 = vsel %vm1097_vm3, %v2994_v63, 0.0 }
 0xff1   : > { %2999 = vadd.xlane.f32.xlu0 %v2998_v5 }
 0xff2   : > { %v2995_v7 = vadd.f32 %v2993_v0, %v2991_v3 }
 0xff4   : > { %v3001_v9 = vsel %vm1097_vm3, %v2995_v7, 0.0 }
 0xff5   : > { %3002 = vadd.xlane.f32.xlu1 %v3001_v9 }
0x107a   : > { %v3000_v31 = vpop.xlane.xlu0 %2999 }
0x107b   : > { %v3005_v11 = vmul.f32 0.03125, %v3000_v31 }
0x107d   : > { %v3007_v12 = vsub.f32 %v2994_v63, %v3005_v11  ;;  %v6092_v11 = vld [vmem:[%s7416_s24] ss:$0 sm:$0xff] }
0x107e   : > { %v3003_v13 = vpop.xlane.xlu1 %3002 }
0x107f   : > { %v3006_v14 = vmul.f32 0.03125, %v3003_v13  ;;  %v3009_v36 = vmul.f32 %v3007_v12, %v3007_v12 }
0x1081   : > { %v3008_v15 = vsub.f32 %v2995_v7, %v3006_v14  ;;  %v3011_v16 = vsel %vm1097_vm3, %v3009_v36, 0.0 }
0x1082   : > { %3012 = vadd.xlane.f32.xlu0 %v3011_v16 }
0x1083   : > { %v3010_v17 = vmul.f32 %v3008_v15, %v3008_v15 }
0x1085   : > { %v3014_v18 = vsel %vm1097_vm3, %v3010_v17, 0.0 }
0x1086   : > { %3015 = vadd.xlane.f32.xlu1 %v3014_v18 }
0x110b   : > { %v3013_v21 = vpop.xlane.xlu0 %3012 }
0x110c   : > { %v3017_v22 = vmul.f32 0.03125, %v3013_v21 }
0x110e   : > { %v3019_v23 = vadd.f32 1e-12, %v3017_v22 }
0x110f   : > { %v3016_v24 = vpop.xlane.xlu1 %3015 }
0x1110   : > { %7070 = vrsqrt.f32 %v3019_v23  ;;  %v3018_v26 = vmul.f32 0.03125, %v3016_v24 }
0x1112   : > { %v3020_v27 = vadd.f32 1e-12, %v3018_v26 }
0x1114   : > { %7072 = vrsqrt.f32 %v3020_v27 }
0x111d   : > { %v7071_v28 = vpop.eup %7070 }
0x111e   : > { %v3023_v29 = vmul.f32 %v7071_v28, %v3007_v12 }
0x1120   : > { %v3031_v8 = vmul.f32 %v6086_v30, %v3023_v29 }
0x1121   : > { %v7073_v25 = vpop.eup %7072 }
0x1122   : > { %v3024_v6 = vmul.f32 %v7073_v25, %v3008_v15  ;;  %v3039_v33 = vadd.f32 %v6087_v10, %v3031_v8 }
0x1124   : > { %v3032_v32 = vmul.f32 %v6086_v30, %v3024_v6 }
0x1126   : > { %v3040_v34 = vadd.f32 %v6087_v10, %v3032_v32 }
0x1128   : > { %v3041_v53 = vpack.c.bf16 %v3040_v34, %v3039_v33 }
0x112a   : > { %6709 = vmatmul.mubr.msk.bf16.vlgmr.msra.gmra.mxu0 %vm1097_vm3, %v3041_v53 }
0x11ea   : > { %v3102_v48 = vpop.f32.mrf.mxu0 }
0x11eb   : > { %v3103_v50 = vadd.f32 %v6088_v44, %v3102_v48 }
0x11ec   : > { %v6710_v45 = vpop.f32.mrf.mxu0 }
0x11ed   : > { %v3109_v2 = vmul.f32 %v3103_v50, %v3103_v50 }
0x11ee   : > { %v3105_v52 = vpop.f32.mrf.mxu0 }
0x11ef   : > { %v3111_v54 = vmul.f32 %v3109_v2, %v3103_v50  ;;  %v3106_v55 = vadd.f32 %v6088_v44, %v3105_v52 }
0x11f0   : > { %v6711_v51 = vpop.f32.mrf.mxu0 }
0x11f1   : > { %v3113_v4 = vmul.f32 0.044715, %v3111_v54  ;;  %v3110_v56 = vmul.f32 %v3106_v55, %v3106_v55 }
0x11f3   : > { %v3115_v57 = vadd.f32 %v3113_v4, %v3103_v50  ;;  %v3112_v58 = vmul.f32 %v3110_v56, %v3106_v55 }
0x11f5   : > { %v3117_v59 = vmul.f32 0.7978846, %v3115_v57  ;;  %v3114_v60 = vmul.f32 0.044715, %v3112_v58 }
0x11f7   : > { %7074 = vtanh.f32 %v3117_v59  ;;  %v3116_v49 = vadd.f32 %v3114_v60, %v3106_v55 }
0x11f9   : > { %v3118_v61 = vmul.f32 0.7978846, %v3116_v49 }
0x11fb   : > { %7076 = vtanh.f32 %v3118_v61 }
0x1204   : > { %v7075_v62 = vpop.eup %7074 }
0x1205   : > { %v3121_v63 = vadd.f32 1.0, %v7075_v62 }
0x1207   : > { %v3123_v1 = vmul.f32 0.5, %v3121_v63 }
0x1208   : > { %v7077_v0 = vpop.eup %7076 }
0x1209   : > { %v3122_v3 = vadd.f32 1.0, %v7077_v0  ;;  %v3125_v7 = vmul.f32 %v3123_v1, %v3103_v50 }
0x120b   : > { %v3124_v5 = vmul.f32 0.5, %v3122_v3 }
0x120d   : > { %v3126_v9 = vmul.f32 %v3124_v5, %v3106_v55 }
0x120f   : > { %v3127_v31 = vpack.c.bf16 %v3126_v9, %v3125_v7 }
0x1211   : > { %6721 = vmatmul.mubr.msk.bf16.vlgmr.msra.gmra.mxu1 %vm3167_vm6, %v3127_v31 }
0x12d1   : > { %v3205_v12 = vpop.f32.mrf.mxu1 }
0x12d2   : > { %v3206_v13 = vadd.f32 %v6092_v11, %v3205_v12 }
0x12d3   : > { %v6722_v14 = vpop.f32.mrf.mxu1 }
0x12d4   : > { %v3212_v36 = vadd.f32 %v3206_v13, %v3039_v33 }
0x12d5   : > { %v3208_v15 = vpop.f32.mrf.mxu1 }
0x12d6   : > { %v3209_v16 = vadd.f32 %v6092_v11, %v3208_v15  ;;  %v3216_v17 = vsel %vm1097_vm3, %v3212_v36, 0.0 }
0x12d7   : > { %3217 = vadd.xlane.f32.xlu0 %v3216_v17  ;;  %v6723_v18 = vpop.f32.mrf.mxu1 }
0x12d8   : > { %v3213_v19 = vadd.f32 %v3209_v16, %v3040_v34 }
0x12da   : > { %v3219_v20 = vsel %vm1097_vm3, %v3213_v19, 0.0 }
0x12db   : > { %3220 = vadd.xlane.f32.xlu1 %v3219_v20 }
0x1360   : > { %v3218_v21 = vpop.xlane.xlu0 %3217 }
0x1361   : > { %v3222_v22 = vmul.f32 0.03125, %v3218_v21 }
0x1363   : > { %v3224_v23 = vsub.f32 %v3212_v36, %v3222_v22 }
0x1364   : > { %v3221_v24 = vpop.xlane.xlu1 %3220 }
0x1365   : > { %v3223_v26 = vmul.f32 0.03125, %v3221_v24  ;;  %v3226_v27 = vmul.f32 %v3224_v23, %v3224_v23 }
0x1367   : > { %v3225_v28 = vsub.f32 %v3213_v19, %v3223_v26  ;;  %v3228_v29 = vsel %vm1097_vm3, %v3226_v27, 0.0 }
0x1368   : > { %3229 = vadd.xlane.f32.xlu0 %v3228_v29 }
0x1369   : > { %v3227_v30 = vmul.f32 %v3225_v28, %v3225_v28 }
0x136b   : > { %v3231_v25 = vsel %vm1097_vm3, %v3227_v30, 0.0 }
0x136c   : > { %3232 = vadd.xlane.f32.xlu1 %v3231_v25 }
0x13f1   : > { %v3230_v6 = vpop.xlane.xlu0 %3229 }
0x13f2   : > { %v3234_v8 = vmul.f32 0.03125, %v3230_v6 }
0x13f4   : > { %v3236_v10 = vadd.f32 1e-12, %v3234_v8 }
0x13f5   : > { %v3233_v32 = vpop.xlane.xlu1 %3232 }
0x13f6   : > { %7078 = vrsqrt.f32 %v3236_v10  ;;  %v3235_v33 = vmul.f32 0.03125, %v3233_v32 }
0x13f8   : > { %v3237_v34 = vadd.f32 1e-12, %v3235_v33 }
0x13fa   : > { %7080 = vrsqrt.f32 %v3237_v34 }
0x1403   : > { %v7079_v53 = vpop.eup %7078 }
0x1404   : > { %v3240_v38 = vmul.f32 %v7079_v53, %v3224_v23 }
0x1406   : > { %v3248_v42 = vmul.f32 %v6098_v37, %v3240_v38 }
0x1407   : > { %v7081_v44 = vpop.eup %7080 }
0x1408   : > { %v3256_v48 = vadd.f32 %v6099_v41, %v3248_v42  ;;  %v3241_v50 = vmul.f32 %v7081_v44, %v3225_v28 }
0x140a   : > { %v6295_v45 = vpack.c.bf16 %v3256_v48, %v3256_v48  ;;  %v3249_v2 = vmul.f32 %v6098_v37, %v3241_v50 }
0x140c   : > { %3267 = vst.msk [vmem:[#allocation2] sm:$0xf] %vm3266_vm7, %v6295_v45  ;;  %v3257_v52 = vadd.f32 %v6099_v41, %v3249_v2 }
0x140e   : > { %v6296_v54 = vpack.c.bf16 %v3257_v52, %v3257_v52 }
0x1410   : > { %3268 = vst.msk [vmem:[#allocation2 + $0x4] sm:$0xf] %vm3266_vm7, %v6296_v54 }
0x1411 PF: > { %s8202_s10 = sld [smem:[#allocation6_spill]] }
0x1417   : > { %p6102_p7 = scmp.ne.s32.totalorder %s8202_s10, 1 }
0x1419   : > { %3272 = sbr.rel (%p6102_p7) target bundleno = 10142 (0x279e), region = 120 }
0x141e   : > { %v7082_v55 = vld [vmem:[%s7351_s25 + $0x8] sm:$0xff]   ;;  %v6104_v51 = vcombine.low %v7445_v35, %v7445_v35  ;;  %v6105_v4 = vcombine.low %v7447_v39, %v7447_v39  ;;  %v7207_v56 = vmov 0.0   ;;  %v7084_v58 = vld [vmem:[%s7351_s25] sm:$0xff]   ;;  %vm7208_vm8 = vmmov 0  }
0x141f   : > { %6724 = vmatprep.subr.bf16.mxu0 %v7207_v56  ;;  %6732 = vmatprep.subr.bf16.mxu1 %v7207_v56  ;;  %v7083_v57 = vld [vmem:[%s7361_s29 + $0x8] sm:$0xff]   ;;  %v7085_v49 = vld [vmem:[%s7361_s29] sm:$0xff]   ;;  %vm3293_vm9 = vcmask 1041409   ;;  %vm3308_vm10 = vcmask 261120   ;;  %v7791_v0 = vcombine.low %v7445_v35, %v7447_v39  ;;  %vm3519_vm11 = vcmask 64512  }
0x1420   : > { %6725 = vmatpush3.bf16.msra.mxu0 %v7082_v55  ;;  %6728 = vmatprep.mubr.msk.bf16.mxu0 %vm7208_vm8, %v7207_v56  ;;  %v3290_v59 = vunpack.c.l.b16 %v6104_v51  ;;  %v3291_v60 = vunpack.c.l.b16 %v6105_v4  ;;  %v7086_v62 = vld [vmem:[%s7371_s5 + $0x8] sm:$0xff]   ;;  %v7087_v3 = vld [vmem:[%s7371_s5] sm:$0xff]   ;;  %v7818_v23 = vsub.s32 0, %v7449_v40  ;;  %vm3645_vm12 = vcmask 1043456  }
0x1421   : > { %6733 = vmatpush3.bf16.msra.mxu1 %v7083_v57  ;;  %6726 = vmatprep.subr.bf16.mxu0 %v7207_v56  ;;  %v6103_v5 = vld [vmem:[%s7356_s30] ss:$0 sm:$0xff]  ;;  %vm3617_vm13 = vcmask 57344   ;;  %vm5322_vm14 = vcmask 254976   ;;  %vm5493_vm15 = vcmask 523264  }
0x1422   : > { %6734 = vmatprep.subr.bf16.mxu1 %v7207_v56  ;;  %6736 = vmatprep.mubr.msk.bf16.mxu1 %vm7208_vm8, %v7207_v56  ;;  %v3292_v61 = vrot.slane %v3291_v60, 7  ;;  %v6109_v7 = vld [vmem:[%s7366_s3] ss:$0 sm:$0xff] }
0x1423   : > { %v6116_v40 = vld [vmem:[%s7376_s26] ss:$0 sm:$0xff] }
0x1424   : > { %6727 = vmatpush3.bf16.msra.mxu0 %v7084_v58  ;;  %v3294_v63 = vsel %vm3293_vm9, %v3292_v61, %v3290_v59 }
0x1425   : > { %6735 = vmatpush3.bf16.msra.mxu1 %v7085_v49  ;;  %v7793_v1 = vpack.c.b16 %v3294_v63, %v3294_v63  ;;  %6740 = vmatprep.subr.bf16.mxu0 %v7207_v56 }
0x1426   : > { %6748 = vmatprep.subr.bf16.mxu1 %v7207_v56 }
0x1427   : > { %6729 = vmatmul.mubr.msk.bf16.vlgmr.msra.gmra.mxu0 %vm3308_vm10, %v7793_v1 }
0x1428   : > { %6737 = vmatmul.mubr.msk.bf16.vlgmr.msra.gmra.mxu1 %vm3308_vm10, %v7791_v0  ;;  %6741 = vmatpush3.bf16.msra.mxu0 %v7086_v62 }
0x1429   : > { %6742 = vmatprep.subr.bf16.mxu0 %v7207_v56  ;;  %6744 = vmatprep.mubr.msk.bf16.mxu0 %vm7208_vm8, %v7207_v56 }
0x142a   : > { %6750 = vmatprep.mubr.msk.bf16.mxu1 %vm7208_vm8, %v7207_v56 }
0x142c   : > { %6743 = vmatpush3.bf16.msra.mxu0 %v7087_v3 }
0x142d   : > { %6754 = vmatprep.subr.bf16.mxu0 %v7207_v56 }
0x142f   : > { %6745 = vmatmul.mubr.msk.bf16.vlgmr.msra.gmra.mxu0 %vm3308_vm10, %v7791_v0 }
0x1430   : > { %6756 = vmatprep.mubr.msk.bf16.mxu0 %vm7208_vm8, %v7207_v56 }
0x14e7   : > { %v3346_v9 = vpop.f32.mrf.mxu0 }
0x14e8   : > { %v3347_v31 = vadd.f32 %v6103_v5, %v3346_v9  ;;  %v3431_v11 = vpop.f32.mrf.mxu1 }
0x14e9   : > { %v3432_v12 = vadd.f32 %v6109_v7, %v3431_v11  ;;  %v6730_v13 = vpop.f32.mrf.mxu0 }
0x14ea   : > { %v3352_v14 = vpack.c.bf16 %v3347_v31, %v3347_v31  ;;  %v6738_v36 = vpop.f32.mrf.mxu1 }
0x14eb   : > { %v6297_v15 = vpack.c.bf16 %v3432_v12, %v3432_v12  ;;  %v3349_v16 = vpop.f32.mrf.mxu0 }
0x14ec   : > { %v3360_v17 = vrot.slane %v3352_v14, %v7452_v43  ;;  %v3434_v18 = vpop.f32.mrf.mxu1  ;;  %v7088_v14 = vld [vmem:[%s7361_s29 + $0x18] sm:$0xff]  }
0x14ed   : > { %v3524_v19 = vsel %vm3519_vm11, %v6297_v15, 0  ;;  %v3435_v20 = vadd.f32 %v6109_v7, %v3434_v18  ;;  %v6731_v21 = vpop.f32.mrf.mxu0  ;;  %v7090_v18 = vld [vmem:[%s7361_s29 + $0x10] sm:$0xff]  }
0x14ee   : > { %v3367_v22 = vrot.slane %v3360_v17, %v7452_v43  ;;  %v6739_v24 = vpop.f32.mrf.mxu1  ;;  %6749 = vmatpush3.bf16.xpose.msra.mxu1 %v3524_v19  ;;  %v7089_v17 = vld [vmem:[%s7351_s25 + $0x18] sm:$0xff]  }
0x14ef   : > { %v6298_v26 = vpack.c.bf16 %v3435_v20, %v3435_v20  ;;  %6760 = vmatprep.subr.bf16.mxu1 %v7207_v56  ;;  %v3501_v8 = vpop.f32.mrf.mxu0  ;;  %v7091_v20 = vld [vmem:[%s7351_s25 + $0x10] sm:$0xff]   ;;  %v7092_v21 = vld [vmem:[%s7371_s5 + $0x18] sm:$0xff]  }
0x14f0   : > { %v3369_v27 = vunpack.i.h.s16 %v3367_v22  ;;  %v6122_v28 = vpack.i.b16 %v3367_v22, %v3367_v22  ;;  %v3502_v10 = vadd.f32 %v6116_v40, %v3501_v8  ;;  %v7093_v22 = vld [vmem:[%s7371_s5 + $0x10] sm:$0xff]   ;;  %v6141_v8 = vld [vmem:[%s7366_s3 + $0x1] ss:$0 sm:$0xff] }
0x14f1   : > { %v3575_v29 = vsel %vm3519_vm11, %v6298_v26, 0  ;;  %v6746_v32 = vpop.f32.mrf.mxu0 }
0x14f2   : > { %v3518_v30 = vrot.slane %v6122_v28, %v7818_v23  ;;  %v3566_v25 = vpack.i.b16 %v3369_v27, %v3369_v27  ;;  %6755 = vmatpush3.bf16.xpose.msra.mxu0 %v3575_v29  ;;  %v6299_v33 = vpack.c.bf16 %v3502_v10, %v3502_v10 }
0x14f3   : > { %6766 = vmatprep.subr.bf16.mxu0 %v7207_v56  ;;  %v3504_v34 = vpop.f32.mrf.mxu0 }
0x14f4   : > { %v3570_v6 = vrot.slane %v3566_v25, %v7818_v23  ;;  %v3647_v53 = vsel %vm3645_vm12, %v6299_v33, 0  ;;  %v3505_v37 = vadd.f32 %v6116_v40, %v3504_v34 }
0x14f5   : > { %6751 = vmatmul.mubr.msk.bf16.vlgmr.msra.gmra.mxu1 %vm3519_vm11, %v3518_v30  ;;  %v6747_v38 = vpop.f32.mrf.mxu0 }
0x14f6   : > { %6762 = vmatprep.mubr.msk.bf16.mxu1 %vm7208_vm8, %v7207_v56  ;;  %6761 = vmatpush3.bf16.msra.mxu1 %v3647_v53  ;;  %v6300_v41 = vpack.c.bf16 %v3505_v37, %v3505_v37 }
0x14f7   : > { %6772 = vmatprep.subr.bf16.mxu1 %v7207_v56 }
0x14f8   : > { %v3693_v42 = vsel %vm3645_vm12, %v6300_v41, 0 }
0x14f9   : > { %6757 = vmatmul.mubr.msk.bf16.vlgmr.msra.gmra.mxu0 %vm3519_vm11, %v3570_v6 }
0x14fa   : > { %6768 = vmatprep.mubr.msk.bf16.mxu0 %vm7208_vm8, %v7207_v56  ;;  %6767 = vmatpush3.bf16.msra.mxu0 %v3693_v42  ;;  %v6132_v42 = vld [vmem:[%s7356_s30 + $0x1] ss:$0 sm:$0xff] }
0x14fb   : > { %6780 = vmatprep.subr.bf16.mxu0 %v7207_v56 }
0x15b5   : > { %v3560_v44 = vpop.f32.mrf.mxu1 }
0x15b6   : > { %v3561_v55 = vadd.f32 %v3560_v44, %v7456_v46 }
0x15b7   : > { %v6752_v48 = vpop.f32.mrf.mxu1 }
0x15b8   : > { %v3618_v58 = vsel %vm3617_vm13, %v3561_v55, -inf }
0x15b9   : > { %v3563_v50 = vpop.f32.mrf.mxu1  ;;  %v3611_v45 = vpop.f32.mrf.mxu0 }
0x15ba   : > { %v3612_v2 = vadd.f32 %v3611_v45, %v7459_v47 }
0x15bb   : > { %v6753_v52 = vpop.f32.mrf.mxu1  ;;  %v6758_v54 = vpop.f32.mrf.mxu0 }
0x15bc   : > { %v3621_v51 = vsel %vm3617_vm13, %v3612_v2, -inf }
0x15bd   : > { %3622 = vmax.xlane.f32.xlu0 %v3621_v51  ;;  %v3614_v4 = vpop.f32.mrf.mxu0 }
0x15bf   : > { %v6759_v57 = vpop.f32.mrf.mxu0 }
0x15c1   : > { %3619 = vmax.xlane.f32.xlu0 %v3618_v58 }
0x1646   : > { %v3623_v59 = vpop.xlane.xlu0 %3622 }
0x1647   : > { %v3625_v60 = vsub.f32 %v3612_v2, %v3623_v59 }
0x1649   : > { %v3628_v49 = vmul.f32 1.442695, %v3625_v60 }
0x164a   : > { %v3620_v61 = vpop.xlane.xlu0 %3619 }
0x164b   : > { %7114 = vpow2.f32 %v3628_v49  ;;  %v3624_v62 = vsub.f32 %v3561_v55, %v3620_v61 }
0x164d   : > { %v3626_v63 = vmul.f32 1.442695, %v3624_v62 }
0x164f   : > { %7116 = vpow2.f32 %v3626_v63 }
0x1658   : > { %v7115_v3 = vpop.eup %7114 }
0x1659   : > { %v3633_v5 = vsel %vm3617_vm13, %v7115_v3, 0.0 }
0x165a   : > { %3634 = vadd.xlane.f32.xlu1 %v3633_v5 }
0x165c   : > { %v7117_v7 = vpop.eup %7116 }
0x165d   : > { %v3630_v9 = vsel %vm3617_vm13, %v7117_v7, 0.0 }
0x165e   : > { %3631 = vadd.xlane.f32.xlu1 %v3630_v9 }
0x16e3   : > { %v3635_v31 = vpop.xlane.xlu1 %3634 }
0x16e4   : > { %7118 = vrcp.f32 %v3635_v31 }
0x16e7   : > { %v3632_v11 = vpop.xlane.xlu1 %3631 }
0x16e8   : > { %7120 = vrcp.f32 %v3632_v11 }
0x16f1   : > { %v7119_v12 = vpop.eup %7118 }
0x16f2   : > { %v3639_v13 = vmul.f32 %v7119_v12, %v7115_v3 }
0x16f4   : > { %v3641_v36 = vpack.c.bf16 %v3639_v13, %v3639_v13 }
0x16f5   : > { %v7121_v15 = vpop.eup %7120 }
0x16f6   : > { %6769 = vmatmul.mubr.msk.bf16.vlgmr.msra.gmra.mxu0 %vm3519_vm11, %v3641_v36  ;;  %v3638_v16 = vmul.f32 %v7121_v15, %v7117_v7  ;;  %v6152_v7 = vld [vmem:[%s7376_s26 + $0x1] ss:$0 sm:$0xff] }
0x16f7   : > { %6781 = vmatpush3.bf16.msra.mxu0 %v7088_v14  ;;  %6784 = vmatprep.mubr.msk.bf16.mxu0 %vm7208_vm8, %v7207_v56 }
0x16f8   : > { %v3640_v19 = vpack.c.bf16 %v3638_v16, %v3638_v16  ;;  %6782 = vmatprep.subr.bf16.mxu0 %v7207_v56 }
0x16fa   : > { %6763 = vmatmul.mubr.msk.bf16.vlgmr.msra.gmra.mxu1 %vm3519_vm11, %v3640_v19 }
0x16fb   : > { %6773 = vmatpush3.bf16.msra.mxu1 %v7089_v17  ;;  %6783 = vmatpush3.bf16.msra.mxu0 %v7090_v18 }
0x16fc   : > { %6774 = vmatprep.subr.bf16.mxu1 %v7207_v56  ;;  %6776 = vmatprep.mubr.msk.bf16.mxu1 %vm7208_vm8, %v7207_v56 }
0x16fd   : > { %6796 = vmatprep.subr.bf16.mxu0 %v7207_v56 }
0x16fe   : > { %6785 = vmatmul.mubr.msk.bf16.vlgmr.msra.gmra.mxu0 %vm3308_vm10, %v7791_v0 }
0x16ff   : > { %6775 = vmatpush3.bf16.msra.mxu1 %v7091_v20  ;;  %6798 = vmatprep.mubr.msk.bf16.mxu0 %vm7208_vm8, %v7207_v56 }
0x1700   : > { %6788 = vmatprep.subr.bf16.mxu1 %v7207_v56 }
0x1702   : > { %6777 = vmatmul.mubr.msk.bf16.vlgmr.msra.gmra.mxu1 %vm3308_vm10, %v7793_v1 }
0x1703   : > { %6792 = vmatprep.mubr.msk.bf16.mxu1 %vm7208_vm8, %v7207_v56  ;;  %6789 = vmatpush3.bf16.msra.mxu1 %v7092_v21 }
0x1704   : > { %6790 = vmatprep.subr.bf16.mxu1 %v7207_v56 }
0x1707   : > { %6791 = vmatpush3.bf16.msra.mxu1 %v7093_v22 }
0x1708   : > { %6802 = vmatprep.subr.bf16.mxu1 %v7207_v56 }
0x170a   : > { %6793 = vmatmul.mubr.msk.bf16.vlgmr.msra.gmra.mxu1 %vm3308_vm10, %v7791_v0 }
0x170b   : > { %6804 = vmatprep.mubr.msk.bf16.mxu1 %vm7208_vm8, %v7207_v56 }
0x17b6   : > { %v3729_v24 = vpop.f32.mrf.mxu0 }
0x17b7   : > { %v3736_v26 = vpack.c.bf16 %v3729_v24, %v3729_v24 }
0x17b8   : > { %v6770_v27 = vpop.f32.mrf.mxu0 }
0x17b9   : > { %v4243_v28 = vunpack.c.l.b16 %v3736_v26 }
0x17ba   : > { %v3683_v29 = vpop.f32.mrf.mxu1  ;;  %v3732_v30 = vpop.f32.mrf.mxu0 }
0x17bb   : > { %v3735_v25 = vpack.c.bf16 %v3683_v29, %v3683_v29  ;;  %v4244_v10 = vrot.slane %v4243_v28, 7 }
0x17bc   : > { %v6764_v6 = vpop.f32.mrf.mxu1  ;;  %v6771_v40 = vpop.f32.mrf.mxu0 }
0x17bd   : > { %v4242_v32 = vunpack.c.l.b16 %v3735_v25 }
0x17be   : > { %v3686_v33 = vpop.f32.mrf.mxu1  ;;  %v3880_v34 = vpop.f32.mrf.mxu0 }
0x17bf   : > { %v7874_v53 = vsel %vm3293_vm9, %v4244_v10, %v4242_v32  ;;  %v3881_v37 = vadd.f32 %v6141_v8, %v3880_v34 }
0x17c0   : > { %v6765_v38 = vpop.f32.mrf.mxu1  ;;  %v6786_v41 = vpop.f32.mrf.mxu0 }
0x17c1   : > { %v6301_v44 = vpack.c.bf16 %v3881_v37, %v3881_v37 }
0x17c2   : > { %v3797_v48 = vpop.f32.mrf.mxu1  ;;  %v3883_v50 = vpop.f32.mrf.mxu0 }
0x17c3   : > { %v3974_v45 = vsel %vm3519_vm11, %v6301_v44, 0  ;;  %v3798_v2 = vadd.f32 %v6132_v42, %v3797_v48  ;;  %v3884_v52 = vadd.f32 %v6141_v8, %v3883_v50 }
0x17c4   : > { %v6778_v54 = vpop.f32.mrf.mxu1  ;;  %v6787_v55 = vpop.f32.mrf.mxu0  ;;  %6797 = vmatpush3.bf16.xpose.msra.mxu0 %v3974_v45 }
0x17c5   : > { %v3803_v51 = vpack.c.bf16 %v3798_v2, %v3798_v2  ;;  %v6302_v4 = vpack.c.bf16 %v3884_v52, %v3884_v52  ;;  %6808 = vmatprep.subr.bf16.mxu0 %v7207_v56  ;;  %v3737_v2 = vld [vmem:[%s7386_s21] sm:$0xf] }
0x17c6   : > { %v3800_v57 = vpop.f32.mrf.mxu1 }
0x17c7   : > { %v3811_v58 = vrot.slane %v3803_v51, %v7452_v43  ;;  %v4025_v59 = vsel %vm3519_vm11, %v6302_v4, 0  ;;  %v4251_v51 = vsel %vm3645_vm12, %v3737_v2, 0  ;;  %v4246_v4 = vpack.c.b16 %v7874_v53, %v7874_v53  ;;  %v7094_v57 = vld [vmem:[%s7361_s29 + $0x28] sm:$0xff]  }
0x17c8   : > { %v6779_v60 = vpop.f32.mrf.mxu1  ;;  %6803 = vmatpush3.bf16.xpose.msra.mxu1 %v4025_v59  ;;  %v7095_v59 = vld [vmem:[%s7361_s29 + $0x20] sm:$0xff]  }
0x17c9   : > { %v3818_v49 = vrot.slane %v3811_v58, %v7452_v43  ;;  %6814 = vmatprep.subr.bf16.mxu1 %v7207_v56  ;;  %v6163_v58 = vld [vmem:[%s7386_s21 + $0x4] sm:$0xf] }
0x17ca   : > { %v3952_v9 = vpop.f32.mrf.mxu1  ;;  %v4198_v60 = vsel %vm3645_vm12, %v6163_v58, 0  ;;  %v6191_v58 = vld [vmem:[%s7376_s26 + $0x2] ss:$0 sm:$0xff] }
0x17cb   : > { %v3820_v61 = vunpack.i.h.s16 %v3818_v49  ;;  %v6158_v62 = vpack.i.b16 %v3818_v49, %v3818_v49  ;;  %v3953_v31 = vadd.f32 %v6152_v7, %v3952_v9 }
0x17cc   : > { %v6794_v11 = vpop.f32.mrf.mxu1 }
0x17cd   : > { %v3969_v63 = vrot.slane %v6158_v62, %v7818_v23  ;;  %v4016_v3 = vpack.i.b16 %v3820_v61, %v3820_v61  ;;  %v6303_v12 = vpack.c.bf16 %v3953_v31, %v3953_v31 }
0x17ce   : > { %v3955_v13 = vpop.f32.mrf.mxu1 }
0x17cf   : > { %v4020_v5 = vrot.slane %v4016_v3, %v7818_v23  ;;  %6799 = vmatmul.mubr.msk.bf16.vlgmr.msra.gmra.mxu0 %vm3519_vm11, %v3969_v63  ;;  %v4095_v14 = vsel %vm3645_vm12, %v6303_v12, 0  ;;  %v3956_v36 = vadd.f32 %v6152_v7, %v3955_v13 }
0x17d0   : > { %6810 = vmatprep.mubr.msk.bf16.mxu0 %vm7208_vm8, %v7207_v56  ;;  %v6795_v15 = vpop.f32.mrf.mxu1  ;;  %6809 = vmatpush3.bf16.msra.mxu0 %v4095_v14 }
0x17d1   : > { %6805 = vmatmul.mubr.msk.bf16.vlgmr.msra.gmra.mxu1 %vm3519_vm11, %v4020_v5  ;;  %v6304_v16 = vpack.c.bf16 %v3956_v36, %v3956_v36  ;;  %6820 = vmatprep.subr.bf16.mxu0 %v7207_v56  ;;  %v7096_v36 = vld [vmem:[%s7351_s25 + $0x28] sm:$0xff]  }
0x17d2   : > { %6816 = vmatprep.mubr.msk.bf16.mxu1 %vm7208_vm8, %v7207_v56 }
0x17d3   : > { %v4141_v17 = vsel %vm3645_vm12, %v6304_v16, 0 }
0x17d4   : > { %6815 = vmatpush3.bf16.msra.mxu1 %v4141_v17 }
0x17d5   : > { %6826 = vmatprep.subr.bf16.mxu1 %v7207_v56 }
0x188f   : > { %v4010_v18 = vpop.f32.mrf.mxu0 }
0x1890   : > { %v4011_v19 = vadd.f32 %v4010_v18, %v7456_v46  ;;  %v7097_v18 = vld [vmem:[%s7351_s25 + $0x20] sm:$0xff]  }
0x1891   : > { %v6800_v20 = vpop.f32.mrf.mxu0  ;;  %v4061_v21 = vpop.f32.mrf.mxu1 }
0x1892   : > { %v4062_v22 = vadd.f32 %v4061_v21, %v7459_v47  ;;  %v4067_v24 = vsel %vm3617_vm13, %v4011_v19, -inf }
0x1893   : > { %v6806_v26 = vpop.f32.mrf.mxu1  ;;  %4068 = vmax.xlane.f32.xlu1 %v4067_v24  ;;  %v4013_v27 = vpop.f32.mrf.mxu0  ;;  %v6180_v24 = vld [vmem:[%s7366_s3 + $0x2] ss:$0 sm:$0xff] }
0x1894   : > { %v4070_v28 = vsel %vm3617_vm13, %v4062_v22, -inf }
0x1895   : > { %4071 = vmax.xlane.f32.xlu0 %v4070_v28  ;;  %v6801_v29 = vpop.f32.mrf.mxu0  ;;  %v4064_v30 = vpop.f32.mrf.mxu1 }
0x1896   : > { %v7099_v30 = vld [vmem:[%s7371_s5 + $0x20] sm:$0xff]  }
0x1897   : > { %v6807_v25 = vpop.f32.mrf.mxu1 }
0x191c   : > { %v4069_v6 = vpop.xlane.xlu1 %4068 }
0x191d   : > { %v4073_v40 = vsub.f32 %v4011_v19, %v4069_v6 }
0x191e   : > { %v4072_v8 = vpop.xlane.xlu0 %4071 }
0x191f   : > { %v4075_v10 = vmul.f32 1.442695, %v4073_v40  ;;  %v4074_v32 = vsub.f32 %v4062_v22, %v4072_v8  ;;  %v7098_v22 = vld [vmem:[%s7371_s5 + $0x28] sm:$0xff]  }
0x1921   : > { %7122 = vpow2.f32 %v4075_v10  ;;  %v4077_v33 = vmul.f32 1.442695, %v4074_v32 }
0x1923   : > { %7124 = vpow2.f32 %v4077_v33 }
0x192e   : > { %v7123_v34 = vpop.eup %7122 }
0x192f   : > { %v4079_v37 = vsel %vm3617_vm13, %v7123_v34, 0.0 }
0x1930   : > { %v7125_v38 = vpop.eup %7124  ;;  %4080 = vadd.xlane.f32.xlu1 %v4079_v37 }
0x1931   : > { %v4082_v41 = vsel %vm3617_vm13, %v7125_v38, 0.0 }
0x1932   : > { %4083 = vadd.xlane.f32.xlu0 %v4082_v41 }
0x19b9   : > { %v4081_v42 = vpop.xlane.xlu1 %4080 }
0x19ba   : > { %7126 = vrcp.f32 %v4081_v42 }
0x19bb   : > { %v4084_v44 = vpop.xlane.xlu0 %4083 }
0x19bc   : > { %7128 = vrcp.f32 %v4084_v44 }
0x19c7   : > { %v7127_v48 = vpop.eup %7126 }
0x19c8   : > { %v4087_v50 = vmul.f32 %v7127_v48, %v7123_v34 }
0x19c9   : > { %v7129_v45 = vpop.eup %7128 }
0x19ca   : > { %v4089_v52 = vpack.c.bf16 %v4087_v50, %v4087_v50  ;;  %v4088_v54 = vmul.f32 %v7129_v45, %v7125_v38  ;;  %v6171_v38 = vld [vmem:[%s7356_s30 + $0x2] ss:$0 sm:$0xff] }
0x19cc   : > { %6811 = vmatmul.mubr.msk.bf16.vlgmr.msra.gmra.mxu0 %vm3519_vm11, %v4089_v52  ;;  %v4090_v55 = vpack.c.bf16 %v4088_v54, %v4088_v54 }
0x19cd   : > { %6822 = vmatprep.mubr.msk.bf16.mxu0 %vm7208_vm8, %v7207_v56  ;;  %6821 = vmatpush3.bf16.msra.mxu0 %v4198_v60 }
0x19ce   : > { %6817 = vmatmul.mubr.msk.bf16.vlgmr.msra.gmra.mxu1 %vm3519_vm11, %v4090_v55  ;;  %6832 = vmatprep.subr.bf16.mxu0 %v7207_v56 }
0x19cf   : > { %6827 = vmatpush3.bf16.msra.mxu1 %v4251_v51  ;;  %6828 = vmatprep.mubr.msk.bf16.mxu1 %vm7208_vm8, %v7207_v56 }
0x19d0   : > { %6840 = vmatprep.subr.bf16.mxu1 %v7207_v56 }
0x19d6   : > { %6829 = vmatmul.mubr.msk.bf16.vlgmr.msra.gmra.mxu1 %vm3519_vm11, %v4246_v4 }
0x19d7   : > { %6844 = vmatprep.mubr.msk.bf16.mxu1 %vm7208_vm8, %v7207_v56  ;;  %6841 = vmatpush3.bf16.msra.mxu1 %v7094_v57 }
0x19d8   : > { %6842 = vmatprep.subr.bf16.mxu1 %v7207_v56 }
0x19db   : > { %6843 = vmatpush3.bf16.msra.mxu1 %v7095_v59 }
0x19dc   : > { %6856 = vmatprep.subr.bf16.mxu1 %v7207_v56 }
0x19de   : > { %6845 = vmatmul.mubr.msk.bf16.vlgmr.msra.gmra.mxu1 %vm3308_vm10, %v7791_v0 }
0x19df   : > { %6858 = vmatprep.mubr.msk.bf16.mxu1 %vm7208_vm8, %v7207_v56 }
0x1a8c   : > { %v4131_v53 = vpop.f32.mrf.mxu0 }
0x1a8d   : > { %v4183_v62 = vpack.c.bf16 %v4131_v53, %v4131_v53 }
0x1a8e   : > { %v6812_v49 = vpop.f32.mrf.mxu0  ;;  %v4177_v61 = vpop.f32.mrf.mxu1 }
0x1a8f   : > { %v4184_v63 = vpack.c.bf16 %v4177_v61, %v4177_v61  ;;  %v4189_v11 = vunpack.c.l.b16 %v4183_v62 }
0x1a90   : > { %v4134_v3 = vpop.f32.mrf.mxu0  ;;  %v6818_v5 = vpop.f32.mrf.mxu1 }
0x1a91   : > { %v4190_v7 = vunpack.c.l.b16 %v4184_v63 }
0x1a92   : > { %v6813_v9 = vpop.f32.mrf.mxu0  ;;  %v4180_v31 = vpop.f32.mrf.mxu1 }
0x1a93   : > { %v4191_v12 = vrot.slane %v4190_v7, 7 }
0x1a94   : > { %v6819_v13 = vpop.f32.mrf.mxu1 }
0x1a95   : > { %v4192_v14 = vsel %vm3293_vm9, %v4191_v12, %v4189_v11 }
0x1a96   : > { %v4193_v15 = vpack.c.b16 %v4192_v14, %v4192_v14  ;;  %v7929_v16 = vpop.f32.mrf.mxu1 }
0x1a98   : > { %6823 = vmatmul.mubr.msk.bf16.vlgmr.msra.gmra.mxu0 %vm3519_vm11, %v4193_v15  ;;  %v6830_v17 = vpop.f32.mrf.mxu1 }
0x1a99   : > { %6833 = vmatpush3.bf16.msra.mxu0 %v7096_v36  ;;  %6836 = vmatprep.mubr.msk.bf16.mxu0 %vm7208_vm8, %v7207_v56 }
0x1a9a   : > { %v4290_v19 = vpop.f32.mrf.mxu1  ;;  %6834 = vmatprep.subr.bf16.mxu0 %v7207_v56 }
0x1a9c   : > { %v6831_v20 = vpop.f32.mrf.mxu1 }
0x1a9d   : > { %6835 = vmatpush3.bf16.msra.mxu0 %v7097_v18 }
0x1a9e   : > { %6848 = vmatprep.subr.bf16.mxu0 %v7207_v56  ;;  %v4435_v21 = vpop.f32.mrf.mxu1 }
0x1a9f   : > { %v4436_v26 = vadd.f32 %v6180_v24, %v4435_v21 }
0x1aa0   : > { %6837 = vmatmul.mubr.msk.bf16.vlgmr.msra.gmra.mxu0 %vm3308_vm10, %v7793_v1  ;;  %v6846_v27 = vpop.f32.mrf.mxu1 }
0x1aa1   : > { %6852 = vmatprep.mubr.msk.bf16.mxu0 %vm7208_vm8, %v7207_v56  ;;  %6849 = vmatpush3.bf16.msra.mxu0 %v7098_v22  ;;  %v6305_v28 = vpack.c.bf16 %v4436_v26, %v4436_v26 }
0x1aa2   : > { %6850 = vmatprep.subr.bf16.mxu0 %v7207_v56  ;;  %v4438_v29 = vpop.f32.mrf.mxu1 }
0x1aa3   : > { %v4439_v25 = vadd.f32 %v6180_v24, %v4438_v29  ;;  %v4529_v6 = vsel %vm3519_vm11, %v6305_v28, 0 }
0x1aa4   : > { %v6847_v40 = vpop.f32.mrf.mxu1  ;;  %6857 = vmatpush3.bf16.xpose.msra.mxu1 %v4529_v6 }
0x1aa5   : > { %6851 = vmatpush3.bf16.msra.mxu0 %v7099_v30  ;;  %v6306_v8 = vpack.c.bf16 %v4439_v25, %v4439_v25  ;;  %6868 = vmatprep.subr.bf16.mxu1 %v7207_v56 }
0x1aa6   : > { %6862 = vmatprep.subr.bf16.mxu0 %v7207_v56 }
0x1aa7   : > { %v4580_v10 = vsel %vm3519_vm11, %v6306_v8, 0 }
0x1aa8   : > { %6853 = vmatmul.mubr.msk.bf16.vlgmr.msra.gmra.mxu0 %vm3308_vm10, %v7791_v0 }
0x1aa9   : > { %6863 = vmatpush3.bf16.xpose.msra.mxu0 %v4580_v10  ;;  %6864 = vmatprep.mubr.msk.bf16.mxu0 %vm7208_vm8, %v7207_v56 }
0x1aaa   : > { %6874 = vmatprep.subr.bf16.mxu0 %v7207_v56 }
0x1b58   : > { %v7954_v32 = vpop.f32.mrf.mxu0 }
0x1b5a   : > { %v6824_v33 = vpop.f32.mrf.mxu0 }
0x1b5c   : > { %v4237_v34 = vpop.f32.mrf.mxu0 }
0x1b5e   : > { %v6825_v37 = vpop.f32.mrf.mxu0 }
0x1b60   : > { %v4352_v41 = vpop.f32.mrf.mxu0 }
0x1b61   : > { %v4353_v42 = vadd.f32 %v6171_v38, %v4352_v41 }
0x1b62   : > { %v6838_v44 = vpop.f32.mrf.mxu0 }
0x1b63   : > { %v4358_v48 = vpack.c.bf16 %v4353_v42, %v4353_v42  ;;  %v6202_v42 = vld [vmem:[%s7386_s21 + $0x8] sm:$0xf]  ;;  %v7100_v44 = vld [vmem:[%s7351_s25 + $0x38] sm:$0xff]  }
0x1b64   : > { %v4355_v50 = vpop.f32.mrf.mxu0 }
0x1b65   : > { %v4366_v45 = vrot.slane %v4358_v48, %v7452_v43  ;;  %v4753_v48 = vsel %vm3645_vm12, %v6202_v42, 0  ;;  %v7102_v50 = vld [vmem:[%s7351_s25 + $0x30] sm:$0xff]  }
0x1b66   : > { %v6839_v2 = vpop.f32.mrf.mxu0 }
0x1b67   : > { %v4373_v52 = vrot.slane %v4366_v45, %v7452_v43 }
0x1b68   : > { %v4507_v59 = vpop.f32.mrf.mxu0 }
0x1b69   : > { %v4375_v54 = vunpack.i.h.s16 %v4373_v52  ;;  %v6197_v55 = vpack.i.b16 %v4373_v52, %v4373_v52  ;;  %v4508_v60 = vadd.f32 %v6191_v58, %v4507_v59 }
0x1b6a   : > { %v6854_v53 = vpop.f32.mrf.mxu0 }
0x1b6b   : > { %v4524_v51 = vrot.slane %v6197_v55, %v7818_v23  ;;  %v4571_v4 = vpack.i.b16 %v4375_v54, %v4375_v54  ;;  %v6307_v49 = vpack.c.bf16 %v4508_v60, %v4508_v60 }
0x1b6c   : > { %v4510_v61 = vpop.f32.mrf.mxu0 }
0x1b6d   : > { %v4575_v57 = vrot.slane %v4571_v4, %v7818_v23  ;;  %6859 = vmatmul.mubr.msk.bf16.vlgmr.msra.gmra.mxu1 %vm3519_vm11, %v4524_v51  ;;  %v4650_v62 = vsel %vm3645_vm12, %v6307_v49, 0  ;;  %v4511_v63 = vadd.f32 %v6191_v58, %v4510_v61  ;;  %v7101_v61 = vld [vmem:[%s7361_s29 + $0x38] sm:$0xff]  }
0x1b6e   : > { %6870 = vmatprep.mubr.msk.bf16.mxu1 %vm7208_vm8, %v7207_v56  ;;  %v6855_v3 = vpop.f32.mrf.mxu0  ;;  %6869 = vmatpush3.bf16.msra.mxu1 %v4650_v62 }
0x1b6f   : > { %6865 = vmatmul.mubr.msk.bf16.vlgmr.msra.gmra.mxu0 %vm3519_vm11, %v4575_v57  ;;  %v6308_v5 = vpack.c.bf16 %v4511_v63, %v4511_v63  ;;  %6880 = vmatprep.subr.bf16.mxu1 %v7207_v56  ;;  %v7103_v63 = vld [vmem:[%s7361_s29 + $0x30] sm:$0xff]   ;;  %v7104_v3 = vld [vmem:[%s7371_s5 + $0x38] sm:$0xff]  }
0x1b70   : > { %6876 = vmatprep.mubr.msk.bf16.mxu0 %vm7208_vm8, %v7207_v56 }
0x1b71   : > { %v4696_v7 = vsel %vm3645_vm12, %v6308_v5, 0 }
0x1b72   : > { %6875 = vmatpush3.bf16.msra.mxu0 %v4696_v7 }
0x1b73   : > { %6886 = vmatprep.subr.bf16.mxu0 %v7207_v56 }
0x1c2d   : > { %v4565_v9 = vpop.f32.mrf.mxu1 }
0x1c2e   : > { %v4566_v31 = vadd.f32 %v4565_v9, %v7456_v46  ;;  %v7105_v9 = vld [vmem:[%s7371_s5 + $0x30] sm:$0xff]  }
0x1c2f   : > { %v6860_v11 = vpop.f32.mrf.mxu1  ;;  %v4616_v12 = vpop.f32.mrf.mxu0 }
0x1c30   : > { %v4617_v13 = vadd.f32 %v4616_v12, %v7459_v47  ;;  %v4622_v14 = vsel %vm3617_vm13, %v4566_v31, -inf  ;;  %v6209_v12 = vld [vmem:[%s7356_s30 + $0x3] ss:$0 sm:$0xff]  ;;  %s8203_s30 = sld [smem:[#allocation28_spill]] }
0x1c31   : > { %4623 = vmax.xlane.f32.xlu1 %v4622_v14  ;;  %v4568_v36 = vpop.f32.mrf.mxu1  ;;  %v6866_v15 = vpop.f32.mrf.mxu0  ;;  %v4288_v14 = vadd.f32 %v7929_v16, %v7954_v32 }
0x1c32   : > { %v4625_v17 = vsel %vm3617_vm13, %v4617_v13, -inf }
0x1c33   : > { %v6861_v18 = vpop.f32.mrf.mxu1  ;;  %4626 = vmax.xlane.f32.xlu0 %v4625_v17  ;;  %v4619_v19 = vpop.f32.mrf.mxu0 }
0x1c35   : > { %v6867_v20 = vpop.f32.mrf.mxu0 }
0x1cba   : > { %v4624_v21 = vpop.xlane.xlu1 %4623 }
0x1cbb   : > { %v4628_v22 = vsub.f32 %v4566_v31, %v4624_v21 }
0x1cbc   : > { %v4627_v24 = vpop.xlane.xlu0 %4626 }
0x1cbd   : > { %v4630_v26 = vmul.f32 1.442695, %v4628_v22  ;;  %v4629_v27 = vsub.f32 %v4617_v13, %v4627_v24  ;;  %v6218_v22 = vld [vmem:[%s7366_s3 + $0x3] ss:$0 sm:$0xff] }
0x1cbf   : > { %7130 = vpow2.f32 %v4630_v26  ;;  %v4632_v28 = vmul.f32 1.442695, %v4629_v27 }
0x1cc1   : > { %7132 = vpow2.f32 %v4632_v28 }
0x1ccc   : > { %v7131_v29 = vpop.eup %7130 }
0x1ccd   : > { %v4634_v30 = vsel %vm3617_vm13, %v7131_v29, 0.0 }
0x1cce   : > { %v7133_v25 = vpop.eup %7132  ;;  %4635 = vadd.xlane.f32.xlu1 %v4634_v30 }
0x1ccf   : > { %v4637_v6 = vsel %vm3617_vm13, %v7133_v25, 0.0 }
0x1cd0   : > { %4638 = vadd.xlane.f32.xlu0 %v4637_v6 }
0x1d57   : > { %v4636_v40 = vpop.xlane.xlu1 %4635 }
0x1d58   : > { %7134 = vrcp.f32 %v4636_v40 }
0x1d59   : > { %v4639_v8 = vpop.xlane.xlu0 %4638 }
0x1d5a   : > { %7136 = vrcp.f32 %v4639_v8 }
0x1d65   : > { %v7135_v10 = vpop.eup %7134 }
0x1d66   : > { %v4642_v33 = vmul.f32 %v7135_v10, %v7131_v29 }
0x1d67   : > { %v7137_v34 = vpop.eup %7136 }
0x1d68   : > { %v4644_v37 = vpack.c.bf16 %v4642_v33, %v4642_v33  ;;  %v4643_v38 = vmul.f32 %v7137_v34, %v7133_v25  ;;  %v6229_v34 = vld [vmem:[%s7376_s26 + $0x3] ss:$0 sm:$0xff] }
0x1d6a   : > { %6871 = vmatmul.mubr.msk.bf16.vlgmr.msra.gmra.mxu1 %vm3519_vm11, %v4644_v37  ;;  %v4645_v41 = vpack.c.bf16 %v4643_v38, %v4643_v38 }
0x1d6b   : > { %6882 = vmatprep.mubr.msk.bf16.mxu1 %vm7208_vm8, %v7207_v56  ;;  %6881 = vmatpush3.bf16.msra.mxu1 %v4753_v48 }
0x1d6c   : > { %6877 = vmatmul.mubr.msk.bf16.vlgmr.msra.gmra.mxu0 %vm3519_vm11, %v4645_v41  ;;  %6894 = vmatprep.subr.bf16.mxu1 %v7207_v56 }
0x1d6d   : > { %6890 = vmatprep.mubr.msk.bf16.mxu0 %vm7208_vm8, %v7207_v56  ;;  %6887 = vmatpush3.bf16.msra.mxu0 %v7100_v44 }
0x1d6e   : > { %6888 = vmatprep.subr.bf16.mxu0 %v7207_v56 }
0x1d71   : > { %6889 = vmatpush3.bf16.msra.mxu0 %v7102_v50 }
0x1d72   : > { %6902 = vmatprep.subr.bf16.mxu0 %v7207_v56 }
0x1d74   : > { %6891 = vmatmul.mubr.msk.bf16.vlgmr.msra.gmra.mxu0 %vm3308_vm10, %v7793_v1 }
0x1d75   : > { %6906 = vmatprep.mubr.msk.bf16.mxu0 %vm7208_vm8, %v7207_v56  ;;  %6903 = vmatpush3.bf16.msra.mxu0 %v7104_v3 }
0x1d76   : > { %6904 = vmatprep.subr.bf16.mxu0 %v7207_v56 }
0x1d79   : > { %6905 = vmatpush3.bf16.msra.mxu0 %v7105_v9 }
0x1d7a   : > { %6916 = vmatprep.subr.bf16.mxu0 %v7207_v56 }
0x1d7c   : > { %6907 = vmatmul.mubr.msk.bf16.vlgmr.msra.gmra.mxu0 %vm3308_vm10, %v7791_v0 }
0x1d7d   : > { %6918 = vmatprep.mubr.msk.bf16.mxu0 %vm7208_vm8, %v7207_v56 }
0x1e2a   : > { %v4686_v45 = vpop.f32.mrf.mxu1 }
0x1e2b   : > { %v4738_v54 = vpack.c.bf16 %v4686_v45, %v4686_v45 }
0x1e2c   : > { %v6872_v2 = vpop.f32.mrf.mxu1  ;;  %v4732_v52 = vpop.f32.mrf.mxu0 }
0x1e2d   : > { %v4739_v55 = vpack.c.bf16 %v4732_v52, %v4732_v52  ;;  %v4744_v60 = vunpack.c.l.b16 %v4738_v54 }
0x1e2e   : > { %v4689_v51 = vpop.f32.mrf.mxu1  ;;  %v6878_v4 = vpop.f32.mrf.mxu0 }
0x1e2f   : > { %v4745_v57 = vunpack.c.l.b16 %v4739_v55 }
0x1e30   : > { %v6873_v58 = vpop.f32.mrf.mxu1  ;;  %v4735_v59 = vpop.f32.mrf.mxu0 }
0x1e31   : > { %v4746_v53 = vrot.slane %v4745_v57, 7 }
0x1e32   : > { %v6879_v49 = vpop.f32.mrf.mxu0 }
0x1e33   : > { %v4747_v1 = vsel %vm3293_vm9, %v4746_v53, %v4744_v60 }
0x1e34   : > { %v4748_v62 = vpack.c.b16 %v4747_v1, %v4747_v1  ;;  %v4855_v5 = vpop.f32.mrf.mxu0 }
0x1e35   : > { %v4856_v13 = vadd.f32 %v6209_v12, %v4855_v5 }
0x1e36   : > { %6883 = vmatmul.mubr.msk.bf16.vlgmr.msra.gmra.mxu1 %vm3519_vm11, %v4748_v62  ;;  %v6892_v7 = vpop.f32.mrf.mxu0 }
0x1e37   : > { %6895 = vmatpush3.bf16.msra.mxu1 %v7101_v61  ;;  %6898 = vmatprep.mubr.msk.bf16.mxu1 %vm7208_vm8, %v7207_v56  ;;  %v4861_v17 = vpack.c.bf16 %v4856_v13, %v4856_v13 }
0x1e38   : > { %6896 = vmatprep.subr.bf16.mxu1 %v7207_v56  ;;  %v4858_v31 = vpop.f32.mrf.mxu0 }
0x1e39   : > { %v4869_v20 = vrot.slane %v4861_v17, %v7452_v43 }
0x1e3a   : > { %v6893_v11 = vpop.f32.mrf.mxu0 }
0x1e3b   : > { %6897 = vmatpush3.bf16.msra.mxu1 %v7103_v63 }
0x1e3c   : > { %6910 = vmatprep.subr.bf16.mxu1 %v7207_v56  ;;  %v5010_v37 = vpop.f32.mrf.mxu0 }
0x1e3d   : > { %v5011_v38 = vadd.f32 %v6229_v34, %v5010_v37 }
0x1e3e   : > { %6899 = vmatmul.mubr.msk.bf16.vlgmr.msra.gmra.mxu1 %vm3308_vm10, %v7791_v0  ;;  %v4876_v0 = vrot.slane %v4869_v20, %v7452_v43  ;;  %v6908_v41 = vpop.f32.mrf.mxu0  ;;  %v6240_v20 = vld [vmem:[%s7386_s21 + $0xc] sm:$0xf]  ;;  %s8204_s21 = sld [smem:[#allocation29_spill]] }
0x1e3f   : > { %6912 = vmatprep.mubr.msk.bf16.mxu1 %vm7208_vm8, %v7207_v56  ;;  %v6311_v42 = vpack.c.bf16 %v5011_v38, %v5011_v38  ;;  %v5308_v41 = vunpack.c.l.bf16 %v7447_v39 }
0x1e40   : > { %v4878_v30 = vunpack.i.h.s16 %v4876_v0  ;;  %v6235_v25 = vpack.i.b16 %v4876_v0, %v4876_v0  ;;  %v5013_v44 = vpop.f32.mrf.mxu0 }
0x1e41   : > { %v5153_v48 = vsel %vm3645_vm12, %v6311_v42, 0  ;;  %v5014_v50 = vadd.f32 %v6229_v34, %v5013_v44  ;;  %v5307_v44 = vunpack.c.l.bf16 %v7445_v35 }
0x1e42   : > { %v5027_v8 = vrot.slane %v6235_v25, %v7818_v23  ;;  %v5074_v10 = vpack.i.b16 %v4878_v30, %v4878_v30 }
0x1e43   : > { %v6312_v45 = vpack.c.bf16 %v5014_v50, %v5014_v50 }
0x1e44   : > { %v5078_v33 = vrot.slane %v5074_v10, %v7818_v23  ;;  %v6909_v23 = vpop.f32.mrf.mxu0 }
0x1e45   : > { %v5199_v2 = vsel %vm3645_vm12, %v6312_v45, 0 }
0x1ef6   : > { %v4789_v36 = vpop.f32.mrf.mxu1 }
0x1ef7   : > { %v8018_v15 = vadd.f32 %v4789_v36, %v4288_v14 }
0x1ef8   : > { %v6884_v18 = vpop.f32.mrf.mxu1 }
0x1efa   : > { %v4792_v19 = vpop.f32.mrf.mxu1 }
0x1efc   : > { %v6885_v21 = vpop.f32.mrf.mxu1 }
0x1efd   : > { %v5256_v21 = vsel %vm3645_vm12, %v6240_v20, 0 }
0x1efe   : > { %v4938_v24 = vpop.f32.mrf.mxu1 }
0x1eff   : > { %v4939_v26 = vadd.f32 %v6218_v22, %v4938_v24 }
0x1f00   : > { %v6900_v27 = vpop.f32.mrf.mxu1 }
0x1f01   : > { %v6309_v28 = vpack.c.bf16 %v4939_v26, %v4939_v26 }
0x1f02   : > { %v4941_v29 = vpop.f32.mrf.mxu1 }
0x1f03   : > { %v5032_v16 = vsel %vm3519_vm11, %v6309_v28, 0  ;;  %v4942_v32 = vadd.f32 %v6218_v22, %v4941_v29 }
0x1f04   : > { %v6901_v6 = vpop.f32.mrf.mxu1  ;;  %6911 = vmatpush3.bf16.xpose.msra.mxu1 %v5032_v16 }
0x1f05   : > { %v6310_v40 = vpack.c.bf16 %v4942_v32, %v4942_v32  ;;  %6922 = vmatprep.subr.bf16.mxu1 %v7207_v56 }
0x1f07   : > { %v5083_v43 = vsel %vm3519_vm11, %v6310_v40, 0 }
0x1f08   : > { %6917 = vmatpush3.bf16.xpose.msra.mxu0 %v5083_v43 }
0x1f09   : > { %6928 = vmatprep.subr.bf16.mxu0 %v7207_v56 }
0x1f0b   : > { %6913 = vmatmul.mubr.msk.bf16.vlgmr.msra.gmra.mxu1 %vm3519_vm11, %v5027_v8 }
0x1f0c   : > { %6924 = vmatprep.mubr.msk.bf16.mxu1 %vm7208_vm8, %v7207_v56  ;;  %6923 = vmatpush3.bf16.msra.mxu1 %v5153_v48 }
0x1f0d   : > { %6934 = vmatprep.subr.bf16.mxu1 %v7207_v56 }
0x1f0f   : > { %6919 = vmatmul.mubr.msk.bf16.vlgmr.msra.gmra.mxu0 %vm3519_vm11, %v5078_v33  ;;  %v6242_v33 = vld [vmem:[%s7381_s22] ss:$0 sm:$0xff] }
0x1f10   : > { %6930 = vmatprep.mubr.msk.bf16.mxu0 %vm7208_vm8, %v7207_v56  ;;  %6929 = vmatpush3.bf16.msra.mxu0 %v5199_v2 }
0x1f11   : > { %6940 = vmatprep.subr.bf16.mxu0 %v7207_v56 }
0x1fcb   : > { %v5068_v52 = vpop.f32.mrf.mxu1 }
0x1fcc   : > { %v5069_v54 = vadd.f32 %v5068_v52, %v7456_v46 }
0x1fcd   : > { %v6914_v55 = vpop.f32.mrf.mxu1 }
0x1fce   : > { %v5125_v51 = vsel %vm3617_vm13, %v5069_v54, -inf }
0x1fcf   : > { %5126 = vmax.xlane.f32.xlu1 %v5125_v51  ;;  %v5071_v4 = vpop.f32.mrf.mxu1  ;;  %v5119_v57 = vpop.f32.mrf.mxu0 }
0x1fd0   : > { %v5120_v58 = vadd.f32 %v5119_v57, %v7459_v47 }
0x1fd1   : > { %v6915_v59 = vpop.f32.mrf.mxu1  ;;  %v6920_v60 = vpop.f32.mrf.mxu0 }
0x1fd2   : > { %v5128_v53 = vsel %vm3617_vm13, %v5120_v58, -inf }
0x1fd3   : > { %5129 = vmax.xlane.f32.xlu0 %v5128_v53  ;;  %v5122_v49 = vpop.f32.mrf.mxu0  ;;  %v7106_v53 = vld [vmem:[%s7401_s27 + $0x8] sm:$0xff]  }
0x1fd4   : > { %v7107_v49 = vld [vmem:[%s7401_s27] sm:$0xff]  }
0x1fd5   : > { %v6921_v1 = vpop.f32.mrf.mxu0 }
0x2058   : > { %v5127_v61 = vpop.xlane.xlu1 %5126 }
0x2059   : > { %v5131_v62 = vsub.f32 %v5069_v54, %v5127_v61 }
0x205b   : > { %v5133_v63 = vmul.f32 1.442695, %v5131_v62 }
0x205c   : > { %v5130_v3 = vpop.xlane.xlu0 %5129 }
0x205d   : > { %7138 = vpow2.f32 %v5133_v63  ;;  %v5132_v46 = vsub.f32 %v5120_v58, %v5130_v3  ;;  %v6243_v3 = vld [vmem:[%s7391_s19] ss:$0 sm:$0xff] }
0x205f   : > { %v5135_v5 = vmul.f32 1.442695, %v5132_v46 }
0x2061   : > { %7140 = vpow2.f32 %v5135_v5 }
0x206a   : > { %v7139_v7 = vpop.eup %7138 }
0x206b   : > { %v5137_v9 = vsel %vm3617_vm13, %v7139_v7, 0.0 }
0x206c   : > { %5138 = vadd.xlane.f32.xlu1 %v5137_v9 }
0x206e   : > { %v7141_v47 = vpop.eup %7140 }
0x206f   : > { %v5140_v31 = vsel %vm3617_vm13, %v7141_v47, 0.0 }
0x2070   : > { %5141 = vadd.xlane.f32.xlu0 %v5140_v31 }
0x20f5   : > { %v5139_v11 = vpop.xlane.xlu1 %5138 }
0x20f6   : > { %7142 = vrcp.f32 %v5139_v11 }
0x20f9   : > { %v5142_v12 = vpop.xlane.xlu0 %5141 }
0x20fa   : > { %7144 = vrcp.f32 %v5142_v12 }
0x2103   : > { %v7143_v13 = vpop.eup %7142 }
0x2104   : > { %v5145_v14 = vmul.f32 %v7143_v13, %v7139_v7  ;;  %v6244_v7 = vld [vmem:[%s7396_s1] ss:$0 sm:$0xff] }
0x2106   : > { %v5147_v36 = vpack.c.bf16 %v5145_v14, %v5145_v14 }
0x2107   : > { %v7145_v17 = vpop.eup %7144 }
0x2108   : > { %6925 = vmatmul.mubr.msk.bf16.vlgmr.msra.gmra.mxu1 %vm3519_vm11, %v5147_v36  ;;  %v5146_v18 = vmul.f32 %v7145_v17, %v7141_v47 }
0x2109   : > { %6936 = vmatprep.mubr.msk.bf16.mxu1 %vm7208_vm8, %v7207_v56  ;;  %6935 = vmatpush3.bf16.msra.mxu1 %v5256_v21  ;;  %v7108_v21 = vld [vmem:[%s7411_s18 + $0x18] sm:$0xff]  }
0x210a   : > { %v5148_v19 = vpack.c.bf16 %v5146_v18, %v5146_v18  ;;  %6948 = vmatprep.subr.bf16.mxu1 %v7207_v56 }
0x210c   : > { %6931 = vmatmul.mubr.msk.bf16.vlgmr.msra.gmra.mxu0 %vm3519_vm11, %v5148_v19 }
0x210d   : > { %6944 = vmatprep.mubr.msk.bf16.mxu0 %vm7208_vm8, %v7207_v56  ;;  %6941 = vmatpush3.bf16.msra.mxu0 %v7106_v53 }
0x210e   : > { %6942 = vmatprep.subr.bf16.mxu0 %v7207_v56 }
0x2111   : > { %6943 = vmatpush3.bf16.msra.mxu0 %v7107_v49  ;;  %v7112_v49 = vld [vmem:[%s8203_s30 + $0x8] sm:$0xff]  }
0x2112   : > { %6960 = vmatprep.subr.bf16.mxu0 %v7207_v56 }
0x21c8   : > { %v5189_v22 = vpop.f32.mrf.mxu1 }
0x21c9   : > { %v5241_v27 = vpack.c.bf16 %v5189_v22, %v5189_v22  ;;  %v7109_v22 = vld [vmem:[%s7411_s18 + $0x10] sm:$0xff]  }
0x21ca   : > { %v6926_v24 = vpop.f32.mrf.mxu1 }
0x21cb   : > { %v5247_v32 = vunpack.c.l.b16 %v5241_v27  ;;  %v7110_v24 = vld [vmem:[%s7411_s18 + $0x8] sm:$0xff]  }
0x21cc   : > { %v5192_v0 = vpop.f32.mrf.mxu1  ;;  %v5235_v26 = vpop.f32.mrf.mxu0 }
0x21cd   : > { %v5242_v28 = vpack.c.bf16 %v5235_v26, %v5235_v26  ;;  %v7111_v0 = vld [vmem:[%s7411_s18] sm:$0xff]  }
0x21ce   : > { %v6927_v29 = vpop.f32.mrf.mxu1  ;;  %v6932_v30 = vpop.f32.mrf.mxu0  ;;  %v6245_v26 = vld [vmem:[%s7406_s4] ss:$0 sm:$0xff] }
0x21cf   : > { %v5248_v25 = vunpack.c.l.b16 %v5242_v28 }
0x21d0   : > { %v5238_v16 = vpop.f32.mrf.mxu0 }
0x21d1   : > { %v5249_v6 = vrot.slane %v5248_v25, 7 }
0x21d2   : > { %v6933_v40 = vpop.f32.mrf.mxu0 }
0x21d3   : > { %v5250_v8 = vsel %vm3293_vm9, %v5249_v6, %v5247_v32 }
0x21d4   : > { %v5251_v10 = vpack.c.b16 %v5250_v8, %v5250_v8 }
0x21d6   : > { %6937 = vmatmul.mubr.msk.bf16.vlgmr.msra.gmra.mxu1 %vm3519_vm11, %v5251_v10 }
0x21d7   : > { %6956 = vmatprep.mubr.msk.bf16.mxu1 %vm7208_vm8, %v7207_v56  ;;  %6949 = vmatpush3.bf16.msra.mxu1 %v7108_v21  ;;  %v6257_v21 = vld [vmem:[%s8204_s21] ss:$0 sm:$0xff] }
0x21d8   : > { %6950 = vmatprep.subr.bf16.mxu1 %v7207_v56 }
0x21db   : > { %6951 = vmatpush3.bf16.msra.mxu1 %v7109_v22 }
0x21dc   : > { %6952 = vmatprep.subr.bf16.mxu1 %v7207_v56 }
0x21df   : > { %6953 = vmatpush3.bf16.msra.mxu1 %v7110_v24 }
0x21e0   : > { %6954 = vmatprep.subr.bf16.mxu1 %v7207_v56 }
0x21e3   : > { %6955 = vmatpush3.bf16.msra.mxu1 %v7111_v0 }
0x2296   : > { %v5292_v43 = vpop.f32.mrf.mxu1 }
0x2297   : > { %v5298_v34 = vadd.f32 %v5292_v43, %v8018_v15 }
0x2298   : > { %v6938_v37 = vpop.f32.mrf.mxu1 }
0x2299   : > { %v5306_v38 = vadd.f32 %v6242_v33, %v5298_v34 }
0x229a   : > { %v5295_v42 = vpop.f32.mrf.mxu1 }
0x229b   : > { %v5310_v48 = vrot.slane %v5306_v38, 1  ;;  %v5313_v45 = vadd.f32 %v5307_v44, %v5306_v38  ;;  %v6249_v38 = vld [vmem:[%s7416_s24] ss:$0 sm:$0xff] }
0x229c   : > { %v6939_v50 = vpop.f32.mrf.mxu1 }
0x229d   : > { %v5314_v23 = vadd.f32 %v5310_v48, %v5308_v41 }
0x229f   : > { %v5319_v2 = vrot.slane %v5314_v23, 7 }
0x22a1   : > { %v5320_v52 = vsel %vm3293_vm9, %v5319_v2, %v5313_v45 }
0x22a2   : > { %v5323_v54 = vsel %vm5322_vm14, %v5320_v52, 0.0 }
0x22a3   : > { %5324 = vadd.xlane.f32.xlu0 %v5323_v54 }
0x232c   : > { %v5325_v15 = vpop.xlane.xlu0 %5324 }
0x232d   : > { %v5327_v55 = vmul.f32 0.03125, %v5325_v15 }
0x232f   : > { %v5329_v51 = vrot.slane %v5327_v55, 1  ;;  %v5332_v39 = vsub.f32 %v5313_v45, %v5327_v55 }
0x2331   : > { %v5333_v4 = vsub.f32 %v5314_v23, %v5329_v51  ;;  %v5334_v35 = vmul.f32 %v5332_v39, %v5332_v39 }
0x2333   : > { %v5335_v57 = vmul.f32 %v5333_v4, %v5333_v4 }
0x2335   : > { %v5338_v58 = vrot.slane %v5335_v57, 7 }
0x2337   : > { %v5339_v59 = vsel %vm3293_vm9, %v5338_v58, %v5334_v35 }
0x2338   : > { %v5341_v60 = vsel %vm5322_vm14, %v5339_v59, 0.0 }
0x2339   : > { %5342 = vadd.xlane.f32.xlu1 %v5341_v60 }
0x23c2   : > { %v5343_v1 = vpop.xlane.xlu1 %5342 }
0x23c3   : > { %v5344_v61 = vmul.f32 0.03125, %v5343_v1  ;;  %v7113_v1 = vld [vmem:[%s8203_s30] sm:$0xff]  }
0x23c5   : > { %v5345_v62 = vadd.f32 1e-12, %v5344_v61 }
0x23c7   : > { %7146 = vrsqrt.f32 %v5345_v62 }
0x23d4   : > { %v7147_v63 = vpop.eup %7146 }
0x23d5   : > { %v5348_v46 = vrot.slane %v7147_v63, 1  ;;  %v5351_v5 = vmul.f32 %v7147_v63, %v5332_v39 }
0x23d7   : > { %v5352_v9 = vmul.f32 %v5348_v46, %v5333_v4  ;;  %v5359_v47 = vmul.f32 %v6243_v3, %v5351_v5  ;;  %v6255_v46 = vld [vmem:[%s7421_s6] ss:$0 sm:$0xff] }
0x23d9   : > { %v5360_v31 = vmul.f32 %v6243_v3, %v5352_v9  ;;  %v5367_v11 = vadd.f32 %v6244_v7, %v5359_v47  ;;  %v6256_v9 = vld [vmem:[%s7426_s14] ss:$0 sm:$0xff] }
0x23db   : > { %v5368_v12 = vadd.f32 %v6244_v7, %v5360_v31  ;;  %v5369_v13 = vpack.c.bf16 %v5367_v11, %v5367_v11 }
0x23dd   : > { %v5370_v14 = vpack.c.bf16 %v5368_v12, %v5368_v12  ;;  %v5384_v17 = vunpack.c.l.b16 %v5369_v13 }
0x23df   : > { %v5385_v36 = vunpack.c.l.b16 %v5370_v14 }
0x23e1   : > { %v5386_v18 = vrot.slane %v5385_v36, 7 }
0x23e3   : > { %v5387_v19 = vsel %vm3293_vm9, %v5386_v18, %v5384_v17 }
0x23e4   : > { %v5388_v20 = vpack.c.b16 %v5387_v19, %v5387_v19 }
0x23e6   : > { %6945 = vmatmul.mubr.msk.bf16.vlgmr.msra.gmra.mxu0 %vm3308_vm10, %v5388_v20 }
0x23e7   : > { %6964 = vmatprep.mubr.msk.bf16.mxu0 %vm7208_vm8, %v7207_v56  ;;  %6961 = vmatpush3.bf16.msra.mxu0 %v7112_v49 }
0x23e8   : > { %6962 = vmatprep.subr.bf16.mxu0 %v7207_v56 }
0x23eb   : > { %6963 = vmatpush3.bf16.msra.mxu0 %v7113_v1 }
0x24a6   : > { %v5438_v27 = vpop.f32.mrf.mxu0 }
0x24a7   : > { %v5439_v28 = vadd.f32 %v6245_v26, %v5438_v27 }
0x24a8   : > { %v6946_v29 = vpop.f32.mrf.mxu0 }
0x24a9   : > { %v5444_v30 = vmul.f32 %v5439_v28, %v5439_v28 }
0x24aa   : > { %v5441_v25 = vpop.f32.mrf.mxu0 }
0x24ab   : > { %v5445_v16 = vmul.f32 %v5444_v30, %v5439_v28 }
0x24ac   : > { %v6947_v32 = vpop.f32.mrf.mxu0 }
0x24ad   : > { %v5446_v6 = vmul.f32 0.044715, %v5445_v16 }
0x24af   : > { %v5447_v40 = vadd.f32 %v5446_v6, %v5439_v28 }
0x24b1   : > { %v5448_v8 = vmul.f32 0.7978846, %v5447_v40 }
0x24b3   : > { %7148 = vtanh.f32 %v5448_v8 }
0x24c0   : > { %v7149_v10 = vpop.eup %7148 }
0x24c1   : > { %v5450_v43 = vadd.f32 1.0, %v7149_v10 }
0x24c3   : > { %v5451_v33 = vmul.f32 0.5, %v5450_v43 }
0x24c5   : > { %v5452_v34 = vmul.f32 %v5451_v33, %v5439_v28 }
0x24c7   : > { %v5453_v37 = vpack.c.bf16 %v5452_v34, %v5452_v34 }
0x24c9   : > { %6957 = vmatmul.mubr.msk.bf16.vlgmr.msra.gmra.mxu1 %vm5493_vm15, %v5453_v37 }
0x2589   : > { %v5531_v41 = vpop.f32.mrf.mxu1 }
0x258a   : > { %v5532_v42 = vadd.f32 %v6249_v38, %v5531_v41 }
0x258b   : > { %v6958_v44 = vpop.f32.mrf.mxu1 }
0x258c   : > { %v5538_v48 = vrot.slane %v5532_v42, 1  ;;  %v5541_v2 = vadd.f32 %v5532_v42, %v5367_v11 }
0x258d   : > { %v5534_v50 = vpop.f32.mrf.mxu1 }
0x258e   : > { %v5542_v23 = vadd.f32 %v5538_v48, %v5368_v12 }
0x258f   : > { %v6959_v45 = vpop.f32.mrf.mxu1 }
0x2590   : > { %v5547_v52 = vrot.slane %v5542_v23, 7 }
0x2592   : > { %v5548_v54 = vsel %vm3293_vm9, %v5547_v52, %v5541_v2 }
0x2593   : > { %v5550_v15 = vsel %vm5322_vm14, %v5548_v54, 0.0 }
0x2594   : > { %5551 = vadd.xlane.f32.xlu0 %v5550_v15 }
0x261d   : > { %v5552_v55 = vpop.xlane.xlu0 %5551 }
0x261e   : > { %v5553_v51 = vmul.f32 0.03125, %v5552_v55 }
0x2620   : > { %v5555_v39 = vrot.slane %v5553_v51, 1  ;;  %v5558_v4 = vsub.f32 %v5541_v2, %v5553_v51 }
0x2622   : > { %v5559_v57 = vsub.f32 %v5542_v23, %v5555_v39  ;;  %v5560_v58 = vmul.f32 %v5558_v4, %v5558_v4 }
0x2624   : > { %v5561_v35 = vmul.f32 %v5559_v57, %v5559_v57 }
0x2626   : > { %v5564_v59 = vrot.slane %v5561_v35, 7 }
0x2628   : > { %v5565_v60 = vsel %vm3293_vm9, %v5564_v59, %v5560_v58 }
0x2629   : > { %v5567_v53 = vsel %vm5322_vm14, %v5565_v60, 0.0 }
0x262a   : > { %5568 = vadd.xlane.f32.xlu1 %v5567_v53 }
0x26b3   : > { %v5569_v61 = vpop.xlane.xlu1 %5568 }
0x26b4   : > { %v5570_v62 = vmul.f32 0.03125, %v5569_v61 }
0x26b6   : > { %v5571_v63 = vadd.f32 1e-12, %v5570_v62 }
0x26b8   : > { %7150 = vrsqrt.f32 %v5571_v63 }
0x26c5   : > { %v7151_v3 = vpop.eup %7150 }
0x26c6   : > { %v5574_v5 = vrot.slane %v7151_v3, 1  ;;  %v5577_v7 = vmul.f32 %v7151_v3, %v5558_v4 }
0x26c8   : > { %v5578_v47 = vmul.f32 %v5574_v5, %v5559_v57  ;;  %v5585_v31 = vmul.f32 %v6255_v46, %v5577_v7 }
0x26ca   : > { %v5586_v11 = vmul.f32 %v6255_v46, %v5578_v47  ;;  %v5593_v12 = vadd.f32 %v6256_v9, %v5585_v31 }
0x26cc   : > { %v5594_v13 = vadd.f32 %v6256_v9, %v5586_v11  ;;  %v5595_v14 = vpack.c.bf16 %v5593_v12, %v5593_v12 }
0x26ce   : > { %v5596_v36 = vpack.c.bf16 %v5594_v13, %v5594_v13  ;;  %v5610_v18 = vunpack.c.l.b16 %v5595_v14 }
0x26d0   : > { %v5611_v17 = vunpack.c.l.b16 %v5596_v36 }
0x26d2   : > { %v5612_v56 = vrot.slane %v5611_v17, 7 }
0x26d4   : > { %v5613_v19 = vsel %vm3293_vm9, %v5612_v56, %v5610_v18 }
0x26d5   : > { %v5614_v20 = vpack.c.b16 %v5613_v19, %v5613_v19 }
0x26d7   : > { %6965 = vmatmul.mubr.msk.bf16.vlgmr.msra.gmra.mxu0 %vm3308_vm10, %v5614_v20 }
0x2797   : > { %v5664_v22 = vpop.f32.mrf.mxu0 }
0x2798   : > { %v5665_v24 = vadd.f32 %v6257_v21, %v5664_v22 }
0x2799   : > { %v6966_v0 = vpop.f32.mrf.mxu0 }
0x279a   : > { %5670 = vst [vmem:[#allocation3] sm:$0x3] %v5665_v24 }
0x279b   : > { %v5667_v26 = vpop.f32.mrf.mxu0 }
0x279d   : > { %v6967_v27 = vpop.f32.mrf.mxu0 }
0x279e PF: > { %s8205_s14 = sld [smem:[#allocation8_spill]]  ;;  %s7209_s27 = smov [#allocation3]  }
0x279f   : > { %s5680_s4 = sshll.u32 %s7209_s27, 4  ;;  %s5681_s4 = int_to_ptr.vmem [resolvable:$true] %s5680_s4 }
0x27a0   : > { %s7152_s18 = scalar_lea.vmem %s5681_s4, 32  ;;  %p7159_p12 = scmp.lt.s32.totalorder %s5681_s4, %s5681_s4 }
0x27a1   : > { %p7153_p9 = scmp.ne.s32.totalorder %s5681_s4, %s7152_s18  ;;  %p7160_p13 = scmp.lt.s32.totalorder %s7152_s18, %s7152_s18 }
0x27a3   : > { %p7161_p0 = por %p7160_p13, %p7159_p12 }
0x27a4   : > { %s8206_s19 = sadd.s32 4294967295, %s8205_s14  }
0x27a5   : > { %p8106_p8 = scmp.eq.s32.totalorder %s8206_s19, 1 }
0x27a7   : > { %p7154_p10 = pnand %p7153_p9, %p8106_p8 }
0x27a9   : > { %p7155_p11 = pneg %p7154_p10 }
0x27ab   : > { %p7162_p1 = pnand %p7161_p0, %p7155_p11 }
0x27ad   : > { %7165 = shalt.err (!%p7162_p1)
}
0x27ae   : > { %s8208_s20 = sld [smem:[#allocation30_spill]] }
0x27b4   : > { %6969 = dma.vmem_to_hbm [thread:$0]  (%p8106_p8), %s5681_s4, 32, %s8208_s20, [#allocation4]  }
0x27b5   : > { %7189 = dma.done.wait (%p8106_p8), [#allocation4], 32  }
0x27b6   : > { %7191 = vsyncadd (%p8106_p8), [#allocation4], 4294967264 }
0x27b7 PF: > { %s8209_s7 = sld [smem:[#allocation8_spill]] }
0x27b8   : > { %s8210_s3 = sld [smem:[#allocation7_spill]] }
0x27b9   : > { %s8211_s28 = sld [smem:[#allocation9_spill]] }
0x27bd   : > { %s33_s29 = sadd.s32 1, %s8209_s7  }
0x27be   : > { %p30_p2 = scmp.ge.s32.totalorder %s33_s29, 4  }
0x27c0   :  { %32 = sbr.rel (!%p30_p2) target bundleno = 24 (0x18), region = 241 }
0x27c5   :  { %5693 = vsyncpa [#allocation4], 1 }
0x27c6   :  { %5695 = vsyncpa [#allocation4 + $0x1], 1 }

</bundles_post_ra>
